<compile_context>
chip_gen: v7x
topology: tpu7x:2x2x1
jax: 0.10.0
libtpu: 0.0.40
codegen_flags: <defaults>
</compile_context>

<pallas_src>
import functools

import jax
import jax.numpy as jnp
from jax.experimental import pallas as pl
from jax.experimental.pallas import tpu as pltpu


def _round_up(x, m):
    return (x + m - 1) // m * m


# ---------------------------------------------------------------------------
# Fused Pallas kernel: conv1+BN+ReLU -> conv2(s=2)+BN+ReLU -> global avg pool
# ---------------------------------------------------------------------------
def fused_backbone_kernel(x_ref, w1_ref, b1_ref, m1_ref, w2_ref, b2_ref, m2_ref,
                          o_ref, *, wp, n1, n2, c1, c2):
    """Processes one image per grid step, entirely in VMEM.

    x_ref : (1, NX, CIN_P) f32  zero-padded image, flattened row-major with
                                row stride `wp` (real data starts at (+2, +2)).
    w1_ref: (9, CIN_P, C1) bf16 stem 3x3 taps, BN scale folded in.
    b1_ref: (1, C1)        f32  stem folded BN bias.
    m1_ref: (N1, 1)        f32  interior mask: 1 inside the stem output,
                                0 on its +1 zero-padding ring (= conv2 input).
    w2_ref: (9, C1, C2)    bf16 block 3x3 taps, BN scale folded in.
    b2_ref: (1, C2)        f32  block folded BN bias.
    m2_ref: (N2, 1)        f32  stride-2 subsample + GAP weights
                                (1/pool_size at kept positions, 0 elsewhere).
    o_ref : (1, 1, C2)     f32  pooled features for this image.
    """
    x = x_ref[0]                                               # (NX, CIN_P) f32

    # ---- stem conv + folded-BN bias + ReLU, on the padded act1 grid ----------
    acc1 = jnp.zeros((n1, c1), jnp.float32)
    for t in range(9):
        shift = (t // 3) * wp + (t % 3)                        # flat tap offset
        lhs = x[shift:shift + n1, :].astype(jnp.bfloat16)      # (N1, CIN_P)
        acc1 = acc1 + jnp.dot(lhs, w1_ref[t],                  # (CIN_P, C1) bf16
                              preferred_element_type=jnp.float32)
    # bias + ReLU in f32, then zero the padding ring -> conv2's padded input.
    a1p = jnp.maximum(acc1 + b1_ref[...], 0.0) * m1_ref[...]   # (N1, C1) f32

    # ---- block conv (dense stride-1 form) + folded-BN bias + ReLU ------------
    acc2 = jnp.zeros((n2, c2), jnp.float32)
    for t in range(9):
        shift = (t // 3) * wp + (t % 3)
        lhs = a1p[shift:shift + n2, :].astype(jnp.bfloat16)    # (N2, C1)
        acc2 = acc2 + jnp.dot(lhs, w2_ref[t],                  # (C1, C2) bf16
                              preferred_element_type=jnp.float32)
    y2 = jnp.maximum(acc2 + b2_ref[...], 0.0)                  # (N2, C2) f32

    # ---- fused stride-2 subsample + global average pool (masked reduction) ---
    pooled = jnp.sum(y2 * m2_ref[...], axis=0, keepdims=True)  # (1, C2)
    o_ref[...] = pooled.reshape(1, 1, c2)


# ---------------------------------------------------------------------------
# Wrapper: layout plumbing + BN folding + pallas_call
# ---------------------------------------------------------------------------
def fold_bn(gamma, beta, mean, var, eps=1e-5):
    scale = gamma / jnp.sqrt(var + eps)
    return scale, beta - mean * scale


def basic_timm_model_forward(x_nchw, params):
    """x_nchw: (N, 3, H, W) float32 -> pooled backbone features (N, 64)."""
    n, c_in, h, w = x_nchw.shape
    c1 = params["w1"].shape[-1]
    c2 = params["w2"].shape[-1]
    out_h = (h - 1) // 2 + 1            # conv2 (k=3, s=2, p=1) output size
    out_w = (w - 1) // 2 + 1

    # ---- flat-grid geometry (row stride wp; see kernel docstring) ----
    wp = _round_up(w + 3, 8)            # padded row stride, sublane friendly
    n2 = h * wp                         # dense conv2 grid: rows 0..h-1
    n1 = _round_up(n2 + 2 * wp + 2, 8)  # padded-act1 grid (covers conv2 taps)
    nx = _round_up(n1 + 2 * wp + 2, wp)  # flat input length (covers conv1 taps)
    hp = nx // wp
    cin_p = _round_up(c_in, 8)          # zero-pad input channels

    # NCHW -> NHWC, place into a zero canvas at offset (+2, +2), flatten.
    x = jnp.transpose(x_nchw, (0, 2, 3, 1)).astype(jnp.float32)
    canvas = jnp.zeros((n, hp, wp, cin_p), jnp.float32)
    canvas = canvas.at[:, 2:2 + h, 2:2 + w, :c_in].set(x)
    x_flat = canvas.reshape(n, nx, cin_p)

    # ---- fold BN scale into conv weights; bias stays an in-kernel add ----
    s1, b1 = fold_bn(params["g1"], params["b1"], params["m1"], params["v1"])
    s2, b2 = fold_bn(params["g2"], params["b2"], params["m2"], params["v2"])
    w1 = jnp.zeros((9, cin_p, c1), jnp.float32)
    w1 = w1.at[:, :c_in, :].set((params["w1"] * s1).reshape(9, c_in, c1))
    w1 = w1.astype(jnp.bfloat16)
    w2 = (params["w2"] * s2).reshape(9, c1, c2).astype(jnp.bfloat16)
    b1 = b1.reshape(1, c1).astype(jnp.float32)
    b2 = b2.reshape(1, c2).astype(jnp.float32)

    # ---- masks: act1 padding-ring mask + stride-2-subsample/GAP weights ----
    idx1 = jnp.arange(n1)
    p, q = idx1 // wp, idx1 % wp
    mask1 = ((p >= 1) & (p <= h) & (q >= 1) & (q <= w))
    mask1 = mask1.astype(jnp.float32).reshape(n1, 1)
    idx2 = jnp.arange(n2)
    r, c = idx2 // wp, idx2 % wp
    keep = ((r % 2 == 0) & (c % 2 == 0) & (r < h) & (c < w))
    mask2 = (keep.astype(jnp.float32) / float(out_h * out_w)).reshape(n2, 1)

    kernel = functools.partial(fused_backbone_kernel,
                               wp=wp, n1=n1, n2=n2, c1=c1, c2=c2)

    out = pl.pallas_call(
        kernel,
        out_shape=jax.ShapeDtypeStruct((n, 1, c2), jnp.float32),
        grid_spec=pltpu.PrefetchScalarGridSpec(
            num_scalar_prefetch=0,
            grid=(n,),
            in_specs=[
                pl.BlockSpec((1, nx, cin_p), lambda i: (i, 0, 0)),
                pl.BlockSpec((9, cin_p, c1), lambda i: (0, 0, 0)),
                pl.BlockSpec((1, c1), lambda i: (0, 0)),
                pl.BlockSpec((n1, 1), lambda i: (0, 0)),
                pl.BlockSpec((9, c1, c2), lambda i: (0, 0, 0)),
                pl.BlockSpec((1, c2), lambda i: (0, 0)),
                pl.BlockSpec((n2, 1), lambda i: (0, 0)),
            ],
            out_specs=pl.BlockSpec((1, 1, c2), lambda i: (i, 0, 0)),
        ),
        compiler_params=pltpu.CompilerParams(
            dimension_semantics=("parallel",),
            vmem_limit_bytes=32 * 1024 * 1024),
    )(x_flat, w1, b1, mask1, w2, b2, mask2)

    return out.reshape(n, c2)


# ---------------------------------------------------------------------------
# Parameters + pure-JAX reference (for a correctness sanity check)
# ---------------------------------------------------------------------------
def make_params(key):
    k = jax.random.split(key, 8)
    p = {}
    # conv1: 3 -> 32, kernel 3x3, stored [KH, KW, Cin, Cout]
    p["w1"] = jax.random.normal(k[0], (3, 3, 3, 32), jnp.float32) * 0.1
    p["g1"] = 1.0 + 0.01 * jax.random.normal(k[1], (32,), jnp.float32)
    p["b1"] = 0.01 * jax.random.normal(k[2], (32,), jnp.float32)
    p["m1"] = 0.01 * jax.random.normal(k[3], (32,), jnp.float32)
    p["v1"] = jnp.ones((32,), jnp.float32)
    # conv2: 32 -> 64, kernel 3x3, stride 2
    p["w2"] = jax.random.normal(k[4], (3, 3, 32, 64), jnp.float32) * 0.05
    p["g2"] = 1.0 + 0.01 * jax.random.normal(k[5], (64,), jnp.float32)
    p["b2"] = 0.01 * jax.random.normal(k[6], (64,), jnp.float32)
    p["m2"] = 0.01 * jax.random.normal(k[7], (64,), jnp.float32)
    p["v2"] = jnp.ones((64,), jnp.float32)
    return p


def _reference_forward(x_nchw, params):
    """Pure-JAX (XLA) reference of the same stem -> block -> GAP forward."""
    x = jnp.transpose(x_nchw, (0, 2, 3, 1))

    def conv_bn_relu(y, wgt, g, b, m, v, stride):
        y = jax.lax.conv_general_dilated(
            y, wgt, window_strides=(stride, stride), padding=((1, 1), (1, 1)),
            dimension_numbers=("NHWC", "HWIO", "NHWC"),
            precision=jax.lax.Precision.HIGHEST)
        scale = g / jnp.sqrt(v + 1e-5)
        return jnp.maximum(y * scale + (b - m * scale), 0.0)

    y = conv_bn_relu(x, params["w1"], params["g1"], params["b1"],
                     params["m1"], params["v1"], stride=1)
    y = conv_bn_relu(y, params["w2"], params["g2"], params["b2"],
                     params["m2"], params["v2"], stride=2)
    return jnp.mean(y, axis=(1, 2))


if __name__ == "__main__":
    key = jax.random.PRNGKey(0)
    pkey, xkey = jax.random.split(key)
    params = make_params(pkey)

    # small input consistent with the module: batch=2, 3 channels, 16x16 image
    x = jax.random.normal(xkey, (2, 3, 16, 16), jnp.float32)

    feats = jax.jit(basic_timm_model_forward)(x, params)
    jax.block_until_ready(feats)
    assert feats.shape == (2, 64) and feats.dtype == jnp.float32

    ref = _reference_forward(x, params)
    assert jnp.allclose(feats, ref, atol=5e-2, rtol=5e-2), (
        float(jnp.max(jnp.abs(feats - ref))))
    print("KERNEL_OK")
</pallas_src>

<mosaic_0001>
module attributes {stable_mosaic.version = 11 : i64} {
  func.func @fused_backbone_kernel(%arg0: i32, %arg1: memref<1x504x8xf32, #tpu.memory_space<vmem>>, %arg2: memref<9x8x32xbf16, #tpu.memory_space<vmem>>, %arg3: memref<1x32xf32, #tpu.memory_space<vmem>>, %arg4: memref<440x1xf32, #tpu.memory_space<vmem>>, %arg5: memref<9x32x64xbf16, #tpu.memory_space<vmem>>, %arg6: memref<1x64xf32, #tpu.memory_space<vmem>>, %arg7: memref<384x1xf32, #tpu.memory_space<vmem>>, %arg8: memref<1x1x64xf32, #tpu.memory_space<vmem>>) attributes {dimension_semantics = [#tpu.dimension_semantics<parallel>], iteration_bounds = array<i64: 2>, scalar_prefetch = 0 : i64, scratch_operands = 0 : i64, tpu.core_type = #tpu.core_type<tc>, window_params = [{transform_indices = @transform_0, window_bounds = array<i64: 1, 504, 8>}, {pipeline_mode = #tpu.pipeline_mode<synchronous>, transform_indices = @transform_1, window_bounds = array<i64: 9, 8, 32>}, {pipeline_mode = #tpu.pipeline_mode<synchronous>, transform_indices = @transform_2, window_bounds = array<i64: 1, 32>}, {pipeline_mode = #tpu.pipeline_mode<synchronous>, transform_indices = @transform_3, window_bounds = array<i64: 440, 1>}, {pipeline_mode = #tpu.pipeline_mode<synchronous>, transform_indices = @transform_4, window_bounds = array<i64: 9, 32, 64>}, {pipeline_mode = #tpu.pipeline_mode<synchronous>, transform_indices = @transform_5, window_bounds = array<i64: 1, 64>}, {pipeline_mode = #tpu.pipeline_mode<synchronous>, transform_indices = @transform_6, window_bounds = array<i64: 384, 1>}, {transform_indices = @transform_7, window_bounds = array<i64: 1, 1, 64>}]} {
    %c0 = arith.constant 0 : index
    %c0_0 = arith.constant 0 : index
    %c0_1 = arith.constant 0 : index
    %0 = vector.load %arg1[%c0, %c0_0, %c0_1] : memref<1x504x8xf32, #tpu.memory_space<vmem>>, vector<1x504x8xf32>
    %1 = vector.shape_cast %0 : vector<1x504x8xf32> to vector<504x8xf32>
    %cst = arith.constant 0.000000e+00 : f32
    %2 = vector.broadcast %cst : f32 to vector<440x32xf32>
    %3 = vector.extract_strided_slice %1 {offsets = [0, 0], sizes = [440, 8], strides = [1, 1]} : vector<504x8xf32> to vector<440x8xf32>
    %4 = arith.truncf %3 : vector<440x8xf32> to vector<440x8xbf16>
    %c0_2 = arith.constant 0 : index
    %c0_3 = arith.constant 0 : index
    %c0_4 = arith.constant 0 : index
    %5 = vector.load %arg2[%c0_2, %c0_3, %c0_4] : memref<9x8x32xbf16, #tpu.memory_space<vmem>>, vector<1x8x32xbf16>
    %6 = vector.shape_cast %5 : vector<1x8x32xbf16> to vector<8x32xbf16>
    %cst_5 = arith.constant dense<0.000000e+00> : vector<440x32xf32>
    %7 = tpu.matmul %4, %6, %cst_5 {dimension_numbers = #tpu.dot_dimension_numbers<[1], [0], [0], [1], [0, 0, 1, 1], [], []>} : vector<440x8xbf16>, vector<8x32xbf16>, vector<440x32xf32> -> vector<440x32xf32>
    %8 = arith.addf %2, %7 : vector<440x32xf32>
    %9 = vector.extract_strided_slice %1 {offsets = [1, 0], sizes = [440, 8], strides = [1, 1]} : vector<504x8xf32> to vector<440x8xf32>
    %10 = arith.truncf %9 : vector<440x8xf32> to vector<440x8xbf16>
    %c1 = arith.constant 1 : index
    %c0_6 = arith.constant 0 : index
    %c0_7 = arith.constant 0 : index
    %11 = vector.load %arg2[%c1, %c0_6, %c0_7] : memref<9x8x32xbf16, #tpu.memory_space<vmem>>, vector<1x8x32xbf16>
    %12 = vector.shape_cast %11 : vector<1x8x32xbf16> to vector<8x32xbf16>
    %cst_8 = arith.constant dense<0.000000e+00> : vector<440x32xf32>
    %13 = tpu.matmul %10, %12, %cst_8 {dimension_numbers = #tpu.dot_dimension_numbers<[1], [0], [0], [1], [0, 0, 1, 1], [], []>} : vector<440x8xbf16>, vector<8x32xbf16>, vector<440x32xf32> -> vector<440x32xf32>
    %14 = arith.addf %8, %13 : vector<440x32xf32>
    %15 = vector.extract_strided_slice %1 {offsets = [2, 0], sizes = [440, 8], strides = [1, 1]} : vector<504x8xf32> to vector<440x8xf32>
    %16 = arith.truncf %15 : vector<440x8xf32> to vector<440x8xbf16>
    %c2 = arith.constant 2 : index
    %c0_9 = arith.constant 0 : index
    %c0_10 = arith.constant 0 : index
    %17 = vector.load %arg2[%c2, %c0_9, %c0_10] : memref<9x8x32xbf16, #tpu.memory_space<vmem>>, vector<1x8x32xbf16>
    %18 = vector.shape_cast %17 : vector<1x8x32xbf16> to vector<8x32xbf16>
    %cst_11 = arith.constant dense<0.000000e+00> : vector<440x32xf32>
    %19 = tpu.matmul %16, %18, %cst_11 {dimension_numbers = #tpu.dot_dimension_numbers<[1], [0], [0], [1], [0, 0, 1, 1], [], []>} : vector<440x8xbf16>, vector<8x32xbf16>, vector<440x32xf32> -> vector<440x32xf32>
    %20 = arith.addf %14, %19 : vector<440x32xf32>
    %21 = vector.extract_strided_slice %1 {offsets = [24, 0], sizes = [440, 8], strides = [1, 1]} : vector<504x8xf32> to vector<440x8xf32>
    %22 = arith.truncf %21 : vector<440x8xf32> to vector<440x8xbf16>
    %c3 = arith.constant 3 : index
    %c0_12 = arith.constant 0 : index
    %c0_13 = arith.constant 0 : index
    %23 = vector.load %arg2[%c3, %c0_12, %c0_13] : memref<9x8x32xbf16, #tpu.memory_space<vmem>>, vector<1x8x32xbf16>
    %24 = vector.shape_cast %23 : vector<1x8x32xbf16> to vector<8x32xbf16>
    %cst_14 = arith.constant dense<0.000000e+00> : vector<440x32xf32>
    %25 = tpu.matmul %22, %24, %cst_14 {dimension_numbers = #tpu.dot_dimension_numbers<[1], [0], [0], [1], [0, 0, 1, 1], [], []>} : vector<440x8xbf16>, vector<8x32xbf16>, vector<440x32xf32> -> vector<440x32xf32>
    %26 = arith.addf %20, %25 : vector<440x32xf32>
    %27 = vector.extract_strided_slice %1 {offsets = [25, 0], sizes = [440, 8], strides = [1, 1]} : vector<504x8xf32> to vector<440x8xf32>
    %28 = arith.truncf %27 : vector<440x8xf32> to vector<440x8xbf16>
    %c4 = arith.constant 4 : index
    %c0_15 = arith.constant 0 : index
    %c0_16 = arith.constant 0 : index
    %29 = vector.load %arg2[%c4, %c0_15, %c0_16] : memref<9x8x32xbf16, #tpu.memory_space<vmem>>, vector<1x8x32xbf16>
    %30 = vector.shape_cast %29 : vector<1x8x32xbf16> to vector<8x32xbf16>
    %cst_17 = arith.constant dense<0.000000e+00> : vector<440x32xf32>
    %31 = tpu.matmul %28, %30, %cst_17 {dimension_numbers = #tpu.dot_dimension_numbers<[1], [0], [0], [1], [0, 0, 1, 1], [], []>} : vector<440x8xbf16>, vector<8x32xbf16>, vector<440x32xf32> -> vector<440x32xf32>
    %32 = arith.addf %26, %31 : vector<440x32xf32>
    %33 = vector.extract_strided_slice %1 {offsets = [26, 0], sizes = [440, 8], strides = [1, 1]} : vector<504x8xf32> to vector<440x8xf32>
    %34 = arith.truncf %33 : vector<440x8xf32> to vector<440x8xbf16>
    %c5 = arith.constant 5 : index
    %c0_18 = arith.constant 0 : index
    %c0_19 = arith.constant 0 : index
    %35 = vector.load %arg2[%c5, %c0_18, %c0_19] : memref<9x8x32xbf16, #tpu.memory_space<vmem>>, vector<1x8x32xbf16>
    %36 = vector.shape_cast %35 : vector<1x8x32xbf16> to vector<8x32xbf16>
    %cst_20 = arith.constant dense<0.000000e+00> : vector<440x32xf32>
    %37 = tpu.matmul %34, %36, %cst_20 {dimension_numbers = #tpu.dot_dimension_numbers<[1], [0], [0], [1], [0, 0, 1, 1], [], []>} : vector<440x8xbf16>, vector<8x32xbf16>, vector<440x32xf32> -> vector<440x32xf32>
    %38 = arith.addf %32, %37 : vector<440x32xf32>
    %39 = vector.extract_strided_slice %1 {offsets = [48, 0], sizes = [440, 8], strides = [1, 1]} : vector<504x8xf32> to vector<440x8xf32>
    %40 = arith.truncf %39 : vector<440x8xf32> to vector<440x8xbf16>
    %c6 = arith.constant 6 : index
    %c0_21 = arith.constant 0 : index
    %c0_22 = arith.constant 0 : index
    %41 = vector.load %arg2[%c6, %c0_21, %c0_22] : memref<9x8x32xbf16, #tpu.memory_space<vmem>>, vector<1x8x32xbf16>
    %42 = vector.shape_cast %41 : vector<1x8x32xbf16> to vector<8x32xbf16>
    %cst_23 = arith.constant dense<0.000000e+00> : vector<440x32xf32>
    %43 = tpu.matmul %40, %42, %cst_23 {dimension_numbers = #tpu.dot_dimension_numbers<[1], [0], [0], [1], [0, 0, 1, 1], [], []>} : vector<440x8xbf16>, vector<8x32xbf16>, vector<440x32xf32> -> vector<440x32xf32>
    %44 = arith.addf %38, %43 : vector<440x32xf32>
    %45 = vector.extract_strided_slice %1 {offsets = [49, 0], sizes = [440, 8], strides = [1, 1]} : vector<504x8xf32> to vector<440x8xf32>
    %46 = arith.truncf %45 : vector<440x8xf32> to vector<440x8xbf16>
    %c7 = arith.constant 7 : index
    %c0_24 = arith.constant 0 : index
    %c0_25 = arith.constant 0 : index
    %47 = vector.load %arg2[%c7, %c0_24, %c0_25] : memref<9x8x32xbf16, #tpu.memory_space<vmem>>, vector<1x8x32xbf16>
    %48 = vector.shape_cast %47 : vector<1x8x32xbf16> to vector<8x32xbf16>
    %cst_26 = arith.constant dense<0.000000e+00> : vector<440x32xf32>
    %49 = tpu.matmul %46, %48, %cst_26 {dimension_numbers = #tpu.dot_dimension_numbers<[1], [0], [0], [1], [0, 0, 1, 1], [], []>} : vector<440x8xbf16>, vector<8x32xbf16>, vector<440x32xf32> -> vector<440x32xf32>
    %50 = arith.addf %44, %49 : vector<440x32xf32>
    %51 = vector.extract_strided_slice %1 {offsets = [50, 0], sizes = [440, 8], strides = [1, 1]} : vector<504x8xf32> to vector<440x8xf32>
    %52 = arith.truncf %51 : vector<440x8xf32> to vector<440x8xbf16>
    %c8 = arith.constant 8 : index
    %c0_27 = arith.constant 0 : index
    %c0_28 = arith.constant 0 : index
    %53 = vector.load %arg2[%c8, %c0_27, %c0_28] : memref<9x8x32xbf16, #tpu.memory_space<vmem>>, vector<1x8x32xbf16>
    %54 = vector.shape_cast %53 : vector<1x8x32xbf16> to vector<8x32xbf16>
    %cst_29 = arith.constant dense<0.000000e+00> : vector<440x32xf32>
    %55 = tpu.matmul %52, %54, %cst_29 {dimension_numbers = #tpu.dot_dimension_numbers<[1], [0], [0], [1], [0, 0, 1, 1], [], []>} : vector<440x8xbf16>, vector<8x32xbf16>, vector<440x32xf32> -> vector<440x32xf32>
    %56 = arith.addf %50, %55 : vector<440x32xf32>
    %c0_30 = arith.constant 0 : index
    %c0_31 = arith.constant 0 : index
    %57 = vector.load %arg3[%c0_30, %c0_31] : memref<1x32xf32, #tpu.memory_space<vmem>>, vector<1x32xf32>
    %58 = vector.broadcast %57 : vector<1x32xf32> to vector<440x32xf32>
    %59 = arith.addf %56, %58 : vector<440x32xf32>
    %cst_32 = arith.constant 0.000000e+00 : f32
    %60 = vector.broadcast %cst_32 : f32 to vector<440x32xf32>
    %61 = arith.maximumf %59, %60 : vector<440x32xf32>
    %c0_33 = arith.constant 0 : index
    %c0_34 = arith.constant 0 : index
    %62 = vector.load %arg4[%c0_33, %c0_34] : memref<440x1xf32, #tpu.memory_space<vmem>>, vector<440x1xf32>
    %63 = vector.broadcast %62 : vector<440x1xf32> to vector<440x32xf32>
    %64 = arith.mulf %61, %63 : vector<440x32xf32>
    %cst_35 = arith.constant 0.000000e+00 : f32
    %65 = vector.broadcast %cst_35 : f32 to vector<384x64xf32>
    %66 = vector.extract_strided_slice %64 {offsets = [0, 0], sizes = [384, 32], strides = [1, 1]} : vector<440x32xf32> to vector<384x32xf32>
    %67 = arith.truncf %66 : vector<384x32xf32> to vector<384x32xbf16>
    %c0_36 = arith.constant 0 : index
    %c0_37 = arith.constant 0 : index
    %c0_38 = arith.constant 0 : index
    %68 = vector.load %arg5[%c0_36, %c0_37, %c0_38] : memref<9x32x64xbf16, #tpu.memory_space<vmem>>, vector<1x32x64xbf16>
    %69 = vector.shape_cast %68 : vector<1x32x64xbf16> to vector<32x64xbf16>
    %cst_39 = arith.constant dense<0.000000e+00> : vector<384x64xf32>
    %70 = tpu.matmul %67, %69, %cst_39 {dimension_numbers = #tpu.dot_dimension_numbers<[1], [0], [0], [1], [0, 0, 1, 1], [], []>} : vector<384x32xbf16>, vector<32x64xbf16>, vector<384x64xf32> -> vector<384x64xf32>
    %71 = arith.addf %65, %70 : vector<384x64xf32>
    %72 = vector.extract_strided_slice %64 {offsets = [1, 0], sizes = [384, 32], strides = [1, 1]} : vector<440x32xf32> to vector<384x32xf32>
    %73 = arith.truncf %72 : vector<384x32xf32> to vector<384x32xbf16>
    %c1_40 = arith.constant 1 : index
    %c0_41 = arith.constant 0 : index
    %c0_42 = arith.constant 0 : index
    %74 = vector.load %arg5[%c1_40, %c0_41, %c0_42] : memref<9x32x64xbf16, #tpu.memory_space<vmem>>, vector<1x32x64xbf16>
    %75 = vector.shape_cast %74 : vector<1x32x64xbf16> to vector<32x64xbf16>
    %cst_43 = arith.constant dense<0.000000e+00> : vector<384x64xf32>
    %76 = tpu.matmul %73, %75, %cst_43 {dimension_numbers = #tpu.dot_dimension_numbers<[1], [0], [0], [1], [0, 0, 1, 1], [], []>} : vector<384x32xbf16>, vector<32x64xbf16>, vector<384x64xf32> -> vector<384x64xf32>
    %77 = arith.addf %71, %76 : vector<384x64xf32>
    %78 = vector.extract_strided_slice %64 {offsets = [2, 0], sizes = [384, 32], strides = [1, 1]} : vector<440x32xf32> to vector<384x32xf32>
    %79 = arith.truncf %78 : vector<384x32xf32> to vector<384x32xbf16>
    %c2_44 = arith.constant 2 : index
    %c0_45 = arith.constant 0 : index
    %c0_46 = arith.constant 0 : index
    %80 = vector.load %arg5[%c2_44, %c0_45, %c0_46] : memref<9x32x64xbf16, #tpu.memory_space<vmem>>, vector<1x32x64xbf16>
    %81 = vector.shape_cast %80 : vector<1x32x64xbf16> to vector<32x64xbf16>
    %cst_47 = arith.constant dense<0.000000e+00> : vector<384x64xf32>
    %82 = tpu.matmul %79, %81, %cst_47 {dimension_numbers = #tpu.dot_dimension_numbers<[1], [0], [0], [1], [0, 0, 1, 1], [], []>} : vector<384x32xbf16>, vector<32x64xbf16>, vector<384x64xf32> -> vector<384x64xf32>
    %83 = arith.addf %77, %82 : vector<384x64xf32>
    %84 = vector.extract_strided_slice %64 {offsets = [24, 0], sizes = [384, 32], strides = [1, 1]} : vector<440x32xf32> to vector<384x32xf32>
    %85 = arith.truncf %84 : vector<384x32xf32> to vector<384x32xbf16>
    %c3_48 = arith.constant 3 : index
    %c0_49 = arith.constant 0 : index
    %c0_50 = arith.constant 0 : index
    %86 = vector.load %arg5[%c3_48, %c0_49, %c0_50] : memref<9x32x64xbf16, #tpu.memory_space<vmem>>, vector<1x32x64xbf16>
    %87 = vector.shape_cast %86 : vector<1x32x64xbf16> to vector<32x64xbf16>
    %cst_51 = arith.constant dense<0.000000e+00> : vector<384x64xf32>
    %88 = tpu.matmul %85, %87, %cst_51 {dimension_numbers = #tpu.dot_dimension_numbers<[1], [0], [0], [1], [0, 0, 1, 1], [], []>} : vector<384x32xbf16>, vector<32x64xbf16>, vector<384x64xf32> -> vector<384x64xf32>
    %89 = arith.addf %83, %88 : vector<384x64xf32>
    %90 = vector.extract_strided_slice %64 {offsets = [25, 0], sizes = [384, 32], strides = [1, 1]} : vector<440x32xf32> to vector<384x32xf32>
    %91 = arith.truncf %90 : vector<384x32xf32> to vector<384x32xbf16>
    %c4_52 = arith.constant 4 : index
    %c0_53 = arith.constant 0 : index
    %c0_54 = arith.constant 0 : index
    %92 = vector.load %arg5[%c4_52, %c0_53, %c0_54] : memref<9x32x64xbf16, #tpu.memory_space<vmem>>, vector<1x32x64xbf16>
    %93 = vector.shape_cast %92 : vector<1x32x64xbf16> to vector<32x64xbf16>
    %cst_55 = arith.constant dense<0.000000e+00> : vector<384x64xf32>
    %94 = tpu.matmul %91, %93, %cst_55 {dimension_numbers = #tpu.dot_dimension_numbers<[1], [0], [0], [1], [0, 0, 1, 1], [], []>} : vector<384x32xbf16>, vector<32x64xbf16>, vector<384x64xf32> -> vector<384x64xf32>
    %95 = arith.addf %89, %94 : vector<384x64xf32>
    %96 = vector.extract_strided_slice %64 {offsets = [26, 0], sizes = [384, 32], strides = [1, 1]} : vector<440x32xf32> to vector<384x32xf32>
    %97 = arith.truncf %96 : vector<384x32xf32> to vector<384x32xbf16>
    %c5_56 = arith.constant 5 : index
    %c0_57 = arith.constant 0 : index
    %c0_58 = arith.constant 0 : index
    %98 = vector.load %arg5[%c5_56, %c0_57, %c0_58] : memref<9x32x64xbf16, #tpu.memory_space<vmem>>, vector<1x32x64xbf16>
    %99 = vector.shape_cast %98 : vector<1x32x64xbf16> to vector<32x64xbf16>
    %cst_59 = arith.constant dense<0.000000e+00> : vector<384x64xf32>
    %100 = tpu.matmul %97, %99, %cst_59 {dimension_numbers = #tpu.dot_dimension_numbers<[1], [0], [0], [1], [0, 0, 1, 1], [], []>} : vector<384x32xbf16>, vector<32x64xbf16>, vector<384x64xf32> -> vector<384x64xf32>
    %101 = arith.addf %95, %100 : vector<384x64xf32>
    %102 = vector.extract_strided_slice %64 {offsets = [48, 0], sizes = [384, 32], strides = [1, 1]} : vector<440x32xf32> to vector<384x32xf32>
    %103 = arith.truncf %102 : vector<384x32xf32> to vector<384x32xbf16>
    %c6_60 = arith.constant 6 : index
    %c0_61 = arith.constant 0 : index
    %c0_62 = arith.constant 0 : index
    %104 = vector.load %arg5[%c6_60, %c0_61, %c0_62] : memref<9x32x64xbf16, #tpu.memory_space<vmem>>, vector<1x32x64xbf16>
    %105 = vector.shape_cast %104 : vector<1x32x64xbf16> to vector<32x64xbf16>
    %cst_63 = arith.constant dense<0.000000e+00> : vector<384x64xf32>
    %106 = tpu.matmul %103, %105, %cst_63 {dimension_numbers = #tpu.dot_dimension_numbers<[1], [0], [0], [1], [0, 0, 1, 1], [], []>} : vector<384x32xbf16>, vector<32x64xbf16>, vector<384x64xf32> -> vector<384x64xf32>
    %107 = arith.addf %101, %106 : vector<384x64xf32>
    %108 = vector.extract_strided_slice %64 {offsets = [49, 0], sizes = [384, 32], strides = [1, 1]} : vector<440x32xf32> to vector<384x32xf32>
    %109 = arith.truncf %108 : vector<384x32xf32> to vector<384x32xbf16>
    %c7_64 = arith.constant 7 : index
    %c0_65 = arith.constant 0 : index
    %c0_66 = arith.constant 0 : index
    %110 = vector.load %arg5[%c7_64, %c0_65, %c0_66] : memref<9x32x64xbf16, #tpu.memory_space<vmem>>, vector<1x32x64xbf16>
    %111 = vector.shape_cast %110 : vector<1x32x64xbf16> to vector<32x64xbf16>
    %cst_67 = arith.constant dense<0.000000e+00> : vector<384x64xf32>
    %112 = tpu.matmul %109, %111, %cst_67 {dimension_numbers = #tpu.dot_dimension_numbers<[1], [0], [0], [1], [0, 0, 1, 1], [], []>} : vector<384x32xbf16>, vector<32x64xbf16>, vector<384x64xf32> -> vector<384x64xf32>
    %113 = arith.addf %107, %112 : vector<384x64xf32>
    %114 = vector.extract_strided_slice %64 {offsets = [50, 0], sizes = [384, 32], strides = [1, 1]} : vector<440x32xf32> to vector<384x32xf32>
    %115 = arith.truncf %114 : vector<384x32xf32> to vector<384x32xbf16>
    %c8_68 = arith.constant 8 : index
    %c0_69 = arith.constant 0 : index
    %c0_70 = arith.constant 0 : index
    %116 = vector.load %arg5[%c8_68, %c0_69, %c0_70] : memref<9x32x64xbf16, #tpu.memory_space<vmem>>, vector<1x32x64xbf16>
    %117 = vector.shape_cast %116 : vector<1x32x64xbf16> to vector<32x64xbf16>
    %cst_71 = arith.constant dense<0.000000e+00> : vector<384x64xf32>
    %118 = tpu.matmul %115, %117, %cst_71 {dimension_numbers = #tpu.dot_dimension_numbers<[1], [0], [0], [1], [0, 0, 1, 1], [], []>} : vector<384x32xbf16>, vector<32x64xbf16>, vector<384x64xf32> -> vector<384x64xf32>
    %119 = arith.addf %113, %118 : vector<384x64xf32>
    %c0_72 = arith.constant 0 : index
    %c0_73 = arith.constant 0 : index
    %120 = vector.load %arg6[%c0_72, %c0_73] : memref<1x64xf32, #tpu.memory_space<vmem>>, vector<1x64xf32>
    %121 = vector.broadcast %120 : vector<1x64xf32> to vector<384x64xf32>
    %122 = arith.addf %119, %121 : vector<384x64xf32>
    %cst_74 = arith.constant 0.000000e+00 : f32
    %123 = vector.broadcast %cst_74 : f32 to vector<384x64xf32>
    %124 = arith.maximumf %122, %123 : vector<384x64xf32>
    %c0_75 = arith.constant 0 : index
    %c0_76 = arith.constant 0 : index
    %125 = vector.load %arg7[%c0_75, %c0_76] : memref<384x1xf32, #tpu.memory_space<vmem>>, vector<384x1xf32>
    %126 = vector.broadcast %125 : vector<384x1xf32> to vector<384x64xf32>
    %127 = arith.mulf %124, %126 : vector<384x64xf32>
    %cst_77 = arith.constant dense<0.000000e+00> : vector<64xf32>
    %128 = vector.multi_reduction <add>, %127, %cst_77 [0] : vector<384x64xf32> to vector<64xf32>
    %129 = vector.shape_cast %128 : vector<64xf32> to vector<1x64xf32>
    %130 = vector.shape_cast %129 : vector<1x64xf32> to vector<1x1x64xf32>
    %c0_78 = arith.constant 0 : index
    %c0_79 = arith.constant 0 : index
    %c0_80 = arith.constant 0 : index
    %131 = vector.load %arg8[%c0_78, %c0_79, %c0_80] : memref<1x1x64xf32, #tpu.memory_space<vmem>>, vector<1x1x64xf32>
    tpu.vector_store %arg8[%c0_78, %c0_79, %c0_80], %130 {strides = array<i32>} : memref<1x1x64xf32, #tpu.memory_space<vmem>>, vector<1x1x64xf32>,
    return
  }
  func.func @transform_0(%arg0: i32) -> (i32, i32, i32) {
    %c0_i32 = arith.constant 0 : i32
    %c0_i32_0 = arith.constant 0 : i32
    %c0_i32_1 = arith.constant 0 : i32
    return %arg0, %c0_i32, %c0_i32_0 : i32, i32, i32
  }
  func.func @transform_1(%arg0: i32) -> (i32, i32, i32) {
    %c0_i32 = arith.constant 0 : i32
    %c0_i32_0 = arith.constant 0 : i32
    %c0_i32_1 = arith.constant 0 : i32
    %c0_i32_2 = arith.constant 0 : i32
    return %c0_i32, %c0_i32_0, %c0_i32_1 : i32, i32, i32
  }
  func.func @transform_2(%arg0: i32) -> (i32, i32) {
    %c0_i32 = arith.constant 0 : i32
    %c0_i32_0 = arith.constant 0 : i32
    %c0_i32_1 = arith.constant 0 : i32
    return %c0_i32, %c0_i32_0 : i32, i32
  }
  func.func @transform_3(%arg0: i32) -> (i32, i32) {
    %c0_i32 = arith.constant 0 : i32
    %c0_i32_0 = arith.constant 0 : i32
    %c0_i32_1 = arith.constant 0 : i32
    return %c0_i32, %c0_i32_0 : i32, i32
  }
  func.func @transform_4(%arg0: i32) -> (i32, i32, i32) {
    %c0_i32 = arith.constant 0 : i32
    %c0_i32_0 = arith.constant 0 : i32
    %c0_i32_1 = arith.constant 0 : i32
    %c0_i32_2 = arith.constant 0 : i32
    return %c0_i32, %c0_i32_0, %c0_i32_1 : i32, i32, i32
  }
  func.func @transform_5(%arg0: i32) -> (i32, i32) {
    %c0_i32 = arith.constant 0 : i32
    %c0_i32_0 = arith.constant 0 : i32
    %c0_i32_1 = arith.constant 0 : i32
    return %c0_i32, %c0_i32_0 : i32, i32
  }
  func.func @transform_6(%arg0: i32) -> (i32, i32) {
    %c0_i32 = arith.constant 0 : i32
    %c0_i32_0 = arith.constant 0 : i32
    %c0_i32_1 = arith.constant 0 : i32
    return %c0_i32, %c0_i32_0 : i32, i32
  }
  func.func @transform_7(%arg0: i32) -> (i32, i32, i32) {
    %c0_i32 = arith.constant 0 : i32
    %c0_i32_0 = arith.constant 0 : i32
    %c0_i32_1 = arith.constant 0 : i32
    return %arg0, %c0_i32, %c0_i32_0 : i32, i32, i32
  }
}

</mosaic_0001>

<bundles_post_ra>
// kernel: basic_timm_model_forward.1
= control target key start
LH: loop header
LB: loop body
LE: loop exit
PB: predicated region body
PF: predicated region fallthrough
CT: control target
= control target key end

     0   :  { %12 = vsyncpa [#allocation3], 0  ;;  %s15077_s0 = inlined_call_operand.vmem [shape: f32[2,504,8], index: 0, kind: input, shape index: {}]   ;;  %s15078_s1 = inlined_call_operand.vmem [shape: bf16[9,8,32], index: 1, kind: input, shape index: {}]   ;;  %s15079_s2 = inlined_call_operand.vmem [shape: f32[1,32], index: 2, kind: input, shape index: {}]   ;;  %s15080_s3 = inlined_call_operand.vmem [shape: f32[440,1], index: 3, kind: input, shape index: {}]   ;;  %s15081_s4 = inlined_call_operand.vmem [shape: bf16[9,32,64], index: 4, kind: input, shape index: {}]   ;;  %s15082_s5 = inlined_call_operand.vmem [shape: f32[1,64], index: 5, kind: input, shape index: {}]   ;;  %s15083_s6 = inlined_call_operand.vmem [shape: f32[384,1], index: 6, kind: input, shape index: {}]   ;;  %s15084_s7 = inlined_call_operand.hbm [shape: f32[2,1,64], index: 7, kind: output, shape index: {}]  }
   0x1   :  { %14 = vsyncpa [#allocation3 + $0x1], 0  ;;  %s11943_s24 = smov 0   ;;  %s11945_s25 = smov 0  }
   0x2   :  { %s11947_s26 = smov 0   ;;  %s11949_s27 = smov 0  }
   0x3 LB: > { %s11964_s28 = sadd.s32 4294967295, %s11899_s27   ;;  %s8942_s29 = sadd.s32 4294967294, %s11899_s27   ;;  %s11899_s27 = sphi %s11949_s27, %s15617_s27   ;;  %s11895_s26 = sphi %s11947_s26, %s15616_s26   ;;  %s11891_s25 = sphi %s11945_s25, %s15615_s25   ;;  %s11887_s24 = sphi %s11943_s24, %s15614_s24  }
   0x4   : > { %s11968_s30 = sadd.s32 1, %s11899_s27   ;;  %s179_s8 = sadd.s32 1, %s11895_s26 }
   0x5   : > { %s176_s9 = ssub.s32 %s11899_s27, %s11968_s30  ;;  %p189_p0 = scmp.ne.s32.totalorder %s11895_s26, %s11891_s25 }
   0x6   : > { %p177_p1 = scmp.eq.s32.totalorder %s176_s9, 0  ;;  %p190_p2 = scmp.eq.s32.totalorder %s11964_s28, 1 }
   0x7   : > { %p195_p3 = scmp.ne.s32.totalorder %s11891_s25, %s11887_s24  ;;  %p196_p4 = scmp.eq.s32.totalorder %s8942_s29, 1 }
   0x8   : > { %s11979_s10 = scalar_select %p177_p1, %s11895_s26, %s179_s8  }
   0x9   : > { %p11981_p5 = por %p190_p2, %p189_p0  ;;  %p11985_p6 = por %p196_p4, %p195_p3 }
   0xa   : > { %p8945_p7 = scmp.ge.s32.totalorder %s11899_s27, 1  ;;  %p240_p8 = scmp.lt.s32.totalorder %s11899_s27, 3 }
   0xc   : > { %p241_p9 = pnand %p8945_p7, %p240_p8 }
   0xe   : > { %244 = sbr.rel (%p241_p9) target bundleno = 2212 (0x8a4), region = 48 }
  0x15   : > { %v8947_v0 = vld [vmem:[%s15078_s1 + $0x4] sm:$0xf]  ;;  %vm680_vm0 = vcmask 1043456   ;;  %p271_p10 = scmp.lt.s32.totalorder %s11964_s28, 1  ;;  %v367_v2 = vld [vmem:[%s15078_s1] sm:$0xf] }
  0x16   : > { %11765 = vmatprep.subr.msk.bf16.mxu0 %vm680_vm0, %v8947_v0  ;;  %v682_v1 = vsel %vm680_vm0, %v8947_v0, 0  ;;  %11766 = vmatprep.subr.msk.bf16.mxu1 %vm680_vm0, %v8947_v0  ;;  %vm371_vm1 = vsmask.f32 7424  ;;  %vm595_vm2 = vcmask 64512   ;;  %v998_v42 = vsel %vm680_vm0, %v367_v2, 0  ;;  %s9475_s20 = sshll.u32 %s11964_s28, 4 }
  0x17   : > { %9974 = vmatpush3.bf16.msra.mxu0 %v682_v1  ;;  %s272_s17 = scalar_select %p271_p10, %s11964_s28, 1  ;;  %10964 = vmatpush3.bf16.msra.mxu1 %v682_v1  ;;  %v12100_v50 = vld [vmem:[%s15078_s1 + $0x8] sm:$0xf]  ;;  %vm1286_vm3 = vcmask 1046528   ;;  %vm5010_vm4 = vcmask 261120   ;;  %vm8770_vm5 = vcmask 523264  }
  0x18   : > { %11767 = vmatprep.subr.msk.bf16.mxu0 %vm680_vm0, %v367_v2  ;;  %vm8872_vm6 = vcmask 516096   ;;  %s15035_s9 = scalar_lea.hbm %s15084_s7, %s9475_s20  ;;  %s11902_s28 = smov [#allocation2]  }
  0x19   : > { %s11775_s18 = smul.u32 504, %s272_s17  ;;  %s11841_s15 = sshll.u32 %s11902_s28, 4  ;;  %s11842_s15 = int_to_ptr.vmem [resolvable:$false] %s11841_s15 }
  0x1a   : > { %s11843_s16 = scalar_lea.vmem %s11842_s15, 32 }
  0x1b   : > { %s12006_s21 = scalar_lea.vmem %s15077_s0, %s11775_s18 }
  0x1c   : > { %v277_v3 = vld [vmem:[%s12006_s21] sm:$0xff]  ;;  %v278_v4 = vld [vmem:[%s12006_s21 + $0x8] sm:$0xff]  ;;  %v279_v5 = vld [vmem:[%s12006_s21 + $0x10] sm:$0xff] }
  0x1d   : > { %v12012_v6 = vld [vmem:[%s12006_s21 + $0x18] sm:$0xff]  ;;  %v12014_v7 = vpack.c.bf16 %v278_v4, %v277_v3  ;;  %v12017_v8 = vld [vmem:[%s12006_s21 + $0x20] sm:$0xff]  ;;  %v12020_v9 = vld [vmem:[%s12006_s21 + $0x28] sm:$0xff] }
  0x1e   : > { %v12023_v10 = vpack.c.bf16 %v12012_v6, %v279_v5  ;;  %v12027_v11 = vpack.c.bf16 %v12020_v9, %v12017_v8  ;;  %v12030_v12 = vld [vmem:[%s12006_s21 + $0x30] sm:$0xff]  ;;  %v12033_v13 = vld [vmem:[%s12006_s21 + $0x38] sm:$0xff]  ;;  %v12036_v14 = vld [vmem:[%s12006_s21 + $0x40] sm:$0xff] }
  0x1f   : > { %v373_v15 = vshrl.u32 %v12014_v7, 16  ;;  %v375_v16 = vshll.u32 %v12014_v7, 16  ;;  %v12042_v17 = vpack.c.bf16 %v12033_v13, %v12030_v12  ;;  %v12045_v18 = vld [vmem:[%s12006_s21 + $0x48] sm:$0xff]  ;;  %v12048_v19 = vld [vmem:[%s12006_s21 + $0x50] sm:$0xff]  ;;  %v12051_v20 = vld [vmem:[%s12006_s21 + $0x58] sm:$0xff] }
  0x20   : > { %v380_v21 = vshll.u32 %v12023_v10, 16  ;;  %v384_v22 = vshrl.u32 %v12023_v10, 16  ;;  %v388_v23 = vshll.u32 %v12027_v11, 16  ;;  %v392_v24 = vshrl.u32 %v12027_v11, 16  ;;  %v12063_v28 = vld [vmem:[%s12006_s21 + $0x60] sm:$0xff]  ;;  %v12066_v29 = vld [vmem:[%s12006_s21 + $0x68] sm:$0xff] }
  0x21   : > { %v377_v25 = vrot.slane %v375_v16, 1  ;;  %v396_v26 = vshll.u32 %v12042_v17, 16  ;;  %v12060_v27 = vpack.c.bf16 %v12045_v18, %v12036_v14  ;;  %v12070_v32 = vpack.c.bf16 %v12051_v20, %v12048_v19  ;;  %v12083_v44 = vld [vmem:[%s12006_s21 + $0x70] sm:$0xff]  ;;  %v12086_v45 = vld [vmem:[%s12006_s21 + $0x78] sm:$0xff]  ;;  %v12092_v48 = vld [vmem:[%s12006_s21 + $0xa0] sm:$0xff] }
  0x22   : > { %v382_v30 = vrot.slane %v380_v21, 1  ;;  %v390_v31 = vrot.slane %v388_v23, 1  ;;  %v400_v35 = vshrl.u32 %v12042_v17, 16  ;;  %v12077_v40 = vpack.c.bf16 %v12066_v29, %v12063_v28  ;;  %v12095_v49 = vld [vmem:[%s12006_s21 + $0xa8] sm:$0xff]  ;;  %v12111_v57 = vld [vmem:[%s12006_s21 + $0xb0] sm:$0xff]  ;;  %v12114_v58 = vld [vmem:[%s12006_s21 + $0xb8] sm:$0xff] }
  0x23   : > { %v378_v33 = vor.u32 %v377_v25, %v373_v15  ;;  %v398_v34 = vrot.slane %v396_v26, 1  ;;  %v404_v36 = vshll.u32 %v12060_v27, 16  ;;  %v412_v39 = vshll.u32 %v12070_v32, 16  ;;  %15241 = vst [vmem:[#allocation5_spill] sm:$0xff] %v12114_v58  ;;  %v12123_v61 = vld [vmem:[%s12006_s21 + $0x80] sm:$0xff]  ;;  %v12126_v62 = vld [vmem:[%s12006_s21 + $0x88] sm:$0xff] }
  0x24   : > { %v386_v37 = vor.u32 %v384_v22, %v382_v30  ;;  %v394_v38 = vor.u32 %v392_v24, %v390_v31  ;;  %v408_v43 = vshrl.u32 %v12060_v27, 16  ;;  %v416_v54 = vshrl.u32 %v12070_v32, 16  ;;  %v12129_v63 = vld [vmem:[%s12006_s21 + $0xc0] sm:$0xff]  ;;  %v12141_v4 = vld [vmem:[%s12006_s21 + $0xc8] sm:$0xff]  ;;  %v12144_v5 = vld [vmem:[%s12006_s21 + $0xd0] sm:$0xff] }
  0x25   : > { %v383_v41 = vsel %vm371_vm1, %v378_v33, %v382_v30  ;;  %v402_v51 = vor.u32 %v400_v35, %v398_v34  ;;  %v406_v52 = vrot.slane %v404_v36, 1  ;;  %v414_v53 = vrot.slane %v412_v39, 1  ;;  %15242 = vst [vmem:[#allocation6_spill] sm:$0xff] %v12129_v63  ;;  %15244 = vst [vmem:[#allocation8_spill] sm:$0xff] %v12141_v4  ;;  %v12147_v15 = vld [vmem:[%s12006_s21 + $0xd8] sm:$0xff]  ;;  %v12152_v24 = vld [vmem:[%s12006_s21 + $0xe0] sm:$0xff] }
  0x26   : > { %9975 = vmatprep.mubr.msk.bf16.mxu0 %vm595_vm2, %v383_v41  ;;  %v391_v46 = vsel %vm371_vm1, %v386_v37, %v390_v31  ;;  %v399_v47 = vsel %vm371_vm1, %v394_v38, %v398_v34  ;;  %v420_v55 = vshll.u32 %v12077_v40, 16  ;;  %v12108_v56 = vpack.c.bf16 %v12086_v45, %v12083_v44  ;;  %15245 = vst [vmem:[#allocation9_spill] sm:$0xff] %v12144_v5  ;;  %v12155_v25 = vld [vmem:[%s12006_s21 + $0xe8] sm:$0xff]  ;;  %v12161_v30 = vld [vmem:[%s12006_s21 + $0x90] sm:$0xff]  ;;  %v12164_v31 = vld [vmem:[%s12006_s21 + $0x98] sm:$0xff] }
  0x27   : > { %9976 = vmatmul.mubr.msk.bf16.vlgmr.msra.gmra.mrb[0].mxu0 %vm595_vm2, %v391_v46  ;;  %v410_v59 = vor.u32 %v408_v43, %v406_v52  ;;  %v12118_v60 = vpack.c.bf16 %v12095_v49, %v12092_v48  ;;  %v12132_v0 = vsel %vm371_vm1, %v402_v51, %v406_v52  ;;  %v424_v1 = vshrl.u32 %v12077_v40, 16  ;;  %15246 = vst [vmem:[#allocation10_spill] sm:$0xff] %v12147_v15  ;;  %v12184_v41 = vld [vmem:[%s12006_s21 + $0xf0] sm:$0xff]  ;;  %v12194_v51 = vld [vmem:[%s12006_s21 + $0xf8] sm:$0xff] }
  0x28   : > { %10032 = vmatpush3.bf16.msra.mxu0 %v998_v42  ;;  %9979 = vmatprep.mubr.msk.bf16.mxu0 %vm595_vm2, %v399_v47  ;;  %15243 = vst [vmem:[#allocation7_spill] sm:$0xff] %v12132_v0  ;;  %v12138_v3 = vpack.c.bf16 %v12114_v58, %v12111_v57  ;;  %v418_v16 = vor.u32 %v416_v54, %v414_v53  ;;  %v422_v21 = vrot.slane %v420_v55, 1  ;;  %v428_v22 = vshll.u32 %v12108_v56, 16 }
  0x29   : > { %11768 = vmatprep.subr.msk.bf16.mxu0 %vm680_vm0, %v12100_v50  ;;  %v452_v2 = vshll.u32 %v12118_v60, 16  ;;  %v456_v23 = vshrl.u32 %v12118_v60, 16  ;;  %15247 = vst [vmem:[#allocation11_spill] sm:$0xff] %v12152_v24  ;;  %15248 = vst [vmem:[#allocation12_spill] sm:$0xff] %v12155_v25  ;;  %v12158_v26 = vsel %vm371_vm1, %v410_v59, %v414_v53  ;;  %v12172_v36 = vpack.c.bf16 %v12126_v62, %v12123_v61  ;;  %v12206_v59 = vld [vmem:[%s12006_s21 + $0x100] sm:$0xff] }
  0x2a   : > { %15249 = vst [vmem:[#allocation13_spill] sm:$0xff] %v12158_v26  ;;  %v460_v34 = vshll.u32 %v12138_v3, 16  ;;  %v464_v35 = vshrl.u32 %v12138_v3, 16  ;;  %v432_v37 = vshrl.u32 %v12108_v56, 16  ;;  %v12177_v38 = vpack.c.bf16 %v12141_v4, %v12129_v63  ;;  %15250 = vst [vmem:[#allocation14_spill] sm:$0xff] %v12184_v41 }
  0x2b   : > { %v12166_v33 = vrot.slane %v452_v2, 1  ;;  %v12181_v39 = vpack.c.bf16 %v12147_v15, %v12144_v5  ;;  %v426_v42 = vor.u32 %v424_v1, %v422_v21  ;;  %v12191_v47 = vpack.c.bf16 %v12155_v25, %v12152_v24  ;;  %15251 = vst [vmem:[#allocation15_spill] sm:$0xff] %v12194_v51  ;;  %15252 = vst [vmem:[#allocation16_spill] sm:$0xff] %v12206_v59  ;;  %v12209_v1 = vld [vmem:[%s12006_s21 + $0x108] sm:$0xff] }
  0x2c   : > { %v462_v46 = vrot.slane %v460_v34, 1  ;;  %v12200_v52 = vpack.c.bf16 %v12164_v31, %v12161_v30  ;;  %v468_v53 = vshll.u32 %v12177_v38, 16  ;;  %v472_v54 = vshrl.u32 %v12177_v38, 16  ;;  %15253 = vst [vmem:[#allocation17_spill] sm:$0xff] %v12209_v1 }
  0x2d   : > { %v458_v43 = vor.u32 %v456_v23, %v12166_v33  ;;  %v476_v55 = vshll.u32 %v12181_v39, 16  ;;  %v430_v2 = vrot.slane %v428_v22, 1  ;;  %v484_v15 = vshll.u32 %v12191_v47, 16  ;;  %v12226_v22 = vld [vmem:[%s12006_s21 + $0x118] sm:$0xff] }
  0x2e   : > { %v466_v34 = vor.u32 %v464_v35, %v462_v46  ;;  %v470_v25 = vrot.slane %v468_v53, 1  ;;  %v12223_v5 = vpack.c.bf16 %v12194_v51, %v12184_v41  ;;  %15256 = vst [vmem:[#allocation20_spill] sm:$0xff] %v12226_v22  ;;  %v436_v35 = vshll.u32 %v12172_v36, 16 }
  0x2f   : > { %9980 = vmatmul.mubr.msk.bf16.gmra.mrb[4].mxu0 %vm595_vm2, %v12132_v0  ;;  %v12212_v23 = vsel %vm371_vm1, %v458_v43, %v462_v46  ;;  %v12216_v0 = vld [vmem:[%s12006_s21 + $0x110] sm:$0xff]  ;;  %v478_v24 = vrot.slane %v476_v55, 1  ;;  %v12229_v43 = vsel %vm371_vm1, %v418_v16, %v422_v21  ;;  %v488_v46 = vshrl.u32 %v12191_v47, 16 }
  0x30   : > { %9983 = vmatprep.mubr.msk.bf16.mxu0 %vm595_vm2, %v12158_v26  ;;  %15254 = vst [vmem:[#allocation18_spill] sm:$0xff] %v12212_v23  ;;  %v480_v26 = vshrl.u32 %v12181_v39, 16  ;;  %15255 = vst [vmem:[#allocation19_spill] sm:$0xff] %v12216_v0  ;;  %9995 = vmatprep.mubr.msk.bf16.mxu1 %vm595_vm2, %v12212_v23  ;;  %v440_v4 = vshrl.u32 %v12172_v36, 16  ;;  %v444_v53 = vshll.u32 %v12200_v52, 16  ;;  %v12236_v55 = vsel %vm371_vm1, %v466_v34, %v470_v25 }
  0x31   : > { %15257 = vst [vmem:[#allocation21_spill] sm:$0xff] %v12229_v43  ;;  %15258 = vst [vmem:[#allocation22_spill] sm:$0xff] %v12236_v55  ;;  %v474_v23 = vor.u32 %v472_v54, %v470_v25  ;;  %v12239_v51 = vsel %vm371_vm1, %v426_v42, %v430_v2  ;;  %9996 = vmatmul.mubr.msk.bf16.vlgmr.msra.gmra.mrb[0].mxu1 %vm595_vm2, %v12236_v55  ;;  %v486_v16 = vrot.slane %v484_v15, 1  ;;  %v492_v21 = vshll.u32 %v12223_v5, 16 }
  0x32   : > { %15259 = vst [vmem:[#allocation23_spill] sm:$0xff] %v12239_v51  ;;  %v12246_v41 = vpack.c.bf16 %v12209_v1, %v12206_v59  ;;  %v482_v34 = vor.u32 %v480_v26, %v478_v24  ;;  %v12253_v25 = vpack.c.bf16 %v12226_v22, %v12216_v0  ;;  %v438_v42 = vrot.slane %v436_v35, 1  ;;  %v12265_v26 = vld [vmem:[%s12006_s21 + $0x128] sm:$0xff] }
  0x33   : > { %v12249_v63 = vsel %vm371_vm1, %v474_v23, %v478_v24  ;;  %v490_v15 = vor.u32 %v488_v46, %v486_v16  ;;  %v494_v54 = vrot.slane %v492_v21, 1  ;;  %v434_v23 = vor.u32 %v432_v37, %v430_v2  ;;  %v12262_v24 = vld [vmem:[%s12006_s21 + $0x120] sm:$0xff]  ;;  %15263 = vst [vmem:[#allocation27_spill] sm:$0xff] %v12265_v26 }
  0x34   : > { %15260 = vst [vmem:[#allocation24_spill] sm:$0xff] %v12249_v63  ;;  %15261 = vst [vmem:[#allocation25_spill] sm:$0xff] %v12253_v25  ;;  %9999 = vmatprep.mubr.msk.bf16.mxu1 %vm595_vm2, %v12249_v63  ;;  %v442_v55 = vor.u32 %v440_v4, %v438_v42  ;;  %v446_v22 = vrot.slane %v444_v53, 1  ;;  %v12269_v35 = vsel %vm371_vm1, %v482_v34, %v486_v16  ;;  %v496_v46 = vshrl.u32 %v12223_v5, 16  ;;  %v12286_v53 = vld [vmem:[%s12006_s21 + $0x130] sm:$0xff]  ;;  %v12289_v16 = vld [vmem:[%s12006_s21 + $0x138] sm:$0xff] }
  0x35   : > { %15262 = vst [vmem:[#allocation26_spill] sm:$0xff] %v12262_v24  ;;  %15264 = vst [vmem:[#allocation28_spill] sm:$0xff] %v12269_v35  ;;  %v504_v21 = vshrl.u32 %v12246_v41, 16  ;;  %v508_v63 = vshll.u32 %v12253_v25, 16  ;;  %v12278_v37 = vsel %vm371_vm1, %v434_v23, %v438_v42  ;;  %v448_v4 = vshrl.u32 %v12200_v52, 16 }
  0x36   : > { %15266 = vst [vmem:[#allocation30_spill] sm:$0xff] %v12278_v37  ;;  %v12283_v2 = vpack.c.bf16 %v12265_v26, %v12262_v24  ;;  %15268 = vst [vmem:[#allocation32_spill] sm:$0xff] %v12286_v53  ;;  %v12292_v34 = vsel %vm371_vm1, %v442_v55, %v446_v22  ;;  %v12302_v55 = vpack.c.bf16 %v12289_v16, %v12286_v53 }
  0x37   : > { %9984 = vmatmul.mubr.msk.bf16.gmra.mrb[8].mxu0 %vm595_vm2, %v12229_v43  ;;  %v500_v43 = vshll.u32 %v12246_v41, 16  ;;  %15269 = vst [vmem:[#allocation33_spill] sm:$0xff] %v12289_v16  ;;  %15270 = vst [vmem:[#allocation34_spill] sm:$0xff] %v12292_v34  ;;  %v510_v26 = vrot.slane %v508_v63, 1  ;;  %v12316_v63 = vld [vmem:[%s12006_s21 + $0x148] sm:$0xff] }
  0x38   : > { %9987 = vmatprep.mubr.msk.bf16.mxu0 %vm595_vm2, %v12239_v51  ;;  %v12275_v51 = vsel %vm371_vm1, %v490_v15, %v494_v54  ;;  %15267 = vst [vmem:[#allocation31_spill] sm:$0xff] %v12283_v2  ;;  %v498_v15 = vor.u32 %v496_v46, %v494_v54  ;;  %15271 = vst [vmem:[#allocation35_spill] sm:$0xff] %v12302_v55  ;;  %v512_v54 = vshrl.u32 %v12253_v25, 16  ;;  %v520_v46 = vshrl.u32 %v12283_v2, 16 }
  0x39   : > { %15265 = vst [vmem:[#allocation29_spill] sm:$0xff] %v12275_v51  ;;  %10000 = vmatmul.mubr.msk.bf16.gmra.mrb[4].mxu1 %vm595_vm2, %v12269_v35  ;;  %v502_v42 = vrot.slane %v500_v43, 1  ;;  %v450_v35 = vor.u32 %v448_v4, %v446_v22  ;;  %v516_v43 = vshll.u32 %v12283_v2, 16  ;;  %15274 = vst [vmem:[#allocation38_spill] sm:$0xff] %v12316_v63  ;;  %v524_v16 = vshll.u32 %v12302_v55, 16  ;;  %v12326_v22 = vld [vmem:[%s12006_s21 + $0x158] sm:$0xff] }
  0x3a   : > { %10003 = vmatprep.mubr.msk.bf16.mxu1 %vm595_vm2, %v12275_v51  ;;  %15277 = vst [vmem:[#allocation41_spill] sm:$0xff] %v12326_v22 }
  0x3b   : > { %v506_v23 = vor.u32 %v504_v21, %v502_v42  ;;  %v12308_v51 = vsel %vm371_vm1, %v498_v15, %v502_v42  ;;  %v12330_v4 = vsel %vm371_vm1, %v450_v35, %v12166_v33  ;;  %v518_v42 = vrot.slane %v516_v43, 1 }
  0x3c   : > { %15272 = vst [vmem:[#allocation36_spill] sm:$0xff] %v12308_v51  ;;  %15278 = vst [vmem:[#allocation42_spill] sm:$0xff] %v12330_v4  ;;  %v526_v33 = vrot.slane %v524_v16, 1  ;;  %v1287_v35 = vrot.slane %v12014_v7, 1  ;;  %v1288_v43 = vrot.slane %v12023_v10, 1  ;;  %v528_v16 = vshrl.u32 %v12302_v55, 16 }
  0x3d   : > { %v12319_v21 = vsel %vm371_vm1, %v506_v23, %v510_v26  ;;  %v514_v23 = vor.u32 %v512_v54, %v510_v26  ;;  %v522_v53 = vor.u32 %v520_v46, %v518_v42  ;;  %v15115_v26 = vrot.slane %v12027_v11, 1 }
  0x3e   : > { %15275 = vst [vmem:[#allocation39_spill] sm:$0xff] %v12319_v21  ;;  %v12353_v46 = vsel %vm1286_vm3, %v1287_v35, %v1288_v43 }
  0x3f   : > { %9988 = vmatmul.mubr.msk.bf16.gmra.mrb[12].mxu0 %vm595_vm2, %v12278_v37  ;;  %v12313_v37 = vld [vmem:[%s12006_s21 + $0x140] sm:$0xff] }
  0x40   : > { %9991 = vmatprep.mubr.msk.bf16.mxu0 %vm595_vm2, %v12292_v34  ;;  %15273 = vst [vmem:[#allocation37_spill] sm:$0xff] %v12313_v37  ;;  %v12323_v34 = vld [vmem:[%s12006_s21 + $0x150] sm:$0xff]  ;;  %v12336_v15 = vpack.c.bf16 %v12316_v63, %v12313_v37  ;;  %v1427_v63 = vsel %vm680_vm0, %v12100_v50, 0  ;;  %v12394_v37 = vld [vmem:[%s15078_s1 + $0xc] sm:$0xf] }
  0x41   : > { %15276 = vst [vmem:[#allocation40_spill] sm:$0xff] %v12323_v34  ;;  %10004 = vmatmul.mubr.msk.bf16.gmra.mrb[8].mxu1 %vm595_vm2, %v12308_v51  ;;  %v12342_v24 = vpack.c.bf16 %v12326_v22, %v12323_v34  ;;  %v12360_v51 = vld [vmem:[%s12006_s21 + $0x160] sm:$0xff]  ;;  %v12371_v22 = vsel %vm371_vm1, %v522_v53, %v526_v33 }
  0x42   : > { %15279 = vst [vmem:[#allocation43_spill] sm:$0xff] %v12336_v15  ;;  %10007 = vmatprep.mubr.msk.bf16.mxu1 %vm595_vm2, %v12319_v21  ;;  %v532_v54 = vshll.u32 %v12336_v15, 16  ;;  %v12356_v21 = vsel %vm371_vm1, %v514_v23, %v518_v42  ;;  %15282 = vst [vmem:[#allocation46_spill] sm:$0xff] %v12360_v51  ;;  %v536_v35 = vshrl.u32 %v12336_v15, 16  ;;  %v12376_v42 = vld [vmem:[%s12006_s21 + $0x170] sm:$0xff]  ;;  %v12379_v23 = vld [vmem:[%s12006_s21 + $0x178] sm:$0xff] }
  0x43   : > { %15280 = vst [vmem:[#allocation44_spill] sm:$0xff] %v12342_v24  ;;  %15281 = vst [vmem:[#allocation45_spill] sm:$0xff] %v12356_v21  ;;  %v540_v34 = vshll.u32 %v12342_v24, 16 }
  0x44   : > { %15284 = vst [vmem:[#allocation48_spill] sm:$0xff] %v12371_v22  ;;  %15285 = vst [vmem:[#allocation49_spill] sm:$0xff] %v12376_v42 }
  0x45   : > { %15286 = vst [vmem:[#allocation50_spill] sm:$0xff] %v12379_v23 }
  0x47   : > { %9992 = vmatmul.mubr.msk.bf16.gmra.mrb[16].mxu0 %vm595_vm2, %v12330_v4  ;;  %v12363_v4 = vld [vmem:[%s12006_s21 + $0x168] sm:$0xff] }
  0x48   : > { %10033 = vmatprep.mubr.msk.bf16.mxu0 %vm595_vm2, %v12014_v7  ;;  %15283 = vst [vmem:[#allocation47_spill] sm:$0xff] %v12363_v4  ;;  %v12368_v7 = vsel %vm1286_vm3, %v1288_v43, %v15115_v26  ;;  %v534_v43 = vrot.slane %v532_v54, 1  ;;  %v12387_v53 = vpack.c.bf16 %v12363_v4, %v12360_v51  ;;  %v530_v26 = vor.u32 %v528_v16, %v526_v33  ;;  %v12426_v4 = vld [vmem:[%s12006_s21 + $0x198] sm:$0xff] }
  0x49   : > { %10008 = vmatmul.mubr.msk.bf16.gmra.mrb[12].mxu1 %vm595_vm2, %v12356_v21  ;;  %v542_v54 = vrot.slane %v540_v34, 1  ;;  %v12400_v21 = vpack.c.bf16 %v12379_v23, %v12376_v42  ;;  %v12415_v34 = vld [vmem:[%s12006_s21 + $0x188] sm:$0xff]  ;;  %v12423_v42 = vld [vmem:[%s12006_s21 + $0x190] sm:$0xff]  ;;  %15294 = vst [vmem:[#allocation58_spill] sm:$0xff] %v12426_v4 }
  0x4a   : > { %15287 = vst [vmem:[#allocation51_spill] sm:$0xff] %v12387_v53  ;;  %10011 = vmatprep.mubr.msk.bf16.mxu1 %vm595_vm2, %v12371_v22  ;;  %v538_v50 = vor.u32 %v536_v35, %v534_v43  ;;  %v548_v33 = vshll.u32 %v12387_v53, 16  ;;  %v12408_v16 = vsel %vm371_vm1, %v530_v26, %v534_v43  ;;  %v12412_v35 = vld [vmem:[%s12006_s21 + $0x180] sm:$0xff]  ;;  %15291 = vst [vmem:[#allocation55_spill] sm:$0xff] %v12415_v34 }
  0x4b   : > { %15288 = vst [vmem:[#allocation52_spill] sm:$0xff] %v12400_v21  ;;  %15289 = vst [vmem:[#allocation53_spill] sm:$0xff] %v12408_v16  ;;  %v556_v23 = vshll.u32 %v12400_v21, 16  ;;  %v12432_v43 = vpack.c.bf16 %v12415_v34, %v12412_v35  ;;  %v12440_v1 = vpack.c.bf16 %v12426_v4, %v12423_v42  ;;  %v12464_v34 = vld [vmem:[%s12006_s21 + $0x1b8] sm:$0xff] }
  0x4c   : > { %15290 = vst [vmem:[#allocation54_spill] sm:$0xff] %v12412_v35  ;;  %v12418_v22 = vsel %vm371_vm1, %v538_v50, %v542_v54  ;;  %15293 = vst [vmem:[#allocation57_spill] sm:$0xff] %v12423_v42  ;;  %v550_v26 = vrot.slane %v548_v33, 1  ;;  %v12461_v42 = vld [vmem:[%s12006_s21 + $0x1b0] sm:$0xff] }
  0x4d   : > { %15292 = vst [vmem:[#allocation56_spill] sm:$0xff] %v12418_v22  ;;  %15295 = vst [vmem:[#allocation59_spill] sm:$0xff] %v12432_v43  ;;  %v558_v0 = vrot.slane %v556_v23, 1  ;;  %v564_v33 = vshll.u32 %v12432_v43, 16  ;;  %v572_v4 = vshll.u32 %v12440_v1, 16  ;;  %v12478_v58 = vpack.c.bf16 %v12464_v34, %v12461_v42 }
  0x4e   : > { %15296 = vst [vmem:[#allocation60_spill] sm:$0xff] %v12440_v1  ;;  %15300 = vst [vmem:[#allocation64_spill] sm:$0xff] %v12464_v34 }
  0x4f   : > { %10034 = vmatmul.mubr.msk.bf16.vlgmr.msra.gmra.mrb[0].mxu0 %vm595_vm2, %v12023_v10  ;;  %v544_v10 = vshrl.u32 %v12342_v24, 16  ;;  %v574_v59 = vrot.slane %v572_v4, 1  ;;  %15302 = vst [vmem:[#allocation66_spill] sm:$0xff] %v12478_v58  ;;  %v588_v4 = vshll.u32 %v12478_v58, 16 }
  0x50   : > { %10090 = vmatpush3.bf16.msra.mxu0 %v1427_v63  ;;  %10037 = vmatprep.mubr.msk.bf16.mxu0 %vm595_vm2, %v12027_v11  ;;  %v552_v63 = vshrl.u32 %v12387_v53, 16 }
  0x51   : > { %11769 = vmatprep.subr.msk.bf16.mxu0 %vm680_vm0, %v12394_v37  ;;  %10012 = vmatmul.mubr.msk.bf16.gmra.mrb[16].mxu1 %vm595_vm2, %v12408_v16  ;;  %v546_v50 = vor.u32 %v544_v10, %v542_v54  ;;  %v12450_v54 = vld [vmem:[%s12006_s21 + $0x1a0] sm:$0xff]  ;;  %v12453_v10 = vld [vmem:[%s12006_s21 + $0x1a8] sm:$0xff] }
  0x52   : > { %10015 = vmatprep.mubr.msk.bf16.mxu1 %vm595_vm2, %v12418_v22  ;;  %v554_v51 = vor.u32 %v552_v63, %v550_v26  ;;  %v560_v22 = vshrl.u32 %v12400_v21, 16  ;;  %15298 = vst [vmem:[#allocation62_spill] sm:$0xff] %v12453_v10  ;;  %v568_v63 = vshrl.u32 %v12432_v43, 16 }
  0x53   : > { %v12446_v16 = vsel %vm371_vm1, %v546_v50, %v550_v26  ;;  %v566_v26 = vrot.slane %v564_v33, 1  ;;  %v12470_v50 = vpack.c.bf16 %v12453_v10, %v12450_v54 }
  0x54   : > { %15297 = vst [vmem:[#allocation61_spill] sm:$0xff] %v12446_v16  ;;  %v12456_v23 = vsel %vm371_vm1, %v554_v51, %v558_v0  ;;  %v562_v51 = vor.u32 %v560_v22, %v558_v0 }
  0x55   : > { %15299 = vst [vmem:[#allocation63_spill] sm:$0xff] %v12456_v23  ;;  %15301 = vst [vmem:[#allocation65_spill] sm:$0xff] %v12470_v50  ;;  %v570_v35 = vor.u32 %v568_v63, %v566_v26  ;;  %v580_v33 = vshll.u32 %v12470_v50, 16  ;;  %v584_v22 = vshrl.u32 %v12470_v50, 16 }
  0x57   : > { %10038 = vmatmul.mubr.msk.bf16.gmra.mrb[4].mxu0 %vm595_vm2, %v12042_v17  ;;  %v12488_v0 = vsel %vm371_vm1, %v570_v35, %v574_v59  ;;  %v582_v63 = vrot.slane %v580_v33, 1  ;;  %v592_v33 = vshrl.u32 %v12478_v58, 16 }
  0x58   : > { %10041 = vmatprep.mubr.msk.bf16.mxu0 %vm595_vm2, %v12060_v27  ;;  %15304 = vst [vmem:[#allocation68_spill] sm:$0xff] %v12488_v0 }
  0x59   : > { %10016 = vmatmul.mubr.msk.bf16.gmra.mrb[20].mxu1 %vm595_vm2, %v12446_v16  ;;  %v12484_v16 = vsel %vm371_vm1, %v562_v51, %v566_v26  ;;  %v586_v26 = vor.u32 %v584_v22, %v582_v63  ;;  %v590_v51 = vrot.slane %v588_v4, 1  ;;  %v1855_v22 = vsel %vm680_vm0, %v12394_v37, 0 }
  0x5a   : > { %10019 = vmatprep.mubr.msk.bf16.mxu1 %vm595_vm2, %v12456_v23  ;;  %15303 = vst [vmem:[#allocation67_spill] sm:$0xff] %v12484_v16  ;;  %v576_v23 = vshrl.u32 %v12440_v1, 16  ;;  %v15308_v4 = vrot.slane %v12027_v11, 1 }
  0x5b   : > { %v12504_v10 = vsel %vm371_vm1, %v586_v26, %v590_v51  ;;  %v12565_v26 = vld [vmem:[%s15078_s1 + $0x10] sm:$0xf] }
  0x5c   : > { %v578_v34 = vor.u32 %v576_v23, %v574_v59  ;;  %15306 = vst [vmem:[#allocation70_spill] sm:$0xff] %v12504_v10  ;;  %v12515_v59 = vor.u32 %v592_v33, %v590_v51  ;;  %v1292_v23 = vrot.slane %v12042_v17, 1  ;;  %v1296_v51 = vrot.slane %v12070_v32, 1 }
  0x5d   : > { %v1300_v33 = vrot.slane %v12108_v56, 1 }
  0x5e   : > { %v12501_v35 = vsel %vm371_vm1, %v578_v34, %v582_v63  ;;  %15307 = vst [vmem:[#allocation71_spill] sm:$0xff] %v12515_v59  ;;  %v366_v34 = vpack.c.bf16 %v12461_v42, %v12461_v42  ;;  %v1293_v63 = vsel %vm1286_vm3, %v15308_v4, %v1292_v23  ;;  %v1304_v4 = vrot.slane %v12200_v52, 1 }
  0x5f   : > { %10042 = vmatmul.mubr.msk.bf16.gmra.mrb[8].mxu0 %vm595_vm2, %v12070_v32  ;;  %15305 = vst [vmem:[#allocation69_spill] sm:$0xff] %v12501_v35 }
  0x60   : > { %10045 = vmatprep.mubr.msk.bf16.mxu0 %vm595_vm2, %v12077_v40 }
  0x61   : > { %10020 = vmatmul.mubr.msk.bf16.gmra.mrb[24].mxu1 %vm595_vm2, %v12484_v16 }
  0x62   : > { %10023 = vmatprep.mubr.msk.bf16.mxu1 %vm595_vm2, %v12488_v0 }
  0x67   : > { %10046 = vmatmul.mubr.msk.bf16.gmra.mrb[12].mxu0 %vm595_vm2, %v12108_v56 }
  0x68   : > { %10049 = vmatprep.mubr.msk.bf16.mxu0 %vm595_vm2, %v12172_v36 }
  0x69   : > { %10024 = vmatmul.mubr.msk.bf16.gmra.mrb[28].mxu1 %vm595_vm2, %v12501_v35 }
  0x6a   : > { %10027 = vmatprep.mubr.msk.bf16.mxu1 %vm595_vm2, %v12504_v10 }
  0x6f   : > { %10050 = vmatmul.mubr.msk.bf16.gmra.mrb[16].mxu0 %vm595_vm2, %v12200_v52 }
  0x70   : > { %10053 = vmatprep.mubr.msk.bf16.mxu0 %vm595_vm2, %v12118_v60 }
  0x71   : > { %10028 = vmatmul.mubr.msk.bf16.gmra.mrb[32].mxu1 %vm595_vm2, %v12515_v59  ;;  %v15391_v59 = vld [vmem:[#allocation54_spill] sm:$0xff] }
  0x77   : > { %10054 = vmatmul.mubr.msk.bf16.gmra.mrb[20].mxu0 %vm595_vm2, %v12138_v3 }
  0x78   : > { %10057 = vmatprep.mubr.msk.bf16.mxu0 %vm595_vm2, %v12177_v38 }
  0x7f   : > { %10058 = vmatmul.mubr.msk.bf16.gmra.mrb[24].mxu0 %vm595_vm2, %v12181_v39 }
  0x80   : > { %10061 = vmatprep.mubr.msk.bf16.mxu0 %vm595_vm2, %v12191_v47 }
  0x87   : > { %10062 = vmatmul.mubr.msk.bf16.gmra.mrb[28].mxu0 %vm595_vm2, %v12223_v5 }
  0x88   : > { %10065 = vmatprep.mubr.msk.bf16.mxu0 %vm595_vm2, %v12246_v41 }
  0x8f   : > { %10066 = vmatmul.mubr.msk.bf16.gmra.mrb[32].mxu0 %vm595_vm2, %v12253_v25 }
  0x90   : > { %10069 = vmatprep.mubr.msk.bf16.mxu0 %vm595_vm2, %v12283_v2 }
  0x97   : > { %10070 = vmatmul.mubr.msk.bf16.gmra.mrb[36].mxu0 %vm595_vm2, %v12302_v55 }
  0x98   : > { %10073 = vmatprep.mubr.msk.bf16.mxu0 %vm595_vm2, %v12336_v15 }
  0x9f   : > { %10074 = vmatmul.mubr.msk.bf16.gmra.mrb[40].mxu0 %vm595_vm2, %v12342_v24 }
  0xa0   : > { %10077 = vmatprep.mubr.msk.bf16.mxu0 %vm595_vm2, %v12387_v53 }
  0xa7   : > { %10078 = vmatmul.mubr.msk.bf16.gmra.mrb[44].mxu0 %vm595_vm2, %v12400_v21 }
  0xa8   : > { %10081 = vmatprep.mubr.msk.bf16.mxu0 %vm595_vm2, %v12432_v43 }
  0xaf   : > { %10082 = vmatmul.mubr.msk.bf16.gmra.mrb[48].mxu0 %vm595_vm2, %v12440_v1 }
  0xb0   : > { %10085 = vmatprep.mubr.msk.bf16.mxu0 %vm595_vm2, %v12470_v50 }
  0xb7   : > { %10086 = vmatmul.mubr.msk.bf16.gmra.mrb[52].mxu0 %vm595_vm2, %v366_v34 }
  0xb8   : > { %10091 = vmatprep.mubr.msk.bf16.mxu0 %vm595_vm2, %v12353_v46  ;;  %v1294_v46 = vrot.slane %v12060_v27, 1 }
  0xba   : > { %v12575_v11 = vsel %vm1286_vm3, %v1292_v23, %v1294_v46  ;;  %v12578_v37 = vsel %vm1286_vm3, %v1294_v46, %v1296_v51  ;;  %v1302_v23 = vrot.slane %v12172_v36, 1 }
  0xbb   : > { %15309 = vst [vmem:[#allocation72_spill] sm:$0xff] %v12575_v11  ;;  %15310 = vst [vmem:[#allocation73_spill] sm:$0xff] %v12578_v37 }
  0xbc   : > { %v12602_v46 = vsel %vm1286_vm3, %v1302_v23, %v1304_v4 }
  0xbd   : > { %15314 = vst [vmem:[#allocation77_spill] sm:$0xff] %v12602_v46 }
  0xbf   : > { %10092 = vmatmul.mubr.msk.bf16.vlgmr.msra.gmra.mrb[0].mxu0 %vm595_vm2, %v12368_v7  ;;  %v1298_v7 = vrot.slane %v12077_v40, 1 }
  0xc0   : > { %10148 = vmatpush3.bf16.msra.mxu0 %v1855_v22  ;;  %10095 = vmatprep.mubr.msk.bf16.mxu0 %vm595_vm2, %v1293_v63  ;;  %v12599_v63 = vsel %vm1286_vm3, %v1300_v33, %v1302_v23  ;;  %v1312_v23 = vrot.slane %v12181_v39, 1 }
  0xc1   : > { %11770 = vmatprep.subr.msk.bf16.mxu0 %vm680_vm0, %v12565_v26  ;;  %v12587_v34 = vsel %vm1286_vm3, %v1296_v51, %v1298_v7  ;;  %v12590_v22 = vsel %vm1286_vm3, %v1298_v7, %v1300_v33  ;;  %15313 = vst [vmem:[#allocation76_spill] sm:$0xff] %v12599_v63  ;;  %v1306_v51 = vrot.slane %v12118_v60, 1  ;;  %v1308_v7 = vrot.slane %v12138_v3, 1 }
  0xc2   : > { %15311 = vst [vmem:[#allocation74_spill] sm:$0xff] %v12587_v34  ;;  %15312 = vst [vmem:[#allocation75_spill] sm:$0xff] %v12590_v22  ;;  %v1310_v33 = vrot.slane %v12177_v38, 1 }
  0xc7   : > { %10096 = vmatmul.mubr.msk.bf16.gmra.mrb[4].mxu0 %vm595_vm2, %v12575_v11  ;;  %v15387_v11 = vld [vmem:[#allocation46_spill] sm:$0xff] }
  0xc8   : > { %10099 = vmatprep.mubr.msk.bf16.mxu0 %vm595_vm2, %v12578_v37 }
  0xcf   : > { %10100 = vmatmul.mubr.msk.bf16.gmra.mrb[8].mxu0 %vm595_vm2, %v12587_v34  ;;  %v12614_v34 = vsel %vm1286_vm3, %v1306_v51, %v1308_v7 }
  0xd0   : > { %10103 = vmatprep.mubr.msk.bf16.mxu0 %vm595_vm2, %v12590_v22  ;;  %v12611_v22 = vsel %vm1286_vm3, %v1304_v4, %v1306_v51  ;;  %15316 = vst [vmem:[#allocation79_spill] sm:$0xff] %v12614_v34  ;;  %v1314_v4 = vrot.slane %v12191_v47, 1  ;;  %v1316_v51 = vrot.slane %v12223_v5, 1 }
  0xd1   : > { %15315 = vst [vmem:[#allocation78_spill] sm:$0xff] %v12611_v22 }
  0xd7   : > { %10104 = vmatmul.mubr.msk.bf16.gmra.mrb[12].mxu0 %vm595_vm2, %v12599_v63  ;;  %v12626_v63 = vsel %vm1286_vm3, %v1310_v33, %v1312_v23 }
  0xd8   : > { %10107 = vmatprep.mubr.msk.bf16.mxu0 %vm595_vm2, %v12602_v46  ;;  %v12623_v46 = vsel %vm1286_vm3, %v1308_v7, %v1310_v33  ;;  %15318 = vst [vmem:[#allocation81_spill] sm:$0xff] %v12626_v63  ;;  %v1318_v7 = vrot.slane %v12246_v41, 1  ;;  %v1320_v33 = vrot.slane %v12253_v25, 1  ;;  %v13076_v25 = vld [vmem:[%s12006_s21 + $0x1d0] sm:$0xff] }
  0xd9   : > { %15317 = vst [vmem:[#allocation80_spill] sm:$0xff] %v12623_v46 }
  0xdf   : > { %10108 = vmatmul.mubr.msk.bf16.gmra.mrb[16].mxu0 %vm595_vm2, %v12611_v22  ;;  %v12638_v22 = vsel %vm1286_vm3, %v1314_v4, %v1316_v51 }
  0xe0   : > { %10111 = vmatprep.mubr.msk.bf16.mxu0 %vm595_vm2, %v12614_v34  ;;  %v12635_v34 = vsel %vm1286_vm3, %v1312_v23, %v1314_v4  ;;  %15320 = vst [vmem:[#allocation83_spill] sm:$0xff] %v12638_v22  ;;  %v1322_v23 = vrot.slane %v12283_v2, 1  ;;  %v1324_v4 = vrot.slane %v12302_v55, 1 }
  0xe1   : > { %15319 = vst [vmem:[#allocation82_spill] sm:$0xff] %v12635_v34 }
  0xe7   : > { %10112 = vmatmul.mubr.msk.bf16.gmra.mrb[20].mxu0 %vm595_vm2, %v12623_v46  ;;  %v12650_v46 = vsel %vm1286_vm3, %v1318_v7, %v1320_v33 }
  0xe8   : > { %10115 = vmatprep.mubr.msk.bf16.mxu0 %vm595_vm2, %v12626_v63  ;;  %v12647_v63 = vsel %vm1286_vm3, %v1316_v51, %v1318_v7  ;;  %15322 = vst [vmem:[#allocation85_spill] sm:$0xff] %v12650_v46  ;;  %v1326_v51 = vrot.slane %v12336_v15, 1  ;;  %v1328_v7 = vrot.slane %v12342_v24, 1 }
  0xe9   : > { %15321 = vst [vmem:[#allocation84_spill] sm:$0xff] %v12647_v63 }
  0xef   : > { %10116 = vmatmul.mubr.msk.bf16.gmra.mrb[24].mxu0 %vm595_vm2, %v12635_v34  ;;  %v12662_v34 = vsel %vm1286_vm3, %v1322_v23, %v1324_v4 }
  0xf0   : > { %10119 = vmatprep.mubr.msk.bf16.mxu0 %vm595_vm2, %v12638_v22  ;;  %v12659_v22 = vsel %vm1286_vm3, %v1320_v33, %v1322_v23  ;;  %15324 = vst [vmem:[#allocation87_spill] sm:$0xff] %v12662_v34  ;;  %v1330_v33 = vrot.slane %v12387_v53, 1 }
  0xf1   : > { %15323 = vst [vmem:[#allocation86_spill] sm:$0xff] %v12659_v22 }
  0xf7   : > { %10120 = vmatmul.mubr.msk.bf16.gmra.mrb[28].mxu0 %vm595_vm2, %v12647_v63  ;;  %v12674_v63 = vsel %vm1286_vm3, %v1326_v51, %v1328_v7 }
  0xf8   : > { %10123 = vmatprep.mubr.msk.bf16.mxu0 %vm595_vm2, %v12650_v46  ;;  %v12671_v46 = vsel %vm1286_vm3, %v1324_v4, %v1326_v51  ;;  %15326 = vst [vmem:[#allocation89_spill] sm:$0xff] %v12674_v63  ;;  %v12691_v51 = vsel %vm1286_vm3, %v1328_v7, %v1330_v33 }
  0xf9   : > { %15325 = vst [vmem:[#allocation88_spill] sm:$0xff] %v12671_v46  ;;  %15331 = vst [vmem:[#allocation94_spill] sm:$0xff] %v12691_v51 }
  0xff   : > { %10124 = vmatmul.mubr.msk.bf16.gmra.mrb[32].mxu0 %vm595_vm2, %v12659_v22 }
 0x100   : > { %10127 = vmatprep.mubr.msk.bf16.mxu0 %vm595_vm2, %v12662_v34  ;;  %v1332_v34 = vrot.slane %v12400_v21, 1 }
 0x104   : > { %v12681_v23 = vpop.f32.mrb[0].mxu1 }
 0x105   : > { %15327 = vst [vmem:[#allocation90_spill] sm:$0xff] %v12681_v23  ;;  %v12684_v22 = vpop.f32.mrb[1].mxu1  ;;  %v1334_v23 = vrot.slane %v12432_v43, 1 }
 0x106   : > { %15328 = vst [vmem:[#allocation91_spill] sm:$0xff] %v12684_v22  ;;  %v12686_v37 = vpop.f32.mrb[2].mxu1 }
 0x107   : > { %10128 = vmatmul.mubr.msk.bf16.gmra.mrb[36].mxu0 %vm595_vm2, %v12671_v46  ;;  %15329 = vst [vmem:[#allocation92_spill] sm:$0xff] %v12686_v37  ;;  %v12688_v4 = vpop.f32.mrb[3].mxu1  ;;  %v12694_v46 = vsel %vm1286_vm3, %v1330_v33, %v1332_v34  ;;  %v1336_v37 = vrot.slane %v12440_v1, 1  ;;  %v12711_v33 = vsel %vm1286_vm3, %v1332_v34, %v1334_v23 }
 0x108   : > { %10131 = vmatprep.mubr.msk.bf16.mxu0 %vm595_vm2, %v12674_v63  ;;  %15330 = vst [vmem:[#allocation93_spill] sm:$0xff] %v12688_v4  ;;  %15332 = vst [vmem:[#allocation95_spill] sm:$0xff] %v12694_v46 }
 0x109   : > { %15337 = vst [vmem:[#allocation100_spill] sm:$0xff] %v12711_v33 }
 0x10c   : > { %v12701_v63 = vpop.f32.mrb[4].mxu1 }
 0x10d   : > { %15333 = vst [vmem:[#allocation96_spill] sm:$0xff] %v12701_v63  ;;  %v12704_v22 = vpop.f32.mrb[5].mxu1  ;;  %v1338_v63 = vrot.slane %v12470_v50, 1 }
 0x10e   : > { %15334 = vst [vmem:[#allocation97_spill] sm:$0xff] %v12704_v22  ;;  %v12706_v4 = vpop.f32.mrb[6].mxu1 }
 0x10f   : > { %10132 = vmatmul.mubr.msk.bf16.gmra.mrb[40].mxu0 %vm595_vm2, %v12691_v51  ;;  %15335 = vst [vmem:[#allocation98_spill] sm:$0xff] %v12706_v4  ;;  %v12708_v7 = vpop.f32.mrb[7].mxu1  ;;  %v12714_v51 = vsel %vm1286_vm3, %v1334_v23, %v1336_v37  ;;  %v12724_v4 = vrot.slane %v12478_v58, 1  ;;  %v12733_v23 = vsel %vm1286_vm3, %v1336_v37, %v1338_v63  ;;  %v12753_v37 = vpack.c.bf16 %v12017_v8, %v12012_v6  ;;  %v15397_v58 = vld [vmem:[#allocation64_spill] sm:$0xff] }
 0x110   : > { %10135 = vmatprep.mubr.msk.bf16.mxu0 %vm595_vm2, %v12694_v46  ;;  %15336 = vst [vmem:[#allocation99_spill] sm:$0xff] %v12708_v7  ;;  %15338 = vst [vmem:[#allocation101_spill] sm:$0xff] %v12714_v51  ;;  %v12773_v6 = vpack.c.bf16 %v12036_v14, %v12033_v13  ;;  %v2452_v8 = vsel %vm680_vm0, %v12565_v26, 0  ;;  %v12796_v14 = vpack.c.bf16 %v12048_v19, %v12045_v18 }
 0x111   : > { %15340 = vst [vmem:[#allocation103_spill] sm:$0xff] %v12724_v4  ;;  %15344 = vst [vmem:[#allocation107_spill] sm:$0xff] %v12733_v23  ;;  %v12816_v18 = vpack.c.bf16 %v12083_v44, %v12066_v29  ;;  %v12836_v29 = vpack.c.bf16 %v12161_v30, %v12126_v62  ;;  %v15366_v30 = vld [vmem:[#allocation5_spill] sm:$0xff]  ;;  %v2171_v43 = vshrl.u32 %v12753_v37, 16 }
 0x112   : > { %v2195_v15 = vshrl.u32 %v12796_v14, 16 }
 0x114   : > { %v12721_v46 = vpop.f32.mrb[8].mxu1 }
 0x115   : > { %15339 = vst [vmem:[#allocation102_spill] sm:$0xff] %v12721_v46  ;;  %v12726_v7 = vpop.f32.mrb[9].mxu1 }
 0x116   : > { %15341 = vst [vmem:[#allocation104_spill] sm:$0xff] %v12726_v7  ;;  %v12728_v34 = vpop.f32.mrb[10].mxu1 }
 0x117   : > { %10136 = vmatmul.mubr.msk.bf16.gmra.mrb[44].mxu0 %vm595_vm2, %v12711_v33  ;;  %15342 = vst [vmem:[#allocation105_spill] sm:$0xff] %v12728_v34  ;;  %v12730_v22 = vpop.f32.mrb[11].mxu1  ;;  %v12737_v33 = vsel %vm1286_vm3, %v1338_v63, %v12724_v4 }
 0x118   : > { %10139 = vmatprep.mubr.msk.bf16.mxu0 %vm595_vm2, %v12714_v51  ;;  %15343 = vst [vmem:[#allocation106_spill] sm:$0xff] %v12730_v22  ;;  %15345 = vst [vmem:[#allocation108_spill] sm:$0xff] %v12737_v33 }
 0x11c   : > { %v12743_v46 = vpop.f32.mrb[12].mxu1 }
 0x11d   : > { %15346 = vst [vmem:[#allocation109_spill] sm:$0xff] %v12743_v46  ;;  %v12745_v7 = vpop.f32.mrb[13].mxu1 }
 0x11e   : > { %15347 = vst [vmem:[#allocation110_spill] sm:$0xff] %v12745_v7  ;;  %v12747_v34 = vpop.f32.mrb[14].mxu1  ;;  %v15379_v7 = vld [vmem:[#allocation26_spill] sm:$0xff] }
 0x11f   : > { %10140 = vmatmul.mubr.msk.bf16.gmra.mrb[48].mxu0 %vm595_vm2, %v12733_v23  ;;  %15348 = vst [vmem:[#allocation111_spill] sm:$0xff] %v12747_v34  ;;  %v12749_v22 = vpop.f32.mrb[15].mxu1  ;;  %v12767_v34 = vpack.c.bf16 %v12030_v12, %v12020_v9  ;;  %v15383_v23 = vld [vmem:[#allocation37_spill] sm:$0xff] }
 0x120   : > { %10143 = vmatprep.mubr.msk.bf16.mxu0 %vm595_vm2, %v12737_v33  ;;  %15349 = vst [vmem:[#allocation112_spill] sm:$0xff] %v12749_v22 }
 0x121   : > { %v2177_v53 = vshll.u32 %v12767_v34, 16 }
 0x124   : > { %v12759_v63 = vpop.f32.mrb[16].mxu1 }
 0x125   : > { %15350 = vst [vmem:[#allocation113_spill] sm:$0xff] %v12759_v63  ;;  %v12761_v33 = vpop.f32.mrb[17].mxu1  ;;  %v12780_v63 = vld [vmem:[%s15078_s1 + $0x14] sm:$0xf] }
 0x126   : > { %15351 = vst [vmem:[#allocation114_spill] sm:$0xff] %v12761_v33  ;;  %v12763_v46 = vpop.f32.mrb[18].mxu1 }
 0x127   : > { %10144 = vmatmul.mubr.msk.bf16.gmra.mrb[56].mxu0 %vm595_vm2, %v12724_v4  ;;  %15352 = vst [vmem:[#allocation115_spill] sm:$0xff] %v12763_v46  ;;  %v12769_v22 = vpop.f32.mrb[19].mxu1  ;;  %v15375_v46 = vld [vmem:[#allocation16_spill] sm:$0xff] }
 0x128   : > { %10149 = vmatprep.mubr.msk.bf16.mxu0 %vm595_vm2, %v12753_v37  ;;  %15353 = vst [vmem:[#allocation116_spill] sm:$0xff] %v12769_v22 }
 0x12c   : > { %v12786_v9 = vpop.f32.mrb[20].mxu1 }
 0x12d   : > { %15354 = vst [vmem:[#allocation117_spill] sm:$0xff] %v12786_v9  ;;  %v12788_v12 = vpop.f32.mrb[21].mxu1 }
 0x12e   : > { %15355 = vst [vmem:[#allocation118_spill] sm:$0xff] %v12788_v12  ;;  %v12792_v13 = vpop.f32.mrb[22].mxu1 }
 0x12f   : > { %10150 = vmatmul.mubr.msk.bf16.vlgmr.msra.gmra.mrb[0].mxu0 %vm595_vm2, %v12767_v34  ;;  %15356 = vst [vmem:[#allocation119_spill] sm:$0xff] %v12792_v13  ;;  %v12798_v26 = vpop.f32.mrb[23].mxu1 }
 0x130   : > { %10206 = vmatpush3.bf16.msra.mxu0 %v2452_v8  ;;  %10153 = vmatprep.mubr.msk.bf16.mxu0 %vm595_vm2, %v12773_v6  ;;  %15357 = vst [vmem:[#allocation120_spill] sm:$0xff] %v12798_v26  ;;  %v12802_v8 = vpack.c.bf16 %v12063_v28, %v12051_v20  ;;  %v12822_v20 = vpack.c.bf16 %v12123_v61, %v12086_v45  ;;  %v15371_v26 = vld [vmem:[#allocation11_spill] sm:$0xff] }
 0x131   : > { %11771 = vmatprep.subr.msk.bf16.mxu0 %vm680_vm0, %v12780_v63  ;;  %v12842_v45 = vpack.c.bf16 %v12092_v48, %v12164_v31  ;;  %v15368_v48 = vld [vmem:[#allocation8_spill] sm:$0xff]  ;;  %v15369_v31 = vld [vmem:[#allocation9_spill] sm:$0xff] }
 0x132   : > { %v2202_v2 = vshrl.u32 %v12802_v8, 16  ;;  %15399 = vst [vmem:[#allocation8_spill] sm:$0xff] %v13076_v25 }
 0x134   : > { %v12808_v12 = vpop.f32.mrb[24].mxu1 }
 0x135   : > { %15358 = vst [vmem:[#allocation121_spill] sm:$0xff] %v12808_v12  ;;  %v12810_v9 = vpop.f32.mrb[25].mxu1  ;;  %v12862_v12 = vpack.c.bf16 %v15369_v31, %v15368_v48  ;;  %v15377_v48 = vld [vmem:[#allocation19_spill] sm:$0xff] }
 0x136   : > { %15359 = vst [vmem:[#allocation122_spill] sm:$0xff] %v12810_v9  ;;  %v12812_v13 = vpop.f32.mrb[26].mxu1 }
 0x137   : > { %10154 = vmatmul.mubr.msk.bf16.gmra.mrb[4].mxu0 %vm595_vm2, %v12796_v14  ;;  %15360 = vst [vmem:[#allocation123_spill] sm:$0xff] %v12812_v13  ;;  %v12818_v19 = vpop.f32.mrb[27].mxu1 }
 0x138   : > { %10157 = vmatprep.mubr.msk.bf16.mxu0 %vm595_vm2, %v12802_v8  ;;  %15361 = vst [vmem:[#allocation124_spill] sm:$0xff] %v12818_v19 }
 0x13c   : > { %v12828_v28 = vpop.f32.mrb[28].mxu1 }
 0x13d   : > { %15362 = vst [vmem:[#allocation125_spill] sm:$0xff] %v12828_v28  ;;  %v12830_v9 = vpop.f32.mrb[29].mxu1 }
 0x13e   : > { %15363 = vst [vmem:[#allocation126_spill] sm:$0xff] %v12830_v9  ;;  %v12832_v13 = vpop.f32.mrb[30].mxu1 }
 0x13f   : > { %10158 = vmatmul.mubr.msk.bf16.gmra.mrb[8].mxu0 %vm595_vm2, %v12816_v18  ;;  %15364 = vst [vmem:[#allocation127_spill] sm:$0xff] %v12832_v13  ;;  %v12838_v44 = vpop.f32.mrb[31].mxu1  ;;  %v12850_v13 = vpack.c.bf16 %v12111_v57, %v12095_v49  ;;  %v15372_v49 = vld [vmem:[#allocation12_spill] sm:$0xff]  ;;  %v15373_v57 = vld [vmem:[#allocation14_spill] sm:$0xff] }
 0x140   : > { %10161 = vmatprep.mubr.msk.bf16.mxu0 %vm595_vm2, %v12822_v20  ;;  %15365 = vst [vmem:[#allocation128_spill] sm:$0xff] %v12838_v44  ;;  %v15367_v44 = vld [vmem:[#allocation6_spill] sm:$0xff] }
 0x141   : > { %v12854_v19 = vpack.c.bf16 %v15367_v44, %v15366_v30  ;;  %v12874_v44 = vpack.c.bf16 %v15373_v57, %v15372_v49  ;;  %v15374_v30 = vld [vmem:[#allocation15_spill] sm:$0xff]  ;;  %v15381_v49 = vld [vmem:[#allocation32_spill] sm:$0xff] }
 0x142   : > { %v12878_v33 = vpack.c.bf16 %v15375_v46, %v15374_v30  ;;  %v15380_v46 = vld [vmem:[#allocation27_spill] sm:$0xff]  ;;  %v15382_v30 = vld [vmem:[#allocation33_spill] sm:$0xff] }
 0x143   : > { %v12898_v57 = vpack.c.bf16 %v15381_v49, %v15380_v46  ;;  %v12902_v51 = vpack.c.bf16 %v15383_v23, %v15382_v30  ;;  %v15388_v23 = vld [vmem:[#allocation47_spill] sm:$0xff]  ;;  %v15389_v46 = vld [vmem:[#allocation49_spill] sm:$0xff]  ;;  %v15390_v30 = vld [vmem:[#allocation50_spill] sm:$0xff] }
 0x144   : > { %v10029_v61 = vpop.f32.mrb[32].mxu1  ;;  %v12922_v49 = vpack.c.bf16 %v15389_v46, %v15388_v23  ;;  %v12926_v35 = vpack.c.bf16 %v15391_v59, %v15390_v30  ;;  %v12945_v59 = vld [vmem:[%s12006_s21 + $0x1c0] sm:$0xff]  ;;  %v2173_v23 = vshll.u32 %v12753_v37, 16 }
 0x145   : > { %v926_v9 = vpop.f32.mrb[33].mxu1  ;;  %15395 = vst [vmem:[#allocation5_spill] sm:$0xff] %v12945_v59  ;;  %v12958_v50 = vpack.c.bf16 %v12945_v59, %v15397_v58 }
 0x146   : > { %v10030_v28 = vpop.f32.mrb[34].mxu1  ;;  %v2175_v21 = vrot.slane %v2173_v23, 1  ;;  %v2181_v23 = vshrl.u32 %v12767_v34, 16 }
 0x147   : > { %10162 = vmatmul.mubr.msk.bf16.gmra.mrb[12].mxu0 %vm595_vm2, %v12836_v29  ;;  %v929_v62 = vpop.f32.mrb[35].mxu1  ;;  %v15370_v28 = vld [vmem:[#allocation10_spill] sm:$0xff] }
 0x148   : > { %10165 = vmatprep.mubr.msk.bf16.mxu0 %vm595_vm2, %v12842_v45  ;;  %v12866_v22 = vpack.c.bf16 %v15371_v26, %v15370_v28  ;;  %v15376_v26 = vld [vmem:[#allocation17_spill] sm:$0xff]  ;;  %v15378_v28 = vld [vmem:[#allocation20_spill] sm:$0xff] }
 0x149   : > { %v12886_v31 = vpack.c.bf16 %v15377_v48, %v15376_v26  ;;  %v12890_v4 = vpack.c.bf16 %v15379_v7, %v15378_v28  ;;  %v15384_v7 = vld [vmem:[#allocation38_spill] sm:$0xff]  ;;  %v15385_v26 = vld [vmem:[#allocation40_spill] sm:$0xff]  ;;  %v15386_v28 = vld [vmem:[#allocation41_spill] sm:$0xff] }
 0x14a   : > { %v12910_v48 = vpack.c.bf16 %v15385_v26, %v15384_v7  ;;  %v12914_v10 = vpack.c.bf16 %v15387_v11, %v15386_v28  ;;  %v15392_v11 = vld [vmem:[#allocation55_spill] sm:$0xff]  ;;  %v15393_v7 = vld [vmem:[#allocation57_spill] sm:$0xff]  ;;  %v15394_v28 = vld [vmem:[#allocation58_spill] sm:$0xff] }
 0x14b   : > { %v12934_v26 = vpack.c.bf16 %v15393_v7, %v15392_v11  ;;  %v12938_v0 = vpack.c.bf16 %v12450_v54, %v15394_v28  ;;  %v15396_v7 = vld [vmem:[#allocation62_spill] sm:$0xff] }
 0x14c   : > { %v12952_v16 = vpack.c.bf16 %v12461_v42, %v15396_v7  ;;  %v12969_v42 = vld [vmem:[%s12006_s21 + $0x1c8] sm:$0xff]  ;;  %v2191_v7 = vshll.u32 %v12796_v14, 16 }
 0x14d   : > { %15398 = vst [vmem:[#allocation6_spill] sm:$0xff] %v12969_v42  ;;  %v1767_v58 = vpack.c.bf16 %v12969_v42, %v12969_v42 }
 0x14f   : > { %10166 = vmatmul.mubr.msk.bf16.gmra.mrb[16].mxu0 %vm595_vm2, %v12850_v13 }
 0x150   : > { %10169 = vmatprep.mubr.msk.bf16.mxu0 %vm595_vm2, %v12854_v19 }
 0x157   : > { %10170 = vmatmul.mubr.msk.bf16.gmra.mrb[20].mxu0 %vm595_vm2, %v12862_v12 }
 0x158   : > { %10173 = vmatprep.mubr.msk.bf16.mxu0 %vm595_vm2, %v12866_v22 }
 0x15f   : > { %10174 = vmatmul.mubr.msk.bf16.gmra.mrb[24].mxu0 %vm595_vm2, %v12874_v44 }
 0x160   : > { %10177 = vmatprep.mubr.msk.bf16.mxu0 %vm595_vm2, %v12878_v33 }
 0x167   : > { %10178 = vmatmul.mubr.msk.bf16.gmra.mrb[28].mxu0 %vm595_vm2, %v12886_v31 }
 0x168   : > { %10181 = vmatprep.mubr.msk.bf16.mxu0 %vm595_vm2, %v12890_v4 }
 0x16f   : > { %10182 = vmatmul.mubr.msk.bf16.gmra.mrb[32].mxu0 %vm595_vm2, %v12898_v57 }
 0x170   : > { %10185 = vmatprep.mubr.msk.bf16.mxu0 %vm595_vm2, %v12902_v51 }
 0x177   : > { %10186 = vmatmul.mubr.msk.bf16.gmra.mrb[36].mxu0 %vm595_vm2, %v12910_v48 }
 0x178   : > { %10189 = vmatprep.mubr.msk.bf16.mxu0 %vm595_vm2, %v12914_v10 }
 0x17f   : > { %10190 = vmatmul.mubr.msk.bf16.gmra.mrb[40].mxu0 %vm595_vm2, %v12922_v49 }
 0x180   : > { %10193 = vmatprep.mubr.msk.bf16.mxu0 %vm595_vm2, %v12926_v35 }
 0x187   : > { %10194 = vmatmul.mubr.msk.bf16.gmra.mrb[44].mxu0 %vm595_vm2, %v12934_v26 }
 0x188   : > { %10197 = vmatprep.mubr.msk.bf16.mxu0 %vm595_vm2, %v12938_v0 }
 0x18a   : > { %v10087_v46 = vpop.f32.mrb[52].mxu0 }
 0x18b   : > { %v12948_v30 = vadd.f32 %v10087_v46, %v10029_v61  ;;  %v1242_v11 = vpop.f32.mrb[53].mxu0  ;;  %v2179_v46 = vrot.slane %v2177_v53, 1  ;;  %v2193_v53 = vrot.slane %v2191_v7, 1  ;;  %v2209_v7 = vshrl.u32 %v12816_v18, 16 }
 0x18c   : > { %v12954_v54 = vadd.f32 %v1242_v11, %v926_v9  ;;  %v10088_v28 = vpop.f32.mrb[54].mxu0  ;;  %v2176_v9 = vor.u32 %v2175_v21, %v2171_v43  ;;  %v2184_v11 = vshll.u32 %v12773_v6, 16  ;;  %v2198_v43 = vshll.u32 %v12802_v8, 16 }
 0x18d   : > { %v1245_v1 = vpop.f32.mrb[55].mxu0  ;;  %v2183_v59 = vor.u32 %v2181_v23, %v2179_v46 }
 0x18e   : > { %v12962_v61 = vadd.f32 %v1245_v1, %v929_v62  ;;  %v2180_v1 = vsel %vm371_vm1, %v2176_v9, %v2179_v46  ;;  %v2188_v62 = vshrl.u32 %v12773_v6, 16  ;;  %v2186_v28 = vrot.slane %v2184_v11, 1  ;;  %v12991_v46 = vld [vmem:[%s15078_s1 + $0x18] sm:$0xf] }
 0x18f   : > { %10198 = vmatmul.mubr.msk.bf16.gmra.mrb[48].mxu0 %vm595_vm2, %v12952_v16  ;;  %v2935_v9 = vsel %vm680_vm0, %v12780_v63, 0  ;;  %v2200_v11 = vrot.slane %v2198_v43, 1  ;;  %v2226_v43 = vshll.u32 %v12842_v45, 16 }
 0x190   : > { %10201 = vmatprep.mubr.msk.bf16.mxu0 %vm595_vm2, %v12958_v50  ;;  %v2190_v21 = vor.u32 %v2188_v62, %v2186_v28  ;;  %v2187_v24 = vsel %vm371_vm1, %v2183_v59, %v2186_v28  ;;  %v2197_v59 = vor.u32 %v2195_v15, %v2193_v53 }
 0x191   : > { %v2204_v23 = vor.u32 %v2202_v2, %v2200_v11 }
 0x192   : > { %v2194_v55 = vsel %vm371_vm1, %v2190_v21, %v2193_v53  ;;  %v2201_v62 = vsel %vm371_vm1, %v2197_v59, %v2200_v11  ;;  %v2219_v21 = vshll.u32 %v12836_v29, 16  ;;  %v2230_v59 = vshrl.u32 %v12842_v45, 16 }
 0x194   : > { %v2221_v53 = vrot.slane %v2219_v21, 1  ;;  %v2237_v21 = vshrl.u32 %v12850_v13, 16 }
 0x197   : > { %10202 = vmatmul.mubr.msk.bf16.gmra.mrb[60].mxu0 %vm595_vm2, %v1767_v58  ;;  %v2205_v58 = vshll.u32 %v12816_v18, 16 }
 0x198   : > { %10207 = vmatprep.mubr.msk.bf16.mxu0 %vm595_vm2, %v2180_v1  ;;  %v2212_v1 = vshll.u32 %v12822_v20, 16 }
 0x199   : > { %v2207_v63 = vrot.slane %v2205_v58, 1  ;;  %v2223_v58 = vshrl.u32 %v12836_v29, 16 }
 0x19b   : > { %v2208_v28 = vsel %vm371_vm1, %v2204_v23, %v2207_v63  ;;  %v2211_v2 = vor.u32 %v2209_v7, %v2207_v63  ;;  %v2233_v23 = vshll.u32 %v12850_v13, 16  ;;  %v2225_v63 = vor.u32 %v2223_v58, %v2221_v53 }
 0x19d   : > { %v2235_v7 = vrot.slane %v2233_v23, 1  ;;  %v2251_v23 = vshrl.u32 %v12862_v12, 16 }
 0x19f   : > { %10208 = vmatmul.mubr.msk.bf16.vlgmr.msra.gmra.mrb[0].mxu0 %vm595_vm2, %v2187_v24  ;;  %v2216_v24 = vshrl.u32 %v12822_v20, 16 }
 0x1a0   : > { %10264 = vmatpush3.bf16.msra.mxu0 %v2935_v9  ;;  %10211 = vmatprep.mubr.msk.bf16.mxu0 %vm595_vm2, %v2194_v55  ;;  %v2214_v55 = vrot.slane %v2212_v1, 1  ;;  %v2228_v1 = vrot.slane %v2226_v43, 1 }
 0x1a1   : > { %11772 = vmatprep.subr.msk.bf16.mxu0 %vm680_vm0, %v12991_v46 }
 0x1a2   : > { %v2218_v15 = vor.u32 %v2216_v24, %v2214_v55  ;;  %v2215_v9 = vsel %vm371_vm1, %v2211_v2, %v2214_v55  ;;  %v2229_v24 = vsel %vm371_vm1, %v2225_v63, %v2228_v1  ;;  %v2244_v2 = vshrl.u32 %v12854_v19, 16 }
 0x1a3   : > { %v2258_v63 = vshrl.u32 %v12866_v22, 16 }
 0x1a4   : > { %v2222_v11 = vsel %vm371_vm1, %v2218_v15, %v2221_v53  ;;  %v2247_v15 = vshll.u32 %v12862_v12, 16  ;;  %v2239_v53 = vor.u32 %v2237_v21, %v2235_v7 }
 0x1a6   : > { %v2249_v58 = vrot.slane %v2247_v15, 1  ;;  %v2265_v15 = vshrl.u32 %v12874_v44, 16 }
 0x1a7   : > { %10212 = vmatmul.mubr.msk.bf16.gmra.mrb[4].mxu0 %vm595_vm2, %v2201_v62  ;;  %v2232_v62 = vor.u32 %v2230_v59, %v2228_v1 }
 0x1a8   : > { %10215 = vmatprep.mubr.msk.bf16.mxu0 %vm595_vm2, %v2208_v28  ;;  %v2240_v28 = vshll.u32 %v12854_v19, 16 }
 0x1a9   : > { %v2236_v55 = vsel %vm371_vm1, %v2232_v62, %v2235_v7  ;;  %v2261_v62 = vshll.u32 %v12874_v44, 16  ;;  %v2253_v7 = vor.u32 %v2251_v23, %v2249_v58 }
 0x1aa   : > { %v2242_v43 = vrot.slane %v2240_v28, 1 }
 0x1ab   : > { %v2263_v21 = vrot.slane %v2261_v62, 1  ;;  %v2279_v62 = vshrl.u32 %v12886_v31, 16 }
 0x1ac   : > { %v2243_v59 = vsel %vm371_vm1, %v2239_v53, %v2242_v43  ;;  %v2272_v53 = vshrl.u32 %v12878_v33, 16 }
 0x1af   : > { %10216 = vmatmul.mubr.msk.bf16.gmra.mrb[8].mxu0 %vm595_vm2, %v2215_v9  ;;  %v2246_v9 = vor.u32 %v2244_v2, %v2242_v43 }
 0x1b0   : > { %10219 = vmatprep.mubr.msk.bf16.mxu0 %vm595_vm2, %v2222_v11  ;;  %v2254_v11 = vshll.u32 %v12866_v22, 16 }
 0x1b1   : > { %v2250_v1 = vsel %vm371_vm1, %v2246_v9, %v2249_v58  ;;  %v2275_v9 = vshll.u32 %v12886_v31, 16  ;;  %v2267_v58 = vor.u32 %v2265_v15, %v2263_v21 }
 0x1b2   : > { %v2256_v28 = vrot.slane %v2254_v11, 1 }
 0x1b3   : > { %v2277_v23 = vrot.slane %v2275_v9, 1  ;;  %v2293_v9 = vshrl.u32 %v12898_v57, 16 }
 0x1b4   : > { %v2257_v2 = vsel %vm371_vm1, %v2253_v7, %v2256_v28  ;;  %v2286_v7 = vshrl.u32 %v12890_v4, 16 }
 0x1b7   : > { %10220 = vmatmul.mubr.msk.bf16.gmra.mrb[12].mxu0 %vm595_vm2, %v2229_v24  ;;  %v2260_v24 = vor.u32 %v2258_v63, %v2256_v28 }
 0x1b8   : > { %10223 = vmatprep.mubr.msk.bf16.mxu0 %vm595_vm2, %v2236_v55  ;;  %v2268_v55 = vshll.u32 %v12878_v33, 16 }
 0x1b9   : > { %v2264_v43 = vsel %vm371_vm1, %v2260_v24, %v2263_v21  ;;  %v2289_v24 = vshll.u32 %v12898_v57, 16  ;;  %v2281_v21 = vor.u32 %v2279_v62, %v2277_v23 }
 0x1ba   : > { %v2270_v11 = vrot.slane %v2268_v55, 1 }
 0x1bb   : > { %v2291_v15 = vrot.slane %v2289_v24, 1  ;;  %v2307_v24 = vshrl.u32 %v12910_v48, 16 }
 0x1bc   : > { %v2271_v63 = vsel %vm371_vm1, %v2267_v58, %v2270_v11  ;;  %v2300_v58 = vshrl.u32 %v12902_v51, 16 }
 0x1bf   : > { %10224 = vmatmul.mubr.msk.bf16.gmra.mrb[16].mxu0 %vm595_vm2, %v2243_v59  ;;  %v2274_v59 = vor.u32 %v2272_v53, %v2270_v11 }
 0x1c0   : > { %10227 = vmatprep.mubr.msk.bf16.mxu0 %vm595_vm2, %v2250_v1  ;;  %v2282_v1 = vshll.u32 %v12890_v4, 16 }
 0x1c1   : > { %v2278_v28 = vsel %vm371_vm1, %v2274_v59, %v2277_v23  ;;  %v2303_v59 = vshll.u32 %v12910_v48, 16  ;;  %v2295_v23 = vor.u32 %v2293_v9, %v2291_v15 }
 0x1c2   : > { %v2284_v55 = vrot.slane %v2282_v1, 1 }
 0x1c3   : > { %v2305_v62 = vrot.slane %v2303_v59, 1  ;;  %v2321_v59 = vshrl.u32 %v12922_v49, 16 }
 0x1c4   : > { %v2285_v53 = vsel %vm371_vm1, %v2281_v21, %v2284_v55  ;;  %v2314_v21 = vshrl.u32 %v12914_v10, 16 }
 0x1c7   : > { %10228 = vmatmul.mubr.msk.bf16.gmra.mrb[20].mxu0 %vm595_vm2, %v2257_v2  ;;  %v2288_v2 = vor.u32 %v2286_v7, %v2284_v55 }
 0x1c8   : > { %10231 = vmatprep.mubr.msk.bf16.mxu0 %vm595_vm2, %v2264_v43  ;;  %v2296_v43 = vshll.u32 %v12902_v51, 16 }
 0x1c9   : > { %v2292_v11 = vsel %vm371_vm1, %v2288_v2, %v2291_v15  ;;  %v2317_v2 = vshll.u32 %v12922_v49, 16  ;;  %v2309_v15 = vor.u32 %v2307_v24, %v2305_v62 }
 0x1ca   : > { %v2298_v1 = vrot.slane %v2296_v43, 1 }
 0x1cb   : > { %v2319_v9 = vrot.slane %v2317_v2, 1  ;;  %v2335_v2 = vshrl.u32 %v12934_v26, 16 }
 0x1cc   : > { %v2299_v7 = vsel %vm371_vm1, %v2295_v23, %v2298_v1  ;;  %v2328_v23 = vshrl.u32 %v12926_v35, 16 }
 0x1cf   : > { %10232 = vmatmul.mubr.msk.bf16.gmra.mrb[24].mxu0 %vm595_vm2, %v2271_v63  ;;  %v2302_v63 = vor.u32 %v2300_v58, %v2298_v1 }
 0x1d0   : > { %10235 = vmatprep.mubr.msk.bf16.mxu0 %vm595_vm2, %v2278_v28  ;;  %v2310_v28 = vshll.u32 %v12914_v10, 16 }
 0x1d1   : > { %v2306_v55 = vsel %vm371_vm1, %v2302_v63, %v2305_v62  ;;  %v2331_v63 = vshll.u32 %v12934_v26, 16  ;;  %v2323_v62 = vor.u32 %v2321_v59, %v2319_v9 }
 0x1d2   : > { %v2312_v43 = vrot.slane %v2310_v28, 1 }
 0x1d3   : > { %v2333_v24 = vrot.slane %v2331_v63, 1 }
 0x1d4   : > { %v2313_v58 = vsel %vm371_vm1, %v2309_v15, %v2312_v43  ;;  %v2342_v15 = vshrl.u32 %v12938_v0, 16 }
 0x1d7   : > { %10236 = vmatmul.mubr.msk.bf16.gmra.mrb[28].mxu0 %vm595_vm2, %v2285_v53  ;;  %v2316_v53 = vor.u32 %v2314_v21, %v2312_v43 }
 0x1d8   : > { %10239 = vmatprep.mubr.msk.bf16.mxu0 %vm595_vm2, %v2292_v11  ;;  %v2324_v11 = vshll.u32 %v12926_v35, 16 }
 0x1d9   : > { %v2320_v1 = vsel %vm371_vm1, %v2316_v53, %v2319_v9  ;;  %v2345_v53 = vshll.u32 %v12952_v16, 16  ;;  %v2337_v9 = vor.u32 %v2335_v2, %v2333_v24 }
 0x1da   : > { %v2326_v28 = vrot.slane %v2324_v11, 1 }
 0x1dc   : > { %v2327_v21 = vsel %vm371_vm1, %v2323_v62, %v2326_v28 }
 0x1df   : > { %10240 = vmatmul.mubr.msk.bf16.gmra.mrb[32].mxu0 %vm595_vm2, %v2299_v7  ;;  %v2330_v7 = vor.u32 %v2328_v23, %v2326_v28  ;;  %v2352_v23 = vshll.u32 %v12958_v50, 16  ;;  %v2349_v28 = vshrl.u32 %v12952_v16, 16 }
 0x1e0   : > { %10243 = vmatprep.mubr.msk.bf16.mxu0 %vm595_vm2, %v2306_v55  ;;  %v2338_v55 = vshll.u32 %v12938_v0, 16 }
 0x1e1   : > { %v2334_v43 = vsel %vm371_vm1, %v2330_v7, %v2333_v24  ;;  %v2356_v7 = vshrl.u32 %v12958_v50, 16  ;;  %v2354_v24 = vrot.slane %v2352_v23, 1 }
 0x1e2   : > { %v2340_v11 = vrot.slane %v2338_v55, 1 }
 0x1e3   : > { %v2358_v2 = vor.u32 %v2356_v7, %v2354_v24  ;;  %v3265_v7 = vsel %vm680_vm0, %v12991_v46, 0 }
 0x1e4   : > { %v2344_v59 = vor.u32 %v2342_v15, %v2340_v11  ;;  %v2341_v63 = vsel %vm371_vm1, %v2337_v9, %v2340_v11 }
 0x1e7   : > { %10244 = vmatmul.mubr.msk.bf16.gmra.mrb[36].mxu0 %vm595_vm2, %v2313_v58  ;;  %v13082_v58 = vpack.c.bf16 %v13076_v25, %v12969_v42 }
 0x1e8   : > { %10247 = vmatprep.mubr.msk.bf16.mxu0 %vm595_vm2, %v2320_v1  ;;  %v2347_v1 = vrot.slane %v2345_v53, 1 }
 0x1e9   : > { %v2360_v55 = vshll.u32 %v13082_v58, 16 }
 0x1ea   : > { %v2348_v62 = vsel %vm371_vm1, %v2344_v59, %v2347_v1 }
 0x1ef   : > { %10248 = vmatmul.mubr.msk.bf16.gmra.mrb[40].mxu0 %vm595_vm2, %v2327_v21  ;;  %v2351_v21 = vor.u32 %v2349_v28, %v2347_v1  ;;  %v2364_v1 = vshrl.u32 %v13082_v58, 16 }
 0x1f0   : > { %10251 = vmatprep.mubr.msk.bf16.mxu0 %vm595_vm2, %v2334_v43  ;;  %v2362_v43 = vrot.slane %v2360_v55, 1 }
 0x1f1   : > { %v2355_v25 = vsel %vm371_vm1, %v2351_v21, %v2354_v24  ;;  %v2806_v24 = vrot.slane %v12822_v20, 1  ;;  %v2808_v21 = vrot.slane %v12836_v29, 1  ;;  %v2814_v20 = vrot.slane %v12854_v19, 1 }
 0x1f2   : > { %v2366_v28 = vor.u32 %v2364_v1, %v2362_v43  ;;  %v2816_v29 = vrot.slane %v12862_v12, 1  ;;  %v2822_v12 = vrot.slane %v12878_v33, 1  ;;  %v2824_v19 = vrot.slane %v12886_v31, 1 }
 0x1f3   : > { %v2830_v33 = vrot.slane %v12902_v51, 1  ;;  %v2832_v31 = vrot.slane %v12910_v48, 1  ;;  %v2838_v51 = vrot.slane %v12926_v35, 1  ;;  %v2840_v48 = vrot.slane %v12934_v26, 1 }
 0x1f4   : > { %v2846_v35 = vrot.slane %v12958_v50, 1  ;;  %v2848_v26 = vrot.slane %v13082_v58, 1  ;;  %v4383_v58 = vld [vmem:[%s15080_s3] sm:$0xff] }
 0x1f7   : > { %10252 = vmatmul.mubr.msk.bf16.gmra.mrb[44].mxu0 %vm595_vm2, %v2341_v63  ;;  %v2363_v63 = vsel %vm371_vm1, %v2358_v2, %v2362_v43  ;;  %v2812_v43 = vrot.slane %v12850_v13, 1  ;;  %v2818_v13 = vrot.slane %v12866_v22, 1  ;;  %v2826_v22 = vrot.slane %v12890_v4, 1 }
 0x1f8   : > { %10255 = vmatprep.mubr.msk.bf16.mxu0 %vm595_vm2, %v2348_v62  ;;  %v2834_v4 = vrot.slane %v12914_v10, 1  ;;  %v2842_v10 = vrot.slane %v12938_v0, 1 }
 0x1f9   : > { %v2819_v1 = vsel %vm1286_vm3, %v2816_v29, %v2818_v13 }
 0x1fa   : > { %v10145_v15 = vpop.f32.mrb[56].mxu0 }
 0x1fb   : > { %v13093_v53 = vadd.f32 %v10145_v15, %v12948_v30  ;;  %v1671_v11 = vpop.f32.mrb[57].mxu0  ;;  %v2795_v30 = vrot.slane %v12753_v37, 1 }
 0x1fc   : > { %v13096_v9 = vadd.f32 %v1671_v11, %v12954_v54  ;;  %v10146_v59 = vpop.f32.mrb[58].mxu0  ;;  %v2796_v54 = vrot.slane %v12767_v34, 1  ;;  %v13120_v34 = vld [vmem:[%s15078_s1 + $0x1c] sm:$0xf] }
 0x1fd   : > { %v1674_v42 = vpop.f32.mrb[59].mxu0  ;;  %v2815_v59 = vsel %vm1286_vm3, %v2812_v43, %v2814_v20 }
 0x1fe   : > { %v13101_v23 = vadd.f32 %v1674_v42, %v12962_v61  ;;  %v2797_v62 = vsel %vm1286_vm3, %v2795_v30, %v2796_v54  ;;  %v2798_v61 = vrot.slane %v12773_v6, 1  ;;  %v2800_v42 = vrot.slane %v12796_v14, 1 }
 0x1ff   : > { %10256 = vmatmul.mubr.msk.bf16.gmra.mrb[48].mxu0 %vm595_vm2, %v2355_v25  ;;  %v2802_v6 = vrot.slane %v12802_v8, 1  ;;  %v2804_v14 = vrot.slane %v12816_v18, 1  ;;  %v2809_v8 = vsel %vm1286_vm3, %v2806_v24, %v2808_v21  ;;  %v2810_v18 = vrot.slane %v12842_v45, 1 }
 0x200   : > { %10259 = vmatprep.mubr.msk.bf16.mxu0 %vm595_vm2, %v2363_v63  ;;  %v2799_v25 = vsel %vm1286_vm3, %v2796_v54, %v2798_v61  ;;  %v2801_v37 = vsel %vm1286_vm3, %v2798_v61, %v2800_v42  ;;  %v2817_v63 = vsel %vm1286_vm3, %v2814_v20, %v2816_v29  ;;  %v2820_v45 = vrot.slane %v12874_v44, 1  ;;  %v4388_v20 = vld [vmem:[%s15080_s3 + $0x28] sm:$0xff]  ;;  %v4389_v29 = vld [vmem:[%s15080_s3 + $0x30] sm:$0xff] }
 0x201   : > { %v2803_v46 = vsel %vm1286_vm3, %v2800_v42, %v2802_v6  ;;  %v2805_v55 = vsel %vm1286_vm3, %v2802_v6, %v2804_v14  ;;  %v2807_v2 = vsel %vm1286_vm3, %v2804_v14, %v2806_v24  ;;  %v2811_v15 = vsel %vm1286_vm3, %v2808_v21, %v2810_v18 }
 0x202   : > { %v2813_v11 = vsel %vm1286_vm3, %v2810_v18, %v2812_v43  ;;  %v2821_v30 = vsel %vm1286_vm3, %v2818_v13, %v2820_v45  ;;  %v2823_v54 = vsel %vm1286_vm3, %v2820_v45, %v2822_v12  ;;  %v2828_v44 = vrot.slane %v12898_v57, 1  ;;  %v4391_v13 = vld [vmem:[%s15080_s3 + $0x40] sm:$0xff] }
 0x203   : > { %v2836_v57 = vrot.slane %v12922_v49, 1  ;;  %v2841_v14 = vsel %vm1286_vm3, %v2838_v51, %v2840_v48  ;;  %v2844_v49 = vrot.slane %v12952_v16, 1  ;;  %v11901_v24 = vmov 0   ;;  %v4395_v45 = vld [vmem:[%s15080_s3 + $0x60] sm:$0xff] }
 0x204   : > { %v2829_v61 = vsel %vm1286_vm3, %v2826_v22, %v2828_v44  ;;  %v2831_v42 = vsel %vm1286_vm3, %v2828_v44, %v2830_v33  ;;  %11816 = vset.pattern.permute.xlu0 %v11901_v24  ;;  %11817 = vset.pattern.permute.xlu1 %v11901_v24  ;;  %v4410_v44 = vld [vmem:[%s15080_s3 + $0xd8] sm:$0xff]  ;;  %v4428_v24 = vld [vmem:[%s15080_s3 + $0x168] sm:$0xff] }
 0x205   : > { %v2839_v6 = vsel %vm1286_vm3, %v2836_v57, %v2838_v51  ;;  %v2847_v18 = vsel %vm1286_vm3, %v2844_v49, %v2846_v35  ;;  %4440 = vperm.xlu0 %11816, %v4383_v58   ;;  %v15403_v51 = vld [vmem:[#allocation43_spill] sm:$0xff] }
 0x206   : > { %v4433_v58 = vld [vmem:[%s15080_s3 + $0x190] sm:$0xff] }
 0x207   : > { %10260 = vmatmul.mubr.msk.bf16.gmra.mrb[64].mxu0 %vm595_vm2, %v2366_v28  ;;  %v2825_v28 = vsel %vm1286_vm3, %v2822_v12, %v2824_v19  ;;  %v4400_v12 = vld [vmem:[%s15080_s3 + $0x88] sm:$0xff] }
 0x208   : > { %10265 = vmatprep.mubr.msk.bf16.mxu0 %vm595_vm2, %v2797_v62  ;;  %v2827_v62 = vsel %vm1286_vm3, %v2824_v19, %v2826_v22  ;;  %v4402_v19 = vld [vmem:[%s15080_s3 + $0x98] sm:$0xff]  ;;  %v4408_v22 = vld [vmem:[%s15080_s3 + $0xc8] sm:$0xff] }
 0x20f   : > { %10266 = vmatmul.mubr.msk.bf16.vlgmr.msra.gmra.mrb[0].mxu0 %vm595_vm2, %v2799_v25  ;;  %v2833_v25 = vsel %vm1286_vm3, %v2830_v33, %v2832_v31  ;;  %v15400_v33 = vld [vmem:[#allocation25_spill] sm:$0xff] }
 0x210   : > { %10322 = vmatpush3.bf16.msra.mxu0 %v3265_v7  ;;  %10269 = vmatprep.mubr.msk.bf16.mxu0 %vm595_vm2, %v2801_v37  ;;  %v2835_v7 = vsel %vm1286_vm3, %v2832_v31, %v2834_v4  ;;  %v2837_v37 = vsel %vm1286_vm3, %v2834_v4, %v2836_v57  ;;  %v4416_v31 = vld [vmem:[%s15080_s3 + $0x108] sm:$0xff]  ;;  %v4419_v4 = vld [vmem:[%s15080_s3 + $0x120] sm:$0xff]  ;;  %v15402_v57 = vld [vmem:[#allocation35_spill] sm:$0xff] }
 0x211   : > { %11773 = vmatprep.subr.msk.bf16.mxu0 %vm680_vm0, %v13120_v34 }
 0x217   : > { %10270 = vmatmul.mubr.msk.bf16.gmra.mrb[4].mxu0 %vm595_vm2, %v2803_v46  ;;  %v2843_v46 = vsel %vm1286_vm3, %v2840_v48, %v2842_v10  ;;  %v4422_v48 = vld [vmem:[%s15080_s3 + $0x138] sm:$0xff] }
 0x218   : > { %10273 = vmatprep.mubr.msk.bf16.mxu0 %vm595_vm2, %v2805_v55  ;;  %v2845_v55 = vsel %vm1286_vm3, %v2842_v10, %v2844_v49  ;;  %v4424_v10 = vld [vmem:[%s15080_s3 + $0x148] sm:$0xff]  ;;  %v4425_v49 = vld [vmem:[%s15080_s3 + $0x150] sm:$0xff] }
 0x21f   : > { %10274 = vmatmul.mubr.msk.bf16.gmra.mrb[8].mxu0 %vm595_vm2, %v2807_v2 }
 0x220   : > { %10277 = vmatprep.mubr.msk.bf16.mxu0 %vm595_vm2, %v2809_v8 }
 0x227   : > { %10278 = vmatmul.mubr.msk.bf16.gmra.mrb[12].mxu0 %vm595_vm2, %v2811_v15  ;;  %v2849_v15 = vsel %vm1286_vm3, %v2846_v35, %v2848_v26  ;;  %v4427_v35 = vld [vmem:[%s15080_s3 + $0x160] sm:$0xff] }
 0x228   : > { %10281 = vmatprep.mubr.msk.bf16.mxu0 %vm595_vm2, %v2813_v11  ;;  %v4387_v11 = vld [vmem:[%s15080_s3 + $0x20] sm:$0xff] }
 0x22f   : > { %10282 = vmatmul.mubr.msk.bf16.gmra.mrb[16].mxu0 %vm595_vm2, %v2815_v59  ;;  %v3616_v59 = vsel %vm680_vm0, %v13120_v34, 0  ;;  %v4393_v34 = vld [vmem:[%s15080_s3 + $0x50] sm:$0xff] }
 0x230   : > { %10285 = vmatprep.mubr.msk.bf16.mxu0 %vm595_vm2, %v2817_v63  ;;  %v13236_v63 = vld [vmem:[%s15078_s1 + $0x20] sm:$0xf] }
 0x237   : > { %10286 = vmatmul.mubr.msk.bf16.gmra.mrb[20].mxu0 %vm595_vm2, %v2819_v1  ;;  %v4396_v1 = vld [vmem:[%s15080_s3 + $0x68] sm:$0xff] }
 0x238   : > { %10289 = vmatprep.mubr.msk.bf16.mxu0 %vm595_vm2, %v2821_v30  ;;  %v4398_v30 = vld [vmem:[%s15080_s3 + $0x78] sm:$0xff] }
 0x23f   : > { %10290 = vmatmul.mubr.msk.bf16.gmra.mrb[24].mxu0 %vm595_vm2, %v2823_v54  ;;  %v4404_v54 = vld [vmem:[%s15080_s3 + $0xa8] sm:$0xff] }
 0x240   : > { %10293 = vmatprep.mubr.msk.bf16.mxu0 %vm595_vm2, %v2825_v28  ;;  %v4406_v28 = vld [vmem:[%s15080_s3 + $0xb8] sm:$0xff] }
 0x247   : > { %10294 = vmatmul.mubr.msk.bf16.gmra.mrb[28].mxu0 %vm595_vm2, %v2827_v62  ;;  %v4412_v62 = vld [vmem:[%s15080_s3 + $0xe8] sm:$0xff] }
 0x248   : > { %10297 = vmatprep.mubr.msk.bf16.mxu0 %vm595_vm2, %v2829_v61  ;;  %v4414_v61 = vld [vmem:[%s15080_s3 + $0xf8] sm:$0xff] }
 0x24f   : > { %10298 = vmatmul.mubr.msk.bf16.gmra.mrb[32].mxu0 %vm595_vm2, %v2831_v42  ;;  %v15401_v42 = vld [vmem:[#allocation31_spill] sm:$0xff] }
 0x250   : > { %10301 = vmatprep.mubr.msk.bf16.mxu0 %vm595_vm2, %v2833_v25  ;;  %v4418_v25 = vld [vmem:[%s15080_s3 + $0x118] sm:$0xff] }
 0x257   : > { %10302 = vmatmul.mubr.msk.bf16.gmra.mrb[36].mxu0 %vm595_vm2, %v2835_v7  ;;  %v4420_v7 = vld [vmem:[%s15080_s3 + $0x128] sm:$0xff] }
 0x258   : > { %10305 = vmatprep.mubr.msk.bf16.mxu0 %vm595_vm2, %v2837_v37  ;;  %v4421_v37 = vld [vmem:[%s15080_s3 + $0x130] sm:$0xff] }
 0x25f   : > { %10306 = vmatmul.mubr.msk.bf16.gmra.mrb[40].mxu0 %vm595_vm2, %v2839_v6  ;;  %v4423_v6 = vld [vmem:[%s15080_s3 + $0x140] sm:$0xff] }
 0x260   : > { %10309 = vmatprep.mubr.msk.bf16.mxu0 %vm595_vm2, %v2841_v14  ;;  %v15404_v14 = vld [vmem:[#allocation44_spill] sm:$0xff] }
 0x267   : > { %10310 = vmatmul.mubr.msk.bf16.gmra.mrb[44].mxu0 %vm595_vm2, %v2843_v46  ;;  %v15405_v46 = vld [vmem:[#allocation51_spill] sm:$0xff] }
 0x268   : > { %10313 = vmatprep.mubr.msk.bf16.mxu0 %vm595_vm2, %v2845_v55  ;;  %v4426_v55 = vld [vmem:[%s15080_s3 + $0x158] sm:$0xff] }
 0x26a   : > { %v10203_v21 = vpop.f32.mrb[60].mxu0 }
 0x26b   : > { %v13195_v0 = vadd.f32 %v10203_v21, %v13093_v53  ;;  %v2099_v16 = vpop.f32.mrb[61].mxu0  ;;  %v4385_v53 = vld [vmem:[%s15080_s3 + $0x10] sm:$0xff] }
 0x26c   : > { %v13198_v2 = vadd.f32 %v2099_v16, %v13096_v9  ;;  %v10204_v8 = vpop.f32.mrb[62].mxu0  ;;  %4450 = vperm.xlu1 %11817, %v4385_v53   ;;  %v4384_v9 = vld [vmem:[%s15080_s3 + $0x8] sm:$0xff]  ;;  %v4429_v21 = vld [vmem:[%s15080_s3 + $0x170] sm:$0xff] }
 0x26d   : > { %v2102_v43 = vpop.f32.mrb[63].mxu0  ;;  %4445 = vperm.xlu0 %11816, %v4384_v9   ;;  %v15407_v16 = vld [vmem:[#allocation59_spill] sm:$0xff]  ;;  %v15409_v53 = vld [vmem:[#allocation65_spill] sm:$0xff] }
 0x26e   : > { %v13203_v50 = vadd.f32 %v2102_v43, %v13101_v23  ;;  %v4386_v23 = vld [vmem:[%s15080_s3 + $0x18] sm:$0xff] }
 0x26f   : > { %10314 = vmatmul.mubr.msk.bf16.gmra.mrb[48].mxu0 %vm595_vm2, %v2847_v18  ;;  %v4430_v8 = vld [vmem:[%s15080_s3 + $0x178] sm:$0xff]  ;;  %v4431_v18 = vld [vmem:[%s15080_s3 + $0x180] sm:$0xff] }
 0x270   : > { %10317 = vmatprep.mubr.msk.bf16.mxu0 %vm595_vm2, %v2849_v15  ;;  %4455 = vperm.xlu1 %11817, %v4386_v23   ;;  %v15408_v43 = vld [vmem:[#allocation60_spill] sm:$0xff]  ;;  %v4432_v15 = vld [vmem:[%s15080_s3 + $0x188] sm:$0xff] }
 0x271   : > { %4460 = vperm.xlu0 %11816, %v4387_v11   ;;  %v4434_v9 = vld [vmem:[%s15080_s3 + $0x198] sm:$0xff]  ;;  %v4435_v23 = vld [vmem:[%s15080_s3 + $0x1a0] sm:$0xff]  ;;  %v15410_v11 = vld [vmem:[#allocation66_spill] sm:$0xff] }
 0x274   : > { %4465 = vperm.xlu1 %11817, %v4388_v20   ;;  %v336_v20 = vld [vmem:[%s12006_s21 + $0x1d8] sm:$0xff] }
 0x275   : > { %4470 = vperm.xlu0 %11816, %v4389_v29  }
 0x277   : > { %10318 = vmatmul.mubr.msk.bf16.gmra.mrb[68].mxu0 %vm595_vm2, %v2848_v26  ;;  %v15406_v26 = vld [vmem:[#allocation52_spill] sm:$0xff] }
 0x278   : > { %10323 = vmatprep.mubr.msk.bf16.mxu0 %vm595_vm2, %v12042_v17  ;;  %v4390_v17 = vld [vmem:[%s15080_s3 + $0x38] sm:$0xff] }
 0x279   : > { %4475 = vperm.xlu1 %11817, %v4390_v17   ;;  %4480 = vperm.xlu0 %11816, %v4391_v13  }
 0x27d   : > { %4490 = vperm.xlu0 %11816, %v4393_v34   ;;  %v15412_v34 = vld [vmem:[#allocation6_spill] sm:$0xff] }
 0x27f   : > { %10324 = vmatmul.mubr.msk.bf16.vlgmr.msra.gmra.mrb[0].mxu0 %vm595_vm2, %v12060_v27  ;;  %v4392_v27 = vld [vmem:[%s15080_s3 + $0x48] sm:$0xff] }
 0x280   : > { %10380 = vmatpush3.bf16.msra.mxu0 %v3616_v59  ;;  %10327 = vmatprep.mubr.msk.bf16.mxu0 %vm595_vm2, %v12070_v32  ;;  %v4394_v32 = vld [vmem:[%s15080_s3 + $0x58] sm:$0xff]  ;;  %v4436_v59 = vld [vmem:[%s15080_s3 + $0x1a8] sm:$0xff] }
 0x281   : > { %11774 = vmatprep.subr.msk.bf16.mxu0 %vm680_vm0, %v13236_v63  ;;  %4485 = vperm.xlu1 %11817, %v4392_v27   ;;  %v15411_v27 = vld [vmem:[#allocation5_spill] sm:$0xff] }
 0x282   : > { %4500 = vperm.xlu0 %11816, %v4395_v45   ;;  %v4437_v45 = vld [vmem:[%s15080_s3 + $0x1b0] sm:$0xff] }
 0x285   : > { %4495 = vperm.xlu1 %11817, %v4394_v32   ;;  %v13435_v32 = vpack.c.bf16 %v15412_v34, %v15411_v27  ;;  %v8469_v27 = vld [vmem:[%s15083_s6 + $0x118] sm:$0xff] }
 0x286   : > { %v15429_v34 = vld [vmem:[#allocation48_spill] sm:$0xff] }
 0x287   : > { %10328 = vmatmul.mubr.msk.bf16.gmra.mrb[4].mxu0 %vm595_vm2, %v12077_v40  ;;  %v4397_v40 = vld [vmem:[%s15080_s3 + $0x70] sm:$0xff] }
 0x288   : > { %10331 = vmatprep.mubr.msk.bf16.mxu0 %vm595_vm2, %v12108_v56  ;;  %4510 = vperm.xlu0 %11816, %v4397_v40   ;;  %v4399_v56 = vld [vmem:[%s15080_s3 + $0x80] sm:$0xff] }
 0x289   : > { %4505 = vperm.xlu1 %11817, %v4396_v1  }
 0x28c   : > { %4520 = vperm.xlu0 %11816, %v4399_v56  }
 0x28d   : > { %4515 = vperm.xlu1 %11817, %v4398_v30   ;;  %v15413_v30 = vld [vmem:[#allocation8_spill] sm:$0xff] }
 0x28e   : > { %v13444_v56 = vpack.c.bf16 %v336_v20, %v15413_v30  ;;  %v8466_v20 = vld [vmem:[%s15083_s6 + $0x100] sm:$0xff] }
 0x28f   : > { %10332 = vmatmul.mubr.msk.bf16.gmra.mrb[8].mxu0 %vm595_vm2, %v12172_v36  ;;  %v4401_v36 = vld [vmem:[%s15080_s3 + $0x90] sm:$0xff]  ;;  %v15430_v30 = vld [vmem:[#allocation53_spill] sm:$0xff] }
 0x290   : > { %10335 = vmatprep.mubr.msk.bf16.mxu0 %vm595_vm2, %v12200_v52  ;;  %4530 = vperm.xlu0 %11816, %v4401_v36   ;;  %v4403_v52 = vld [vmem:[%s15080_s3 + $0xa0] sm:$0xff] }
 0x291   : > { %4525 = vperm.xlu1 %11817, %v4400_v12   ;;  %v8434_v36 = vld [vmem:[%s15083_s6] sm:$0xff] }
 0x294   : > { %4540 = vperm.xlu0 %11816, %v4403_v52  }
 0x295   : > { %4535 = vperm.xlu1 %11817, %v4402_v19   ;;  %v13460_v19 = vld [vmem:[%s12006_s21 + $0x1e0] sm:$0xff] }
 0x296   : > { %v3250_v52 = vpack.c.bf16 %v13460_v19, %v13460_v19 }
 0x297   : > { %10336 = vmatmul.mubr.msk.bf16.gmra.mrb[12].mxu0 %vm595_vm2, %v12118_v60  ;;  %v4405_v60 = vld [vmem:[%s15080_s3 + $0xb0] sm:$0xff] }
 0x298   : > { %10339 = vmatprep.mubr.msk.bf16.mxu0 %vm595_vm2, %v12138_v3  ;;  %4550 = vperm.xlu0 %11816, %v4405_v60   ;;  %v4407_v3 = vld [vmem:[%s15080_s3 + $0xc0] sm:$0xff] }
 0x299   : > { %4545 = vperm.xlu1 %11817, %v4404_v54   ;;  %v8437_v54 = vld [vmem:[%s15083_s6 + $0x18] sm:$0xff]  ;;  %v8438_v60 = vld [vmem:[%s15083_s6 + $0x20] sm:$0xff] }
 0x29c   : > { %4560 = vperm.xlu0 %11816, %v4407_v3   ;;  %v15414_v3 = vld [vmem:[#allocation7_spill] sm:$0xff] }
 0x29d   : > { %4555 = vperm.xlu1 %11817, %v4406_v28   ;;  %v8439_v28 = vld [vmem:[%s15083_s6 + $0x28] sm:$0xff] }
 0x29f   : > { %10340 = vmatmul.mubr.msk.bf16.gmra.mrb[16].mxu0 %vm595_vm2, %v12177_v38  ;;  %v4409_v38 = vld [vmem:[%s15080_s3 + $0xd0] sm:$0xff] }
 0x2a0   : > { %10343 = vmatprep.mubr.msk.bf16.mxu0 %vm595_vm2, %v12181_v39  ;;  %4570 = vperm.xlu0 %11816, %v4409_v38   ;;  %v4411_v39 = vld [vmem:[%s15080_s3 + $0xe0] sm:$0xff]  ;;  %v8441_v38 = vld [vmem:[%s15083_s6 + $0x38] sm:$0xff] }
 0x2a1   : > { %4565 = vperm.xlu1 %11817, %v4408_v22   ;;  %v8440_v22 = vld [vmem:[%s15083_s6 + $0x30] sm:$0xff] }
 0x2a4   : > { %4580 = vperm.xlu0 %11816, %v4411_v39   ;;  %v15415_v39 = vld [vmem:[#allocation13_spill] sm:$0xff] }
 0x2a5   : > { %4575 = vperm.xlu1 %11817, %v4410_v44   ;;  %v3953_v44 = vsel %vm680_vm0, %v13236_v63, 0  ;;  %v8444_v63 = vld [vmem:[%s15083_s6 + $0x50] sm:$0xff] }
 0x2a7   : > { %10344 = vmatmul.mubr.msk.bf16.gmra.mrb[20].mxu0 %vm595_vm2, %v12191_v47  ;;  %v4413_v47 = vld [vmem:[%s15080_s3 + $0xf0] sm:$0xff] }
 0x2a8   : > { %10347 = vmatprep.mubr.msk.bf16.mxu0 %vm595_vm2, %v12223_v5  ;;  %4590 = vperm.xlu0 %11816, %v4413_v47   ;;  %v4415_v5 = vld [vmem:[%s15080_s3 + $0x100] sm:$0xff]  ;;  %v8443_v47 = vld [vmem:[%s15083_s6 + $0x48] sm:$0xff] }
 0x2a9   : > { %4585 = vperm.xlu1 %11817, %v4412_v62   ;;  %v8442_v62 = vld [vmem:[%s15083_s6 + $0x40] sm:$0xff] }
 0x2ac   : > { %4600 = vperm.xlu0 %11816, %v4415_v5   ;;  %v8445_v5 = vld [vmem:[%s15083_s6 + $0x58] sm:$0xff] }
 0x2ad   : > { %4595 = vperm.xlu1 %11817, %v4414_v61   ;;  %v15416_v61 = vld [vmem:[#allocation21_spill] sm:$0xff] }
 0x2af   : > { %10348 = vmatmul.mubr.msk.bf16.gmra.mrb[24].mxu0 %vm595_vm2, %v12246_v41  ;;  %v4417_v41 = vld [vmem:[%s15080_s3 + $0x110] sm:$0xff] }
 0x2b0   : > { %10351 = vmatprep.mubr.msk.bf16.mxu0 %vm595_vm2, %v15400_v33  ;;  %4610 = vperm.xlu0 %11816, %v4417_v41   ;;  %v15417_v33 = vld [vmem:[#allocation23_spill] sm:$0xff]  ;;  %v8447_v41 = vld [vmem:[%s15083_s6 + $0x68] sm:$0xff] }
 0x2b1   : > { %4605 = vperm.xlu1 %11817, %v4416_v31   ;;  %v8446_v31 = vld [vmem:[%s15083_s6 + $0x60] sm:$0xff] }
 0x2b4   : > { %4620 = vperm.xlu0 %11816, %v4419_v4   ;;  %v8449_v4 = vld [vmem:[%s15083_s6 + $0x78] sm:$0xff] }
 0x2b5   : > { %4615 = vperm.xlu1 %11817, %v4418_v25   ;;  %v8448_v25 = vld [vmem:[%s15083_s6 + $0x70] sm:$0xff] }
 0x2b7   : > { %10352 = vmatmul.mubr.msk.bf16.gmra.mrb[28].mxu0 %vm595_vm2, %v15401_v42  ;;  %v15418_v42 = vld [vmem:[#allocation30_spill] sm:$0xff] }
 0x2b8   : > { %10355 = vmatprep.mubr.msk.bf16.mxu0 %vm595_vm2, %v15402_v57  ;;  %4630 = vperm.xlu0 %11816, %v4421_v37   ;;  %v15419_v57 = vld [vmem:[#allocation34_spill] sm:$0xff] }
 0x2b9   : > { %4625 = vperm.xlu1 %11817, %v4420_v7   ;;  %v8450_v7 = vld [vmem:[%s15083_s6 + $0x80] sm:$0xff]  ;;  %v8451_v37 = vld [vmem:[%s15083_s6 + $0x88] sm:$0xff] }
 0x2bc   : > { %4640 = vperm.xlu0 %11816, %v4423_v6   ;;  %v8453_v6 = vld [vmem:[%s15083_s6 + $0x98] sm:$0xff] }
 0x2bd   : > { %4635 = vperm.xlu1 %11817, %v4422_v48   ;;  %v8452_v48 = vld [vmem:[%s15083_s6 + $0x90] sm:$0xff] }
 0x2bf   : > { %10356 = vmatmul.mubr.msk.bf16.gmra.mrb[32].mxu0 %vm595_vm2, %v15403_v51  ;;  %v15420_v51 = vld [vmem:[#allocation42_spill] sm:$0xff] }
 0x2c0   : > { %10359 = vmatprep.mubr.msk.bf16.mxu0 %vm595_vm2, %v15404_v14  ;;  %4650 = vperm.xlu0 %11816, %v4425_v49   ;;  %v15421_v14 = vld [vmem:[#allocation18_spill] sm:$0xff] }
 0x2c1   : > { %4645 = vperm.xlu1 %11817, %v4424_v10   ;;  %v8454_v10 = vld [vmem:[%s15083_s6 + $0xa0] sm:$0xff]  ;;  %v8455_v49 = vld [vmem:[%s15083_s6 + $0xa8] sm:$0xff] }
 0x2c4   : > { %4660 = vperm.xlu0 %11816, %v4427_v35   ;;  %v8457_v35 = vld [vmem:[%s15083_s6 + $0xb8] sm:$0xff] }
 0x2c5   : > { %4655 = vperm.xlu1 %11817, %v4426_v55   ;;  %v8456_v55 = vld [vmem:[%s15083_s6 + $0xb0] sm:$0xff] }
 0x2c7   : > { %10360 = vmatmul.mubr.msk.bf16.gmra.mrb[36].mxu0 %vm595_vm2, %v15405_v46  ;;  %v15422_v46 = vld [vmem:[#allocation22_spill] sm:$0xff] }
 0x2c8   : > { %10363 = vmatprep.mubr.msk.bf16.mxu0 %vm595_vm2, %v15406_v26  ;;  %4670 = vperm.xlu0 %11816, %v4429_v21   ;;  %v15423_v26 = vld [vmem:[#allocation24_spill] sm:$0xff]  ;;  %v8459_v21 = vld [vmem:[%s15083_s6 + $0xc8] sm:$0xff] }
 0x2c9   : > { %4665 = vperm.xlu1 %11817, %v4428_v24   ;;  %v8458_v24 = vld [vmem:[%s15083_s6 + $0xc0] sm:$0xff] }
 0x2cc   : > { %4680 = vperm.xlu0 %11816, %v4431_v18   ;;  %v8461_v18 = vld [vmem:[%s15083_s6 + $0xd8] sm:$0xff] }
 0x2cd   : > { %4675 = vperm.xlu1 %11817, %v4430_v8   ;;  %v8460_v8 = vld [vmem:[%s15083_s6 + $0xd0] sm:$0xff] }
 0x2cf   : > { %10364 = vmatmul.mubr.msk.bf16.gmra.mrb[40].mxu0 %vm595_vm2, %v15407_v16  ;;  %v15424_v16 = vld [vmem:[#allocation28_spill] sm:$0xff] }
 0x2d0   : > { %10367 = vmatprep.mubr.msk.bf16.mxu0 %vm595_vm2, %v15408_v43  ;;  %4690 = vperm.xlu0 %11816, %v4433_v58   ;;  %v15425_v43 = vld [vmem:[#allocation29_spill] sm:$0xff] }
 0x2d1   : > { %4685 = vperm.xlu1 %11817, %v4432_v15   ;;  %v8462_v15 = vld [vmem:[%s15083_s6 + $0xe0] sm:$0xff]  ;;  %v8463_v58 = vld [vmem:[%s15083_s6 + $0xe8] sm:$0xff] }
 0x2d4   : > { %4700 = vperm.xlu0 %11816, %v4435_v23   ;;  %v8465_v23 = vld [vmem:[%s15083_s6 + $0xf8] sm:$0xff] }
 0x2d5   : > { %4695 = vperm.xlu1 %11817, %v4434_v9   ;;  %v8464_v9 = vld [vmem:[%s15083_s6 + $0xf0] sm:$0xff] }
 0x2d7   : > { %10368 = vmatmul.mubr.msk.bf16.gmra.mrb[44].mxu0 %vm595_vm2, %v15409_v53  ;;  %v15426_v53 = vld [vmem:[#allocation36_spill] sm:$0xff] }
 0x2d8   : > { %10371 = vmatprep.mubr.msk.bf16.mxu0 %vm595_vm2, %v15410_v11  ;;  %4710 = vperm.xlu0 %11816, %v4437_v45   ;;  %v15427_v11 = vld [vmem:[#allocation39_spill] sm:$0xff]  ;;  %v8470_v45 = vld [vmem:[%s15083_s6 + $0x120] sm:$0xff] }
 0x2d9   : > { %4705 = vperm.xlu1 %11817, %v4436_v59   ;;  %v15428_v59 = vld [vmem:[#allocation45_spill] sm:$0xff] }
 0x2da   : > { %v10261_v29 = vpop.f32.mrb[64].mxu0 }
 0x2db   : > { %v13431_v17 = vadd.f32 %v10261_v29, %v13195_v0  ;;  %v2696_v13 = vpop.f32.mrb[65].mxu0  ;;  %v8467_v29 = vld [vmem:[%s15083_s6 + $0x108] sm:$0xff] }
 0x2dc   : > { %v13441_v1 = vadd.f32 %v2696_v13, %v13198_v2  ;;  %v10262_v40 = vpop.f32.mrb[66].mxu0  ;;  %v8435_v2 = vld [vmem:[%s15083_s6 + $0x8] sm:$0xff]  ;;  %v8468_v13 = vld [vmem:[%s15083_s6 + $0x110] sm:$0xff] }
 0x2dd   : > { %v2699_v12 = vpop.f32.mrb[67].mxu0  ;;  %8484 = vperm.xlu1 %11817, %v8434_v36   ;;  %8489 = vperm.xlu0 %11816, %v8435_v2   ;;  %v8471_v40 = vld [vmem:[%s15083_s6 + $0x128] sm:$0xff]  ;;  %v8473_v36 = vld [vmem:[%s15083_s6 + $0x138] sm:$0xff] }
 0x2de   : > { %v13447_v0 = vadd.f32 %v2699_v12, %v13203_v50  ;;  %v8436_v50 = vld [vmem:[%s15083_s6 + $0x10] sm:$0xff]  ;;  %v15431_v2 = vld [vmem:[#allocation56_spill] sm:$0xff] }
 0x2df   : > { %10372 = vmatmul.mubr.msk.bf16.gmra.mrb[48].mxu0 %vm595_vm2, %v13435_v32  ;;  %v8472_v12 = vld [vmem:[%s15083_s6 + $0x130] sm:$0xff] }
 0x2e0   : > { %10375 = vmatprep.mubr.msk.bf16.mxu0 %vm595_vm2, %v13444_v56 }
 0x2e1   : > { %8494 = vperm.xlu1 %11817, %v8436_v50   ;;  %8499 = vperm.xlu0 %11816, %v8437_v54   ;;  %v8474_v50 = vld [vmem:[%s15083_s6 + $0x140] sm:$0xff] }
 0x2e2   : > { %v15432_v54 = vld [vmem:[#allocation61_spill] sm:$0xff] }
 0x2e5   : > { %8504 = vperm.xlu1 %11817, %v8438_v60   ;;  %8509 = vperm.xlu0 %11816, %v8439_v28   ;;  %v13625_v60 = vpop.permute.xlu0 %4440  ;;  %v8476_v28 = vld [vmem:[%s15083_s6 + $0x150] sm:$0xff] }
 0x2e7   : > { %10376 = vmatmul.mubr.msk.bf16.gmra.mrb[72].mxu0 %vm595_vm2, %v3250_v52  ;;  %v8475_v52 = vld [vmem:[%s15083_s6 + $0x148] sm:$0xff] }
 0x2e8   : > { %10381 = vmatprep.mubr.msk.bf16.mxu0 %vm595_vm2, %v15414_v3  ;;  %v8477_v3 = vld [vmem:[%s15083_s6 + $0x158] sm:$0xff] }
 0x2e9   : > { %8514 = vperm.xlu1 %11817, %v8440_v22   ;;  %8519 = vperm.xlu0 %11816, %v8441_v38   ;;  %v15433_v22 = vld [vmem:[#allocation63_spill] sm:$0xff] }
 0x2eb   : > { %v13635_v38 = vpop.permute.xlu1 %4450 }
 0x2ed   : > { %8524 = vperm.xlu1 %11817, %v8442_v62   ;;  %8529 = vperm.xlu0 %11816, %v8443_v47   ;;  %v15434_v62 = vld [vmem:[#allocation67_spill] sm:$0xff]  ;;  %v13645_v47 = vpop.permute.xlu0 %4445 }
 0x2ef   : > { %10382 = vmatmul.mubr.msk.bf16.vlgmr.msra.gmra.mrb[0].mxu0 %vm595_vm2, %v15415_v39  ;;  %v8479_v39 = vld [vmem:[%s15083_s6 + $0x168] sm:$0xff] }
 0x2f0   : > { %10438 = vmatpush3.bf16.msra.mxu0 %v3953_v44  ;;  %10385 = vmatprep.mubr.msk.bf16.mxu0 %vm595_vm2, %v15416_v61  ;;  %v8478_v44 = vld [vmem:[%s15083_s6 + $0x160] sm:$0xff]  ;;  %v8480_v61 = vld [vmem:[%s15083_s6 + $0x170] sm:$0xff] }
 0x2f1   : > { %8534 = vperm.xlu1 %11817, %v8444_v63   ;;  %8539 = vperm.xlu0 %11816, %v8445_v5   ;;  %v8481_v63 = vld [vmem:[%s15083_s6 + $0x178] sm:$0xff]  ;;  %v3581_v5 = vshll.u32 %v13435_v32, 16 }
 0x2f5   : > { %8544 = vperm.xlu1 %11817, %v8446_v31   ;;  %8549 = vperm.xlu0 %11816, %v8447_v41   ;;  %v338_v31 = vld [vmem:[%s12006_s21 + $0x1e8] sm:$0xff]  ;;  %v13657_v41 = vpop.permute.xlu0 %4460  ;;  %s269_s21 = sand.u32 1, %s11891_s25  }
 0x2f6   : > { %s270_s22 = scalar_lea.vmem [#allocation2], %s269_s21  ;;  %s8875_s13 = scalar_lea.sflag [#allocation3], %s269_s21 }
 0x2f7   : > { %10386 = vmatmul.mubr.msk.bf16.gmra.mrb[4].mxu0 %vm595_vm2, %v15417_v33  ;;  %v13654_v33 = vpop.permute.xlu1 %4455  ;;  %s8887_s23 = sshll.u32 %s270_s22, 4  ;;  %s15037_s23 = int_to_ptr.vmem [resolvable:$true] %s8887_s23 }
 0x2f8   : > { %10389 = vmatprep.mubr.msk.bf16.mxu0 %vm595_vm2, %v15418_v42  ;;  %v15435_v42 = vld [vmem:[#allocation68_spill] sm:$0xff]  ;;  %s11837_s14 = scalar_lea.vmem %s15037_s23, 16  ;;  %p11844_p0 = scmp.lt.s32.totalorder %s15037_s23, %s11842_s15 }
 0x2f9   : > { %8554 = vperm.xlu1 %11817, %v8448_v25   ;;  %8559 = vperm.xlu0 %11816, %v8449_v4   ;;  %v15436_v25 = vld [vmem:[#allocation69_spill] sm:$0xff]  ;;  %v13664_v4 = vpack.c.bf16 %v338_v31, %v13460_v19  ;;  %v11818_v19 = vld [vmem:[%s15081_s4 + $0x10] sm:$0xff]   ;;  %p11838_p11 = scmp.ne.s32.totalorder %s15037_s23, %s11837_s14  ;;  %p11845_p1 = scmp.lt.s32.totalorder %s11843_s16, %s11837_s14 }
 0x2fa   : > { %10495 = vmatprep.subr.bf16.mxu1 %v11818_v19 }
 0x2fb   : > { %10496 = vmatpush3.bf16.msra.mxu1 %v11818_v19  ;;  %v3938_v31 = vrot.slane %v13664_v4, 1  ;;  %p11839_p12 = pnand %p11838_p11, %p11981_p5  ;;  %p11846_p2 = por %p11845_p1, %p11844_p0 }
 0x2fd   : > { %8564 = vperm.xlu1 %11817, %v8450_v7   ;;  %8569 = vperm.xlu0 %11816, %v8451_v37   ;;  %v3588_v7 = vshll.u32 %v13444_v56, 16  ;;  %v3585_v37 = vshrl.u32 %v13435_v32, 16  ;;  %p11840_p13 = pneg %p11839_p12 }
 0x2ff   : > { %10390 = vmatmul.mubr.msk.bf16.gmra.mrb[8].mxu0 %vm595_vm2, %v15419_v57  ;;  %v3583_v57 = vrot.slane %v3581_v5, 1  ;;  %v3936_v5 = vrot.slane %v13444_v56, 1  ;;  %p11847_p3 = pnand %p11846_p2, %p11840_p13 }
 0x300   : > { %10393 = vmatprep.mubr.msk.bf16.mxu0 %vm595_vm2, %v15420_v51  ;;  %v15437_v51 = vld [vmem:[#allocation71_spill] sm:$0xff] }
 0x301   : > { %8574 = vperm.xlu1 %11817, %v8452_v48   ;;  %8579 = vperm.xlu0 %11816, %v8453_v6   ;;  %v3584_v48 = vsel %vm371_vm1, %v15437_v51, %v3583_v57  ;;  %v3592_v6 = vshrl.u32 %v13444_v56, 16  ;;  %v13752_v56 = vld [vmem:[%s15081_s4] sm:$0xff]  }
 0x305   : > { %8584 = vperm.xlu1 %11817, %v8454_v10   ;;  %8589 = vperm.xlu0 %11816, %v8455_v49   ;;  %v15438_v10 = vld [vmem:[#allocation70_spill] sm:$0xff]  ;;  %v3590_v49 = vrot.slane %v3588_v7, 1 }
 0x307   : > { %10394 = vmatmul.mubr.msk.bf16.gmra.mrb[12].mxu0 %vm595_vm2, %v15421_v14  ;;  %v3596_v14 = vshll.u32 %v13664_v4, 16 }
 0x308   : > { %10397 = vmatprep.mubr.msk.bf16.mxu0 %vm595_vm2, %v15422_v46  ;;  %v11819_v46 = vld [vmem:[%s15081_s4 + $0x18] sm:$0xff]  }
 0x309   : > { %8594 = vperm.xlu1 %11817, %v8456_v55   ;;  %8599 = vperm.xlu0 %11816, %v8457_v35   ;;  %v3587_v55 = vor.u32 %v3585_v37, %v3583_v57  ;;  %v3594_v35 = vor.u32 %v3592_v6, %v3590_v49 }
 0x30a   : > { %10497 = vmatprep.subr.bf16.mxu1 %v11819_v46 }
 0x30b   : > { %10498 = vmatpush3.bf16.msra.mxu1 %v11819_v46 }
 0x30c   : > { %10547 = vmatprep.subr.bf16.mxu1 %v13752_v56 }
 0x30d   : > { %8604 = vperm.xlu1 %11817, %v8458_v24   ;;  %8609 = vperm.xlu0 %11816, %v8459_v21  }
 0x30f   : > { %10398 = vmatmul.mubr.msk.bf16.gmra.mrb[16].mxu0 %vm595_vm2, %v15423_v26  ;;  %v3598_v26 = vrot.slane %v3596_v14, 1  ;;  %v4471_v14 = vpop.permute.xlu0 %4470 }
 0x310   : > { %10401 = vmatprep.mubr.msk.bf16.mxu0 %vm595_vm2, %v15424_v16 }
 0x311   : > { %8614 = vperm.xlu1 %11817, %v8460_v8   ;;  %8619 = vperm.xlu0 %11816, %v8461_v18  }
 0x315   : > { %8624 = vperm.xlu1 %11817, %v8462_v15   ;;  %8629 = vperm.xlu0 %11816, %v8463_v58   ;;  %v3599_v58 = vsel %vm371_vm1, %v3594_v35, %v3598_v26 }
 0x317   : > { %10402 = vmatmul.mubr.msk.bf16.gmra.mrb[20].mxu0 %vm595_vm2, %v15425_v43  ;;  %v3591_v43 = vsel %vm371_vm1, %v3587_v55, %v3590_v49  ;;  %v13757_v49 = vpop.permute.xlu0 %4480 }
 0x318   : > { %10405 = vmatprep.mubr.msk.bf16.mxu0 %vm595_vm2, %v15426_v53 }
 0x319   : > { %8634 = vperm.xlu1 %11817, %v8464_v9   ;;  %8639 = vperm.xlu0 %11816, %v8465_v23   ;;  %v3600_v9 = vshrl.u32 %v13664_v4, 16  ;;  %v15439_v23 = vld [vmem:[#allocation72_spill] sm:$0xff]  ;;  %v13755_v4 = vpop.permute.xlu1 %4465 }
 0x31b   : > { %v13761_v46 = vpop.permute.xlu0 %4490 }
 0x31d   : > { %8644 = vperm.xlu1 %11817, %v8466_v20   ;;  %8649 = vperm.xlu0 %11816, %v8467_v29   ;;  %v15443_v20 = vld [vmem:[#allocation76_spill] sm:$0xff]  ;;  %v15444_v29 = vld [vmem:[#allocation77_spill] sm:$0xff] }
 0x31f   : > { %10406 = vmatmul.mubr.msk.bf16.gmra.mrb[24].mxu0 %vm595_vm2, %v15427_v11  ;;  %v15441_v11 = vld [vmem:[#allocation74_spill] sm:$0xff]  ;;  %v13765_v35 = vpop.permute.xlu0 %4500 }
 0x320   : > { %10409 = vmatprep.mubr.msk.bf16.mxu0 %vm595_vm2, %v15428_v59  ;;  %v15445_v59 = vld [vmem:[#allocation78_spill] sm:$0xff] }
 0x321   : > { %8654 = vperm.xlu1 %11817, %v8468_v13   ;;  %8659 = vperm.xlu0 %11816, %v8469_v27   ;;  %v15446_v13 = vld [vmem:[#allocation79_spill] sm:$0xff]  ;;  %v15447_v27 = vld [vmem:[#allocation80_spill] sm:$0xff] }
 0x325   : > { %8664 = vperm.xlu1 %11817, %v8470_v45   ;;  %8669 = vperm.xlu0 %11816, %v8471_v40   ;;  %v15449_v45 = vld [vmem:[#allocation82_spill] sm:$0xff]  ;;  %v15450_v40 = vld [vmem:[#allocation83_spill] sm:$0xff] }
 0x327   : > { %10410 = vmatmul.mubr.msk.bf16.gmra.mrb[28].mxu0 %vm595_vm2, %v15429_v34  ;;  %v15448_v34 = vld [vmem:[#allocation81_spill] sm:$0xff] }
 0x328   : > { %10413 = vmatprep.mubr.msk.bf16.mxu0 %vm595_vm2, %v15430_v30  ;;  %v15451_v30 = vld [vmem:[#allocation84_spill] sm:$0xff] }
 0x329   : > { %8674 = vperm.xlu1 %11817, %v8472_v12   ;;  %8679 = vperm.xlu0 %11816, %v8473_v36   ;;  %v15452_v12 = vld [vmem:[#allocation85_spill] sm:$0xff]  ;;  %v15453_v36 = vld [vmem:[#allocation86_spill] sm:$0xff] }
 0x32d   : > { %8684 = vperm.xlu1 %11817, %v8474_v50   ;;  %8689 = vperm.xlu0 %11816, %v8475_v52   ;;  %v15455_v50 = vld [vmem:[#allocation88_spill] sm:$0xff]  ;;  %v15456_v52 = vld [vmem:[#allocation89_spill] sm:$0xff] }
 0x32f   : > { %10414 = vmatmul.mubr.msk.bf16.gmra.mrb[32].mxu0 %vm595_vm2, %v15431_v2  ;;  %v15454_v2 = vld [vmem:[#allocation87_spill] sm:$0xff] }
 0x330   : > { %10417 = vmatprep.mubr.msk.bf16.mxu0 %vm595_vm2, %v15432_v54  ;;  %v15457_v54 = vld [vmem:[#allocation94_spill] sm:$0xff] }
 0x331   : > { %8694 = vperm.xlu1 %11817, %v8476_v28   ;;  %8699 = vperm.xlu0 %11816, %v8477_v3   ;;  %v15458_v28 = vld [vmem:[#allocation95_spill] sm:$0xff]  ;;  %v15459_v3 = vld [vmem:[#allocation100_spill] sm:$0xff] }
 0x335   : > { %8704 = vperm.xlu1 %11817, %v8478_v44   ;;  %8709 = vperm.xlu0 %11816, %v8479_v39   ;;  %v15461_v44 = vld [vmem:[#allocation107_spill] sm:$0xff]  ;;  %v3934_v39 = vrot.slane %v13435_v32, 1 }
 0x337   : > { %10418 = vmatmul.mubr.msk.bf16.gmra.mrb[36].mxu0 %vm595_vm2, %v15433_v22  ;;  %v15460_v22 = vld [vmem:[#allocation101_spill] sm:$0xff]  ;;  %v3937_v51 = vsel %vm1286_vm3, %v3934_v39, %v3936_v5 }
 0x338   : > { %10421 = vmatprep.mubr.msk.bf16.mxu0 %vm595_vm2, %v15434_v62  ;;  %v15462_v62 = vld [vmem:[#allocation103_spill] sm:$0xff] }
 0x339   : > { %8714 = vperm.xlu1 %11817, %v8480_v61   ;;  %8719 = vperm.xlu0 %11816, %v8481_v63   ;;  %v3935_v61 = vsel %vm1286_vm3, %v15462_v62, %v3934_v39  ;;  %v15463_v63 = vld [vmem:[#allocation108_spill] sm:$0xff] }
 0x33f   : > { %10422 = vmatmul.mubr.msk.bf16.gmra.mrb[40].mxu0 %vm595_vm2, %v15435_v42 }
 0x340   : > { %10425 = vmatprep.mubr.msk.bf16.mxu0 %vm595_vm2, %v15436_v25 }
 0x347   : > { %10426 = vmatmul.mubr.msk.bf16.gmra.mrb[44].mxu0 %vm595_vm2, %v15438_v10  ;;  %v4476_v10 = vpop.permute.xlu1 %4475 }
 0x348   : > { %10429 = vmatprep.mubr.msk.bf16.mxu0 %vm595_vm2, %v3584_v48  ;;  %v3939_v48 = vsel %vm1286_vm3, %v3936_v5, %v3938_v31 }
 0x34a   : > { %v10319_v24 = vpop.f32.mrb[68].mxu0 }
 0x34b   : > { %v3247_v21 = vadd.f32 %v10319_v24, %v13431_v17  ;;  %v3179_v16 = vpop.f32.mrb[69].mxu0  ;;  %v3602_v17 = vor.u32 %v3600_v9, %v3598_v26  ;;  %v13759_v19 = vpop.permute.xlu1 %4485  ;;  %v13782_v9 = vld [vmem:[%s15079_s2] ss:$0 sm:$0xff] }
 0x34c   : > { %v3245_v8 = vadd.f32 %v3179_v16, %v13441_v1  ;;  %v10320_v18 = vpop.f32.mrb[70].mxu0  ;;  %v15440_v1 = vld [vmem:[#allocation73_spill] sm:$0xff] }
 0x34d   : > { %v3182_v15 = vpop.f32.mrb[71].mxu0 }
 0x34e   : > { %v3246_v53 = vadd.f32 %v3182_v15, %v13447_v0  ;;  %v15442_v0 = vld [vmem:[#allocation75_spill] sm:$0xff] }
 0x34f   : > { %10430 = vmatmul.mubr.msk.bf16.gmra.mrb[48].mxu0 %vm595_vm2, %v3591_v43  ;;  %v13763_v55 = vpop.permute.xlu1 %4495  ;;  %v13773_v43 = vpop.permute.xlu0 %4510 }
 0x350   : > { %10433 = vmatprep.mubr.msk.bf16.mxu0 %vm595_vm2, %v3599_v58 }
 0x353   : > { %v13767_v26 = vpop.permute.xlu1 %4505 }
 0x357   : > { %10434 = vmatmul.mubr.msk.bf16.gmra.mrb[76].mxu0 %vm595_vm2, %v3602_v17  ;;  %v13775_v58 = vpop.permute.xlu1 %4515 }
 0x358   : > { %10439 = vmatprep.mubr.msk.bf16.mxu0 %vm595_vm2, %v15439_v23  ;;  %v13784_v23 = vpop.permute.xlu0 %4520 }
 0x35f   : > { %10440 = vmatmul.mubr.msk.bf16.vlgmr.msra.gmra.mrb[0].mxu0 %vm595_vm2, %v15440_v1 }
 0x360   : > { %10443 = vmatprep.mubr.msk.bf16.mxu0 %vm595_vm2, %v15441_v11 }
 0x367   : > { %10444 = vmatmul.mubr.msk.bf16.gmra.mrb[4].mxu0 %vm595_vm2, %v15442_v0  ;;  %v13787_v0 = vpop.permute.xlu1 %4525 }
 0x368   : > { %10447 = vmatprep.mubr.msk.bf16.mxu0 %vm595_vm2, %v15443_v20 }
 0x36f   : > { %10448 = vmatmul.mubr.msk.bf16.gmra.mrb[8].mxu0 %vm595_vm2, %v15444_v29 }
 0x370   : > { %10451 = vmatprep.mubr.msk.bf16.mxu0 %vm595_vm2, %v15445_v59 }
 0x377   : > { %10452 = vmatmul.mubr.msk.bf16.gmra.mrb[12].mxu0 %vm595_vm2, %v15446_v13 }
 0x378   : > { %10455 = vmatprep.mubr.msk.bf16.mxu0 %vm595_vm2, %v15447_v27 }
 0x37f   : > { %10456 = vmatmul.mubr.msk.bf16.gmra.mrb[16].mxu0 %vm595_vm2, %v15448_v34 }
 0x380   : > { %10459 = vmatprep.mubr.msk.bf16.mxu0 %vm595_vm2, %v15449_v45 }
 0x387   : > { %10460 = vmatmul.mubr.msk.bf16.gmra.mrb[20].mxu0 %vm595_vm2, %v15450_v40 }
 0x388   : > { %10463 = vmatprep.mubr.msk.bf16.mxu0 %vm595_vm2, %v15451_v30 }
 0x38f   : > { %10464 = vmatmul.mubr.msk.bf16.gmra.mrb[24].mxu0 %vm595_vm2, %v15452_v12  ;;  %v13792_v12 = vpop.permute.xlu0 %4530 }
 0x390   : > { %10467 = vmatprep.mubr.msk.bf16.mxu0 %vm595_vm2, %v15453_v36 }
 0x397   : > { %10468 = vmatmul.mubr.msk.bf16.gmra.mrb[28].mxu0 %vm595_vm2, %v15454_v2 }
 0x398   : > { %10471 = vmatprep.mubr.msk.bf16.mxu0 %vm595_vm2, %v15455_v50  ;;  %v13796_v50 = vpop.permute.xlu1 %4535 }
 0x39f   : > { %10472 = vmatmul.mubr.msk.bf16.gmra.mrb[32].mxu0 %vm595_vm2, %v15456_v52 }
 0x3a0   : > { %10475 = vmatprep.mubr.msk.bf16.mxu0 %vm595_vm2, %v15457_v54 }
 0x3a7   : > { %10476 = vmatmul.mubr.msk.bf16.gmra.mrb[36].mxu0 %vm595_vm2, %v15458_v28 }
 0x3a8   : > { %10479 = vmatprep.mubr.msk.bf16.mxu0 %vm595_vm2, %v15459_v3 }
 0x3af   : > { %10480 = vmatmul.mubr.msk.bf16.gmra.mrb[40].mxu0 %vm595_vm2, %v15460_v22 }
 0x3b0   : > { %10483 = vmatprep.mubr.msk.bf16.mxu0 %vm595_vm2, %v15461_v44 }
 0x3b7   : > { %10484 = vmatmul.mubr.msk.bf16.gmra.mrb[44].mxu0 %vm595_vm2, %v15463_v63 }
 0x3b8   : > { %10487 = vmatprep.mubr.msk.bf16.mxu0 %vm595_vm2, %v3935_v61 }
 0x3ba   : > { %v10377_v42 = vpop.f32.mrb[72].mxu0 }
 0x3bb   : > { %v3577_v25 = vadd.f32 %v10377_v42, %v3247_v21  ;;  %v3509_v57 = vpop.f32.mrb[73].mxu0  ;;  %v13810_v42 = vpop.permute.xlu0 %4540 }
 0x3bc   : > { %v3575_v7 = vadd.f32 %v3509_v57, %v3245_v8  ;;  %v10378_v37 = vpop.f32.mrb[74].mxu0  ;;  %v13812_v57 = vpop.permute.xlu1 %4545 }
 0x3bd   : > { %v3512_v32 = vpop.f32.mrb[75].mxu0 }
 0x3be   : > { %v3576_v6 = vadd.f32 %v3512_v32, %v3246_v53 }
 0x3bf   : > { %10488 = vmatmul.mubr.msk.bf16.gmra.mrb[48].mxu0 %vm595_vm2, %v3937_v51 }
 0x3c0   : > { %10491 = vmatprep.mubr.msk.bf16.mxu0 %vm595_vm2, %v3939_v48 }
 0x3c7   : > { %10492 = vmatmul.mubr.msk.bf16.gmra.mrb[80].mxu0 %vm595_vm2, %v3938_v31 }
 0x42a   : > { %v10435_v24 = vpop.f32.mrb[76].mxu0 }
 0x42b   : > { %v13769_v21 = vadd.f32 %v10435_v24, %v3577_v25  ;;  %v3860_v16 = vpop.f32.mrb[77].mxu0 }
 0x42c   : > { %v13771_v8 = vadd.f32 %v3860_v16, %v3575_v7  ;;  %v10436_v18 = vpop.f32.mrb[78].mxu0 }
 0x42d   : > { %v3863_v15 = vpop.f32.mrb[79].mxu0 }
 0x42e   : > { %v13777_v53 = vadd.f32 %v3863_v15, %v3576_v6 }
 0x432   : > { %v10441_v17 = vpop.f32.mrb[0].mxu0 }
 0x433   : > { %v4275_v1 = vadd.f32 %v10441_v17, %v13782_v9  ;;  %v3989_v11 = vpop.f32.mrb[1].mxu0 }
 0x434   : > { %v4273_v20 = vadd.f32 %v13782_v9, %v3989_v11  ;;  %v10442_v29 = vpop.f32.mrb[2].mxu0 }
 0x435   : > { %v4330_v59 = vmax.f32 %v4275_v1, 0.0  ;;  %v4276_v13 = vadd.f32 %v10442_v29, %v13782_v9  ;;  %v3992_v27 = vpop.f32.mrb[3].mxu0 }
 0x436   : > { %v4328_v34 = vmax.f32 %v4273_v20, 0.0  ;;  %v4274_v45 = vadd.f32 %v13782_v9, %v3992_v27 }
 0x437   : > { %v4331_v40 = vmax.f32 %v4276_v13, 0.0  ;;  %v4715_v36 = vmul.f32 %v13635_v38, %v4330_v59  ;;  %v13828_v13 = vpop.permute.xlu0 %4550 }
 0x438   : > { %v4329_v30 = vmax.f32 %v4274_v45, 0.0  ;;  %v4713_v52 = vmul.f32 %v13625_v60, %v4328_v34 }
 0x439   : > { %v4716_v2 = vmul.f32 %v13654_v33, %v4331_v40  ;;  %v13833_v40 = vpop.permute.xlu1 %4555 }
 0x43a   : > { %v4714_v54 = vmul.f32 %v13645_v47, %v4329_v30  ;;  %v10445_v28 = vpop.f32.mrb[4].mxu0 }
 0x43b   : > { %v13800_v3 = vpack.c.bf16 %v4716_v2, %v4715_v36  ;;  %v4279_v22 = vadd.f32 %v10445_v28, %v13782_v9  ;;  %v4005_v44 = vpop.f32.mrb[5].mxu0 }
 0x43c   : > { %v13803_v39 = vpack.c.bf16 %v4714_v54, %v4713_v52  ;;  %v4277_v62 = vadd.f32 %v13782_v9, %v4005_v44  ;;  %v10446_v61 = vpop.f32.mrb[6].mxu0 }
 0x43d   : > { %v4334_v38 = vmax.f32 %v4279_v22, 0.0  ;;  %v4280_v33 = vadd.f32 %v10446_v61, %v13782_v9  ;;  %v4008_v63 = vpop.f32.mrb[7].mxu0  ;;  %v4810_v31 = vshll.u32 %v13800_v3, 16  ;;  %v4814_v45 = vshrl.u32 %v13800_v3, 16 }
 0x43e   : > { %v4332_v5 = vmax.f32 %v4277_v62, 0.0  ;;  %v4278_v60 = vadd.f32 %v13782_v9, %v4008_v63  ;;  %v4805_v47 = vshll.u32 %v13803_v39, 16  ;;  %v4803_v51 = vshrl.u32 %v13803_v39, 16  ;;  %v11821_v63 = vld [vmem:[%s15081_s4 + $0x8] sm:$0xff]  }
 0x43f   : > { %v4335_v25 = vmax.f32 %v4280_v33, 0.0  ;;  %v4719_v48 = vmul.f32 %v4471_v14, %v4334_v38  ;;  %v4812_v17 = vrot.slane %v4810_v31, 1 }
 0x440   : > { %v4717_v7 = vmul.f32 %v13657_v41, %v4332_v5  ;;  %v4333_v37 = vmax.f32 %v4278_v60, 0.0  ;;  %v4807_v32 = vrot.slane %v4805_v47, 1 }
 0x441   : > { %v4720_v6 = vmul.f32 %v4476_v10, %v4335_v25  ;;  %v4816_v54 = vor.u32 %v4814_v45, %v4812_v17  ;;  %v13849_v25 = vpop.permute.xlu0 %4560 }
 0x442   : > { %v13816_v24 = vpack.c.bf16 %v4717_v7, %v4716_v2  ;;  %v4718_v16 = vmul.f32 %v13755_v4, %v4333_v37  ;;  %v10449_v18 = vpop.f32.mrb[8].mxu0  ;;  %v4808_v15 = vor.u32 %v4807_v32, %v4803_v51  ;;  %v13855_v51 = vpop.permute.xlu1 %4565 }
 0x443   : > { %v13819_v1 = vpack.c.bf16 %v4720_v6, %v4719_v48  ;;  %v4283_v11 = vadd.f32 %v10449_v18, %v13782_v9  ;;  %v4021_v20 = vpop.f32.mrb[9].mxu0 }
 0x444   : > { %v13822_v41 = vpack.c.bf16 %v4718_v16, %v4717_v7  ;;  %v13824_v29 = vpack.c.bf16 %v4719_v48, %v4718_v16  ;;  %v4281_v14 = vadd.f32 %v13782_v9, %v4021_v20  ;;  %v10450_v10 = vpop.f32.mrb[10].mxu0  ;;  %v4813_v59 = vsel %vm371_vm1, %v4808_v15, %v4812_v17 }
 0x445   : > { %v4338_v4 = vmax.f32 %v4283_v11, 0.0  ;;  %v4284_v27 = vadd.f32 %v10450_v10, %v13782_v9  ;;  %v4024_v34 = vpop.f32.mrb[11].mxu0  ;;  %10499 = vmatprep.mubr.msk.bf16.mxu1 %vm5010_vm4, %v4813_v59  ;;  %v4826_v28 = vshll.u32 %v13819_v1, 16  ;;  %v4830_v16 = vshrl.u32 %v13819_v1, 16 }
 0x446   : > { %v4818_v30 = vshll.u32 %v13822_v41, 16  ;;  %v4336_v36 = vmax.f32 %v4281_v14, 0.0  ;;  %v4282_v2 = vadd.f32 %v13782_v9, %v4024_v34  ;;  %v4822_v61 = vshrl.u32 %v13822_v41, 16  ;;  %v13870_v14 = vld [vmem:[%s15081_s4 + $0x20] sm:$0xff]  }
 0x447   : > { %v4339_v52 = vmax.f32 %v4284_v27, 0.0  ;;  %v4723_v38 = vmul.f32 %v13761_v46, %v4338_v4 }
 0x448   : > { %v4721_v22 = vmul.f32 %v13757_v49, %v4336_v36  ;;  %v4337_v44 = vmax.f32 %v4282_v2, 0.0  ;;  %v4820_v62 = vrot.slane %v4818_v30, 1  ;;  %v13877_v2 = vpop.permute.xlu0 %4570 }
 0x449   : > { %v4724_v33 = vmul.f32 %v13763_v55, %v4339_v52  ;;  %v4828_v55 = vrot.slane %v4826_v28, 1 }
 0x44a   : > { %v13845_v5 = vpack.c.bf16 %v4721_v22, %v4720_v6  ;;  %v4722_v60 = vmul.f32 %v13759_v19, %v4337_v44  ;;  %v10453_v47 = vpop.f32.mrb[12].mxu0  ;;  %v4821_v31 = vsel %vm371_vm1, %v4816_v54, %v4820_v62  ;;  %v4824_v49 = vor.u32 %v4822_v61, %v4820_v62 }
 0x44b   : > { %v13851_v7 = vpack.c.bf16 %v4724_v33, %v4723_v38  ;;  %v4287_v46 = vadd.f32 %v10453_v47, %v13782_v9  ;;  %v4037_v37 = vpop.f32.mrb[13].mxu0  ;;  %10500 = vmatmul.mubr.msk.bf16.vlgmr.msra.gmra.mrb[36].mxu1 %vm5010_vm4, %v4821_v31  ;;  %v4832_v27 = vor.u32 %v4830_v16, %v4828_v55 }
 0x44c   : > { %v13857_v32 = vpack.c.bf16 %v4722_v60, %v4721_v22  ;;  %v13859_v48 = vpack.c.bf16 %v4723_v38, %v4722_v60  ;;  %v4285_v19 = vadd.f32 %v13782_v9, %v4037_v37  ;;  %v10454_v6 = vpop.f32.mrb[14].mxu0  ;;  %10548 = vmatpush3.bf16.msra.mxu1 %v13752_v56  ;;  %v4829_v11 = vsel %vm371_vm1, %v4824_v49, %v4828_v55  ;;  %v13882_v22 = vpop.permute.xlu1 %4575 }
 0x44d   : > { %v4342_v18 = vmax.f32 %v4287_v46, 0.0  ;;  %v4288_v15 = vadd.f32 %v10454_v6, %v13782_v9  ;;  %v4040_v17 = vpop.f32.mrb[15].mxu0  ;;  %v4842_v20 = vshll.u32 %v13851_v7, 16  ;;  %10549 = vmatprep.subr.bf16.mxu1 %v11821_v63  ;;  %10503 = vmatprep.mubr.msk.bf16.mxu1 %vm5010_vm4, %v4829_v11  ;;  %v4846_v55 = vshrl.u32 %v13851_v7, 16 }
 0x44e   : > { %v4340_v10 = vmax.f32 %v4285_v19, 0.0  ;;  %v4286_v59 = vadd.f32 %v13782_v9, %v4040_v17  ;;  %v4834_v56 = vshll.u32 %v13857_v32, 16  ;;  %v4838_v36 = vshrl.u32 %v13857_v32, 16 }
 0x44f   : > { %v4343_v4 = vmax.f32 %v4288_v15, 0.0  ;;  %v4727_v52 = vmul.f32 %v13773_v43, %v4342_v18  ;;  %v4844_v28 = vrot.slane %v4842_v20, 1  ;;  %v13910_v15 = vpop.permute.xlu0 %4580 }
 0x450   : > { %v4725_v34 = vmul.f32 %v13765_v35, %v4340_v10  ;;  %v4341_v45 = vmax.f32 %v4286_v59, 0.0  ;;  %v4836_v30 = vrot.slane %v4834_v56, 1  ;;  %10550 = vmatpush3.bf16.msra.mxu1 %v11821_v63  ;;  %v13912_v20 = vpop.permute.xlu1 %4585 }
 0x451   : > { %v4728_v54 = vmul.f32 %v13775_v58, %v4343_v4  ;;  %10599 = vmatprep.subr.bf16.mxu1 %v13870_v14  ;;  %v4848_v11 = vor.u32 %v4846_v55, %v4844_v28 }
 0x452   : > { %v13884_v44 = vpack.c.bf16 %v4725_v34, %v4724_v33  ;;  %v4726_v35 = vmul.f32 %v13767_v26, %v4341_v45  ;;  %v10457_v62 = vpop.f32.mrb[16].mxu0  ;;  %v13888_v61 = vsel %vm371_vm1, %v4832_v27, %v4836_v30  ;;  %v4840_v38 = vor.u32 %v4838_v36, %v4836_v30 }
 0x453   : > { %15464 = vst [vmem:[#allocation9_spill] sm:$0xff] %v13888_v61  ;;  %v13890_v63 = vpack.c.bf16 %v4728_v54, %v4727_v52  ;;  %v4291_v43 = vadd.f32 %v10457_v62, %v13782_v9  ;;  %v4053_v60 = vpop.f32.mrb[17].mxu0  ;;  %10504 = vmatmul.mubr.msk.bf16.gmra.mrb[40].mxu1 %vm5010_vm4, %v13888_v61 }
 0x454   : > { %v13895_v58 = vpack.c.bf16 %v4726_v35, %v4725_v34  ;;  %v13897_v47 = vpack.c.bf16 %v4727_v52, %v4726_v35  ;;  %v4289_v33 = vadd.f32 %v13782_v9, %v4053_v60  ;;  %v10458_v26 = vpop.f32.mrb[18].mxu0  ;;  %v13901_v31 = vsel %vm371_vm1, %v4840_v38, %v4844_v28 }
 0x455   : > { %15465 = vst [vmem:[#allocation10_spill] sm:$0xff] %v13901_v31  ;;  %v4346_v49 = vmax.f32 %v4291_v43, 0.0  ;;  %v4292_v46 = vadd.f32 %v10458_v26, %v13782_v9  ;;  %v4056_v37 = vpop.f32.mrb[19].mxu0  ;;  %10507 = vmatprep.mubr.msk.bf16.mxu1 %vm5010_vm4, %v13901_v31  ;;  %v4858_v19 = vshll.u32 %v13890_v63, 16  ;;  %v13937_v26 = vpop.permute.xlu0 %4590 }
 0x456   : > { %v4344_v6 = vmax.f32 %v4289_v33, 0.0  ;;  %v4290_v16 = vadd.f32 %v13782_v9, %v4056_v37  ;;  %v4850_v18 = vshll.u32 %v13895_v58, 16  ;;  %v4854_v4 = vshrl.u32 %v13895_v58, 16 }
 0x457   : > { %v4347_v17 = vmax.f32 %v4292_v46, 0.0  ;;  %v4731_v27 = vmul.f32 %v13792_v12, %v4346_v49  ;;  %v4860_v45 = vrot.slane %v4858_v19, 1  ;;  %v15471_v46 = vld [vmem:[#allocation92_spill] sm:$0xff]  ;;  %v4862_v19 = vshrl.u32 %v13890_v63, 16 }
 0x458   : > { %v4729_v10 = vmul.f32 %v13784_v23, %v4344_v6  ;;  %v4345_v59 = vmax.f32 %v4290_v16, 0.0  ;;  %v4852_v56 = vrot.slane %v4850_v18, 1  ;;  %v15467_v23 = vld [vmem:[#allocation90_spill] sm:$0xff]  ;;  %v13945_v16 = vpop.permute.xlu1 %4595 }
 0x459   : > { %v4732_v34 = vmul.f32 %v13796_v50, %v4347_v17  ;;  %v15472_v17 = vld [vmem:[#allocation93_spill] sm:$0xff] }
 0x45a   : > { %v13918_v30 = vpack.c.bf16 %v4729_v10, %v4728_v54  ;;  %v4730_v36 = vmul.f32 %v13787_v0, %v4345_v59  ;;  %v10461_v52 = vpop.f32.mrb[20].mxu0  ;;  %v13922_v28 = vsel %vm371_vm1, %v4848_v11, %v4852_v56  ;;  %v4856_v35 = vor.u32 %v4854_v4, %v4852_v56  ;;  %v15469_v54 = vld [vmem:[#allocation91_spill] sm:$0xff] }
 0x45b   : > { %15466 = vst [vmem:[#allocation11_spill] sm:$0xff] %v13922_v28  ;;  %v13924_v62 = vpack.c.bf16 %v4732_v34, %v4731_v27  ;;  %v10965_v38 = vadd.f32 %v10461_v52, %v15467_v23  ;;  %v4069_v43 = vpop.f32.mrb[21].mxu0  ;;  %10508 = vmatmul.mubr.msk.bf16.gmra.mrb[44].mxu1 %vm5010_vm4, %v13922_v28  ;;  %v4864_v4 = vor.u32 %v4862_v19, %v4860_v45  ;;  %v15483_v28 = vld [vmem:[#allocation104_spill] sm:$0xff] }
 0x45c   : > { %v13929_v12 = vpack.c.bf16 %v4730_v36, %v4729_v10  ;;  %v13931_v50 = vpack.c.bf16 %v4731_v27, %v4730_v36  ;;  %v10966_v60 = vadd.f32 %v4069_v43, %v15469_v54  ;;  %v10462_v0 = vpop.f32.mrb[22].mxu0  ;;  %v13935_v33 = vsel %vm371_vm1, %v4856_v35, %v4860_v45 }
 0x45d   : > { %15470 = vst [vmem:[#allocation14_spill] sm:$0xff] %v13935_v33  ;;  %v4295_v49 = vadd.f32 %v10965_v38, %v13782_v9  ;;  %v10967_v37 = vadd.f32 %v10462_v0, %v15471_v46  ;;  %v4072_v55 = vpop.f32.mrb[23].mxu0  ;;  %10511 = vmatprep.mubr.msk.bf16.mxu1 %vm5010_vm4, %v13935_v33  ;;  %v4874_v6 = vshll.u32 %v13924_v62, 16 }
 0x45e   : > { %15468 = vst [vmem:[#allocation12_spill] sm:$0xff] %v13931_v50  ;;  %v4293_v18 = vadd.f32 %v10966_v60, %v13782_v9  ;;  %v10968_v11 = vadd.f32 %v4072_v55, %v15472_v17  ;;  %v4866_v10 = vshll.u32 %v13929_v12, 16  ;;  %v4870_v35 = vshrl.u32 %v13929_v12, 16  ;;  %v15474_v55 = vld [vmem:[#allocation96_spill] sm:$0xff] }
 0x45f   : > { %v4350_v59 = vmax.f32 %v4295_v49, 0.0  ;;  %v4296_v56 = vadd.f32 %v10967_v37, %v13782_v9  ;;  %v4876_v38 = vrot.slane %v4874_v6, 1  ;;  %v13957_v49 = vpop.permute.xlu0 %4600  ;;  %v13964_v6 = vpop.permute.xlu1 %4605 }
 0x460   : > { %v4348_v27 = vmax.f32 %v4293_v18, 0.0  ;;  %v4294_v36 = vadd.f32 %v10968_v11, %v13782_v9  ;;  %v4868_v52 = vrot.slane %v4866_v10, 1  ;;  %v15476_v11 = vld [vmem:[#allocation97_spill] sm:$0xff] }
 0x461   : > { %v4351_v23 = vmax.f32 %v4296_v56, 0.0  ;;  %v4735_v45 = vmul.f32 %v13828_v13, %v4350_v59  ;;  %v15478_v59 = vld [vmem:[#allocation98_spill] sm:$0xff] }
 0x462   : > { %v4733_v43 = vmul.f32 %v13810_v42, %v4348_v27  ;;  %v4349_v54 = vmax.f32 %v4294_v36, 0.0  ;;  %v10465_v60 = vpop.f32.mrb[24].mxu0  ;;  %v13955_v0 = vsel %vm371_vm1, %v4864_v4, %v4868_v52  ;;  %v4872_v46 = vor.u32 %v4870_v35, %v4868_v52  ;;  %v15480_v35 = vld [vmem:[#allocation99_spill] sm:$0xff] }
 0x463   : > { %15473 = vst [vmem:[#allocation15_spill] sm:$0xff] %v13955_v0  ;;  %v4736_v37 = vmul.f32 %v13833_v40, %v4351_v23  ;;  %v10969_v19 = vadd.f32 %v10465_v60, %v15474_v55  ;;  %v4085_v18 = vpop.f32.mrb[25].mxu0  ;;  %10512 = vmatmul.mubr.msk.bf16.gmra.mrb[48].mxu1 %vm5010_vm4, %v13955_v0 }
 0x464   : > { %v13966_v42 = vpack.c.bf16 %v4733_v43, %v4732_v34  ;;  %v4734_v17 = vmul.f32 %v13812_v57, %v4349_v54  ;;  %v10970_v10 = vadd.f32 %v4085_v18, %v15476_v11  ;;  %v10466_v56 = vpop.f32.mrb[26].mxu0  ;;  %v13971_v4 = vsel %vm371_vm1, %v4872_v46, %v4876_v38 }
 0x465   : > { %15477 = vst [vmem:[#allocation17_spill] sm:$0xff] %v13971_v4  ;;  %v13973_v13 = vpack.c.bf16 %v4736_v37, %v4735_v45  ;;  %v4299_v40 = vadd.f32 %v10969_v19, %v13782_v9  ;;  %v10971_v27 = vadd.f32 %v10466_v56, %v15478_v59  ;;  %v4088_v36 = vpop.f32.mrb[27].mxu0  ;;  %10515 = vmatprep.mubr.msk.bf16.mxu1 %vm5010_vm4, %v13971_v4  ;;  %v4878_v46 = vshrl.u32 %v13924_v62, 16  ;;  %v13993_v56 = vpop.permute.xlu1 %4615  ;;  %v15481_v4 = vld [vmem:[#allocation102_spill] sm:$0xff] }
 0x466   : > { %15475 = vst [vmem:[#allocation16_spill] sm:$0xff] %v13966_v42  ;;  %v13979_v34 = vpack.c.bf16 %v4734_v17, %v4733_v43  ;;  %v13981_v52 = vpack.c.bf16 %v4735_v45, %v4734_v17  ;;  %v4297_v57 = vadd.f32 %v10970_v10, %v13782_v9  ;;  %v10972_v23 = vadd.f32 %v4088_v36, %v15480_v35  ;;  %v13990_v43 = vpop.permute.xlu0 %4610 }
 0x467   : > { %v4354_v54 = vmax.f32 %v4299_v40, 0.0  ;;  %v4300_v60 = vadd.f32 %v10971_v27, %v13782_v9  ;;  %v4890_v55 = vshll.u32 %v13973_v13, 16  ;;  %v4880_v17 = vor.u32 %v4878_v46, %v4876_v38 }
 0x468   : > { %15479 = vst [vmem:[#allocation19_spill] sm:$0xff] %v13981_v52  ;;  %v4352_v19 = vmax.f32 %v4297_v57, 0.0  ;;  %v4298_v18 = vadd.f32 %v10972_v23, %v13782_v9  ;;  %v4882_v11 = vshll.u32 %v13979_v34, 16  ;;  %v4894_v10 = vshrl.u32 %v13973_v13, 16 }
 0x469   : > { %v4355_v45 = vmax.f32 %v4300_v60, 0.0  ;;  %v4886_v35 = vshrl.u32 %v13979_v34, 16  ;;  %v4739_v57 = vmul.f32 %v13877_v2, %v4354_v54  ;;  %v4892_v60 = vrot.slane %v4890_v55, 1  ;;  %v15485_v54 = vld [vmem:[#allocation105_spill] sm:$0xff] }
 0x46a   : > { %v4737_v40 = vmul.f32 %v13849_v25, %v4352_v19  ;;  %v4353_v59 = vmax.f32 %v4298_v18, 0.0  ;;  %v10469_v27 = vpop.f32.mrb[28].mxu0  ;;  %v4884_v36 = vrot.slane %v4882_v11, 1 }
 0x46b   : > { %v4740_v23 = vmul.f32 %v13882_v22, %v4355_v45  ;;  %v10973_v0 = vadd.f32 %v10469_v27, %v15481_v4  ;;  %v4101_v33 = vpop.f32.mrb[29].mxu0  ;;  %v14019_v45 = vpop.permute.xlu0 %4620 }
 0x46c   : > { %v14000_v38 = vpack.c.bf16 %v4737_v40, %v4736_v37  ;;  %v4738_v46 = vmul.f32 %v13855_v51, %v4353_v59  ;;  %v10974_v31 = vadd.f32 %v4101_v33, %v15483_v28  ;;  %v10470_v25 = vpop.f32.mrb[30].mxu0  ;;  %v14005_v19 = vsel %vm371_vm1, %v4880_v17, %v4884_v36  ;;  %v15487_v33 = vld [vmem:[#allocation106_spill] sm:$0xff] }
 0x46d   : > { %15484 = vst [vmem:[#allocation26_spill] sm:$0xff] %v14005_v19  ;;  %v14007_v18 = vpack.c.bf16 %v4740_v23, %v4739_v57  ;;  %v4303_v2 = vadd.f32 %v10973_v0, %v13782_v9  ;;  %v10975_v22 = vadd.f32 %v10470_v25, %v15485_v54  ;;  %v4104_v11 = vpop.f32.mrb[31].mxu0  ;;  %10516 = vmatmul.mubr.msk.bf16.gmra.mrb[52].mxu1 %vm5010_vm4, %v14005_v19  ;;  %v14026_v25 = vpop.permute.xlu1 %4625 }
 0x46e   : > { %15482 = vst [vmem:[#allocation20_spill] sm:$0xff] %v14000_v38  ;;  %v4888_v37 = vor.u32 %v4886_v35, %v4884_v36  ;;  %v14013_v4 = vpack.c.bf16 %v4738_v46, %v4737_v40  ;;  %v14015_v51 = vpack.c.bf16 %v4739_v57, %v4738_v46  ;;  %v4301_v28 = vadd.f32 %v10974_v31, %v13782_v9 }
 0x46f   : > { %v10976_v55 = vadd.f32 %v4104_v11, %v15487_v33  ;;  %v4358_v17 = vmax.f32 %v4303_v2, 0.0  ;;  %v4304_v0 = vadd.f32 %v10975_v22, %v13782_v9  ;;  %v4906_v27 = vshll.u32 %v14007_v18, 16  ;;  %v15489_v33 = vld [vmem:[#allocation109_spill] sm:$0xff] }
 0x470   : > { %15486 = vst [vmem:[#allocation27_spill] sm:$0xff] %v14015_v51  ;;  %v14023_v59 = vsel %vm371_vm1, %v4888_v37, %v4892_v60  ;;  %v4356_v40 = vmax.f32 %v4301_v28, 0.0  ;;  %v4898_v31 = vshll.u32 %v14013_v4, 16  ;;  %v4896_v57 = vor.u32 %v4894_v10, %v4892_v60  ;;  %v15491_v60 = vld [vmem:[#allocation110_spill] sm:$0xff] }
 0x471   : > { %15488 = vst [vmem:[#allocation32_spill] sm:$0xff] %v14023_v59  ;;  %v4302_v36 = vadd.f32 %v10976_v55, %v13782_v9  ;;  %10519 = vmatprep.mubr.msk.bf16.mxu1 %vm5010_vm4, %v14023_v59  ;;  %v4359_v35 = vmax.f32 %v4304_v0, 0.0  ;;  %v4902_v46 = vshrl.u32 %v14013_v4, 16  ;;  %v4743_v2 = vmul.f32 %v13937_v26, %v4358_v17  ;;  %v14045_v17 = vpop.permute.xlu0 %4630 }
 0x472   : > { %v4741_v54 = vmul.f32 %v13910_v15, %v4356_v40  ;;  %v10473_v11 = vpop.f32.mrb[32].mxu0  ;;  %v4900_v37 = vrot.slane %v4898_v31, 1  ;;  %v4908_v61 = vrot.slane %v4906_v27, 1  ;;  %v4910_v59 = vshrl.u32 %v14007_v18, 16 }
 0x473   : > { %v4357_v22 = vmax.f32 %v4302_v36, 0.0  ;;  %v4744_v28 = vmul.f32 %v13945_v16, %v4359_v35  ;;  %v10977_v55 = vadd.f32 %v10473_v11, %v15489_v33  ;;  %v4117_v19 = vpop.f32.mrb[33].mxu0  ;;  %v15493_v36 = vld [vmem:[#allocation111_spill] sm:$0xff] }
 0x474   : > { %v14038_v51 = vpack.c.bf16 %v4741_v54, %v4740_v23  ;;  %v10978_v0 = vadd.f32 %v4117_v19, %v15491_v60  ;;  %v10474_v26 = vpop.f32.mrb[34].mxu0  ;;  %v14043_v15 = vsel %vm371_vm1, %v4896_v57, %v4900_v37  ;;  %v4904_v23 = vor.u32 %v4902_v46, %v4900_v37 }
 0x475   : > { %v4742_v10 = vmul.f32 %v13912_v20, %v4357_v22  ;;  %15492 = vst [vmem:[#allocation37_spill] sm:$0xff] %v14043_v15  ;;  %v14047_v40 = vpack.c.bf16 %v4744_v28, %v4743_v2  ;;  %v4307_v16 = vadd.f32 %v10977_v55, %v13782_v9  ;;  %v10979_v27 = vadd.f32 %v10474_v26, %v15493_v36  ;;  %v4120_v31 = vpop.f32.mrb[35].mxu0  ;;  %v4636_v20 = vpop.permute.xlu1 %4635  ;;  %v15495_v22 = vld [vmem:[#allocation112_spill] sm:$0xff] }
 0x476   : > { %15490 = vst [vmem:[#allocation33_spill] sm:$0xff] %v14038_v51  ;;  %10520 = vmatmul.mubr.msk.bf16.gmra.mrb[56].mxu1 %vm5010_vm4, %v14043_v15  ;;  %v4305_v57 = vadd.f32 %v10978_v0, %v13782_v9  ;;  %v10980_v11 = vadd.f32 %v4120_v31, %v15495_v22  ;;  %v14061_v55 = vsel %vm371_vm1, %v4904_v23, %v4908_v61  ;;  %v14071_v22 = vpop.permute.xlu0 %4640 }
 0x477   : > { %v14053_v35 = vpack.c.bf16 %v4742_v10, %v4741_v54  ;;  %v14055_v19 = vpack.c.bf16 %v4743_v2, %v4742_v10  ;;  %v4362_v33 = vmax.f32 %v4307_v16, 0.0  ;;  %v4308_v60 = vadd.f32 %v10979_v27, %v13782_v9  ;;  %15496 = vst [vmem:[#allocation40_spill] sm:$0xff] %v14061_v55  ;;  %10523 = vmatprep.mubr.msk.bf16.mxu1 %vm5010_vm4, %v14061_v55 }
 0x478   : > { %v4922_v26 = vshll.u32 %v14047_v40, 16  ;;  %v4360_v36 = vmax.f32 %v4305_v57, 0.0  ;;  %v4306_v46 = vadd.f32 %v10980_v11, %v13782_v9  ;;  %v4912_v37 = vor.u32 %v4910_v59, %v4908_v61  ;;  %v15497_v11 = vld [vmem:[#allocation113_spill] sm:$0xff] }
 0x479   : > { %15494 = vst [vmem:[#allocation38_spill] sm:$0xff] %v14055_v19  ;;  %v4914_v2 = vshll.u32 %v14053_v35, 16  ;;  %v4363_v54 = vmax.f32 %v4308_v60, 0.0  ;;  %v4918_v10 = vshrl.u32 %v14053_v35, 16  ;;  %v4747_v0 = vmul.f32 %v13990_v43, %v4362_v33  ;;  %v14076_v61 = vpop.permute.xlu1 %4645 }
 0x47a   : > { %v4745_v16 = vmul.f32 %v13957_v49, %v4360_v36  ;;  %v4361_v27 = vmax.f32 %v4306_v46, 0.0  ;;  %v10477_v31 = vpop.f32.mrb[36].mxu0  ;;  %v4924_v19 = vrot.slane %v4922_v26, 1  ;;  %v4926_v60 = vshrl.u32 %v14047_v40, 16  ;;  %v15499_v49 = vld [vmem:[#allocation114_spill] sm:$0xff] }
 0x47b   : > { %v4916_v23 = vrot.slane %v4914_v2, 1  ;;  %v4748_v57 = vmul.f32 %v13993_v56, %v4363_v54  ;;  %v10981_v15 = vadd.f32 %v10477_v31, %v15497_v11  ;;  %v4133_v55 = vpop.f32.mrb[37].mxu0  ;;  %v15501_v54 = vld [vmem:[#allocation115_spill] sm:$0xff] }
 0x47c   : > { %v14078_v59 = vpack.c.bf16 %v4745_v16, %v4744_v28  ;;  %v4746_v43 = vmul.f32 %v13964_v6, %v4361_v27  ;;  %v10982_v33 = vadd.f32 %v4133_v55, %v15499_v49  ;;  %v10478_v36 = vpop.f32.mrb[38].mxu0  ;;  %v15503_v27 = vld [vmem:[#allocation116_spill] sm:$0xff] }
 0x47d   : > { %v14083_v46 = vsel %vm371_vm1, %v4912_v37, %v4916_v23  ;;  %v14085_v2 = vpack.c.bf16 %v4748_v57, %v4747_v0  ;;  %v4311_v56 = vadd.f32 %v10981_v15, %v13782_v9  ;;  %v10983_v26 = vadd.f32 %v10478_v36, %v15501_v54  ;;  %v4136_v31 = vpop.f32.mrb[39].mxu0 }
 0x47e   : > { %15498 = vst [vmem:[#allocation41_spill] sm:$0xff] %v14078_v59  ;;  %15500 = vst [vmem:[#allocation46_spill] sm:$0xff] %v14083_v46  ;;  %10524 = vmatmul.mubr.msk.bf16.gmra.mrb[60].mxu1 %vm5010_vm4, %v14083_v46  ;;  %v4920_v28 = vor.u32 %v4918_v10, %v4916_v23  ;;  %v14091_v11 = vpack.c.bf16 %v4746_v43, %v4745_v16  ;;  %v14093_v6 = vpack.c.bf16 %v4747_v0, %v4746_v43  ;;  %v4651_v0 = vpop.permute.xlu0 %4650 }
 0x47f   : > { %v4309_v55 = vadd.f32 %v10982_v33, %v13782_v9  ;;  %v10984_v37 = vadd.f32 %v4136_v31, %v15503_v27  ;;  %v4366_v49 = vmax.f32 %v4311_v56, 0.0  ;;  %v4312_v59 = vadd.f32 %v10983_v26, %v13782_v9  ;;  %v4656_v33 = vpop.permute.xlu1 %4655 }
 0x480   : > { %15502 = vst [vmem:[#allocation47_spill] sm:$0xff] %v14093_v6  ;;  %v14099_v15 = vsel %vm371_vm1, %v4920_v28, %v4924_v19  ;;  %v4938_v36 = vshll.u32 %v14085_v2, 16  ;;  %v4930_v10 = vshll.u32 %v14091_v11, 16  ;;  %v4928_v23 = vor.u32 %v4926_v60, %v4924_v19  ;;  %v15507_v60 = vld [vmem:[#allocation118_spill] sm:$0xff] }
 0x481   : > { %15504 = vst [vmem:[#allocation49_spill] sm:$0xff] %v14099_v15  ;;  %v4364_v54 = vmax.f32 %v4309_v55, 0.0  ;;  %v4310_v46 = vadd.f32 %v10984_v37, %v13782_v9  ;;  %10527 = vmatprep.mubr.msk.bf16.mxu1 %vm5010_vm4, %v14099_v15  ;;  %v4367_v16 = vmax.f32 %v4312_v59, 0.0  ;;  %v4934_v43 = vshrl.u32 %v14091_v11, 16  ;;  %v15505_v37 = vld [vmem:[#allocation117_spill] sm:$0xff] }
 0x482   : > { %v4751_v56 = vmul.f32 %v14045_v17, %v4366_v49  ;;  %v10481_v28 = vpop.f32.mrb[40].mxu0  ;;  %v4932_v55 = vrot.slane %v4930_v10, 1  ;;  %v4940_v15 = vrot.slane %v4938_v36, 1  ;;  %v4942_v38 = vshrl.u32 %v14085_v2, 16  ;;  %v15511_v10 = vld [vmem:[#allocation120_spill] sm:$0xff] }
 0x483   : > { %v4749_v26 = vmul.f32 %v14019_v45, %v4364_v54  ;;  %v4365_v31 = vmax.f32 %v4310_v46, 0.0  ;;  %v4752_v27 = vmul.f32 %v4636_v20, %v4367_v16  ;;  %v10985_v6 = vadd.f32 %v10481_v28, %v15505_v37  ;;  %v4149_v51 = vpop.f32.mrb[41].mxu0  ;;  %v15509_v46 = vld [vmem:[#allocation119_spill] sm:$0xff]  ;;  %v4666_v37 = vpop.permute.xlu1 %4665 }
 0x484   : > { %v10986_v59 = vadd.f32 %v4149_v51, %v15507_v60  ;;  %v10482_v42 = vpop.f32.mrb[42].mxu0  ;;  %v14116_v17 = vsel %vm371_vm1, %v4928_v23, %v4932_v55  ;;  %v4661_v23 = vpop.permute.xlu0 %4660 }
 0x485   : > { %v14111_v52 = vpack.c.bf16 %v4749_v26, %v4748_v57  ;;  %v4750_v19 = vmul.f32 %v14026_v25, %v4365_v31  ;;  %15508 = vst [vmem:[#allocation54_spill] sm:$0xff] %v14116_v17  ;;  %v14118_v45 = vpack.c.bf16 %v4752_v27, %v4751_v56  ;;  %v4315_v20 = vadd.f32 %v10985_v6, %v13782_v9  ;;  %v4152_v54 = vpop.f32.mrb[43].mxu0 }
 0x486   : > { %v10987_v49 = vadd.f32 %v10482_v42, %v15509_v46  ;;  %10528 = vmatmul.mubr.msk.bf16.gmra.mrb[64].mxu1 %vm5010_vm4, %v14116_v17  ;;  %v4936_v57 = vor.u32 %v4934_v43, %v4932_v55  ;;  %v4313_v51 = vadd.f32 %v10986_v59, %v13782_v9  ;;  %v10988_v16 = vadd.f32 %v4152_v54, %v15511_v10  ;;  %v15513_v10 = vld [vmem:[#allocation121_spill] sm:$0xff] }
 0x487   : > { %15506 = vst [vmem:[#allocation50_spill] sm:$0xff] %v14111_v52  ;;  %v14124_v36 = vpack.c.bf16 %v4750_v19, %v4749_v26  ;;  %v14126_v25 = vpack.c.bf16 %v4751_v56, %v4750_v19  ;;  %v4370_v31 = vmax.f32 %v4315_v20, 0.0  ;;  %v4954_v42 = vshll.u32 %v14118_v45, 16 }
 0x488   : > { %v4316_v28 = vadd.f32 %v10987_v49, %v13782_v9  ;;  %v14132_v6 = vsel %vm371_vm1, %v4936_v57, %v4940_v15  ;;  %v4368_v60 = vmax.f32 %v4313_v51, 0.0  ;;  %v4314_v43 = vadd.f32 %v10988_v16, %v13782_v9 }
 0x489   : > { %15510 = vst [vmem:[#allocation55_spill] sm:$0xff] %v14126_v25  ;;  %15512 = vst [vmem:[#allocation57_spill] sm:$0xff] %v14132_v6  ;;  %10531 = vmatprep.mubr.msk.bf16.mxu1 %vm5010_vm4, %v14132_v6  ;;  %v4946_v56 = vshll.u32 %v14124_v36, 16  ;;  %v4944_v55 = vor.u32 %v4942_v38, %v4940_v15  ;;  %v4950_v19 = vshrl.u32 %v14124_v36, 16  ;;  %v4755_v59 = vmul.f32 %v4651_v0, %v4370_v31  ;;  %v15515_v38 = vld [vmem:[#allocation122_spill] sm:$0xff] }
 0x48a   : > { %v4371_v26 = vmax.f32 %v4316_v28, 0.0  ;;  %v4753_v20 = vmul.f32 %v14071_v22, %v4368_v60  ;;  %v4369_v46 = vmax.f32 %v4314_v43, 0.0  ;;  %v10485_v49 = vpop.f32.mrb[44].mxu0  ;;  %v4956_v16 = vrot.slane %v4954_v42, 1  ;;  %v4671_v22 = vpop.permute.xlu0 %4670  ;;  %v15517_v60 = vld [vmem:[#allocation123_spill] sm:$0xff] }
 0x48b   : > { %v4948_v54 = vrot.slane %v4946_v56, 1  ;;  %v10989_v51 = vadd.f32 %v10485_v49, %v15513_v10  ;;  %v4165_v17 = vpop.f32.mrb[45].mxu0  ;;  %v4958_v25 = vshrl.u32 %v14118_v45, 16  ;;  %v4676_v56 = vpop.permute.xlu1 %4675 }
 0x48c   : > { %v4756_v57 = vmul.f32 %v4656_v33, %v4371_v26  ;;  %v14143_v6 = vpack.c.bf16 %v4753_v20, %v4752_v27  ;;  %v4754_v28 = vmul.f32 %v14076_v61, %v4369_v46  ;;  %v10990_v15 = vadd.f32 %v4165_v17, %v15515_v38  ;;  %v10486_v52 = vpop.f32.mrb[46].mxu0 }
 0x48d   : > { %v14148_v0 = vsel %vm371_vm1, %v4944_v55, %v4948_v54  ;;  %v4319_v33 = vadd.f32 %v10989_v51, %v13782_v9  ;;  %v10991_v43 = vadd.f32 %v10486_v52, %v15517_v60  ;;  %v4168_v42 = vpop.f32.mrb[47].mxu0  ;;  %v4952_v27 = vor.u32 %v4950_v19, %v4948_v54  ;;  %v15519_v55 = vld [vmem:[#allocation124_spill] sm:$0xff] }
 0x48e   : > { %15514 = vst [vmem:[#allocation58_spill] sm:$0xff] %v14143_v6  ;;  %15516 = vst [vmem:[#allocation62_spill] sm:$0xff] %v14148_v0  ;;  %v14150_v31 = vpack.c.bf16 %v4756_v57, %v4755_v59  ;;  %10532 = vmatmul.mubr.msk.bf16.gmra.mrb[68].mxu1 %vm5010_vm4, %v14148_v0  ;;  %v14156_v61 = vpack.c.bf16 %v4754_v28, %v4753_v20  ;;  %v14158_v17 = vpack.c.bf16 %v4755_v59, %v4754_v28 }
 0x48f   : > { %v4317_v26 = vadd.f32 %v10990_v15, %v13782_v9  ;;  %v10992_v46 = vadd.f32 %v4168_v42, %v15519_v55  ;;  %v4374_v49 = vmax.f32 %v4319_v33, 0.0  ;;  %v4320_v10 = vadd.f32 %v10991_v43, %v13782_v9  ;;  %v4681_v42 = vpop.permute.xlu0 %4680  ;;  %v4686_v6 = vpop.permute.xlu1 %4685 }
 0x490   : > { %15518 = vst [vmem:[#allocation64_spill] sm:$0xff] %v14158_v17  ;;  %v14164_v51 = vsel %vm371_vm1, %v4952_v27, %v4956_v16  ;;  %v4970_v52 = vshll.u32 %v14150_v31, 16  ;;  %v4962_v59 = vshll.u32 %v14156_v61, 16  ;;  %v4960_v54 = vor.u32 %v4958_v25, %v4956_v16 }
 0x491   : > { %15520 = vst [vmem:[#allocation25_spill] sm:$0xff] %v14164_v51  ;;  %v4372_v38 = vmax.f32 %v4317_v26, 0.0  ;;  %v4318_v19 = vadd.f32 %v10992_v46, %v13782_v9  ;;  %10535 = vmatprep.mubr.msk.bf16.mxu1 %vm5010_vm4, %v14164_v51  ;;  %v4375_v20 = vmax.f32 %v4320_v10, 0.0  ;;  %v4966_v43 = vshrl.u32 %v14156_v61, 16  ;;  %v15521_v26 = vld [vmem:[#allocation125_spill] sm:$0xff]  ;;  %v15522_v10 = vld [vmem:[#allocation126_spill] sm:$0xff] }
 0x492   : > { %v10489_v33 = vpop.f32.mrb[48].mxu0  ;;  %v4964_v60 = vrot.slane %v4962_v59, 1  ;;  %v4759_v27 = vmul.f32 %v4671_v22, %v4374_v49  ;;  %v4972_v17 = vrot.slane %v4970_v52, 1 }
 0x493   : > { %v4757_v28 = vmul.f32 %v4661_v23, %v4372_v38  ;;  %v4373_v15 = vmax.f32 %v4318_v19, 0.0  ;;  %v14172_v55 = vmul.f32 %v4676_v56, %v4375_v20  ;;  %v10993_v0 = vadd.f32 %v10489_v33, %v15521_v26  ;;  %v4181_v46 = vpop.f32.mrb[49].mxu0  ;;  %v15524_v56 = vld [vmem:[#allocation127_spill] sm:$0xff]  ;;  %v15526_v20 = vld [vmem:[#allocation128_spill] sm:$0xff] }
 0x494   : > { %v10994_v25 = vadd.f32 %v4181_v46, %v15522_v10  ;;  %v10490_v23 = vpop.f32.mrb[50].mxu0  ;;  %v14179_v16 = vsel %vm371_vm1, %v4960_v54, %v4964_v60  ;;  %v4696_v10 = vpop.permute.xlu1 %4695 }
 0x495   : > { %v14175_v51 = vpack.c.bf16 %v4757_v28, %v4756_v57  ;;  %v4758_v50 = vmul.f32 %v4666_v37, %v4373_v15  ;;  %15523 = vst [vmem:[#allocation31_spill] sm:$0xff] %v14179_v16  ;;  %v14182_v38 = vpack.c.bf16 %v14172_v55, %v4759_v27  ;;  %v4323_v22 = vadd.f32 %v10993_v0, %v13782_v9  ;;  %v4184_v19 = vpop.f32.mrb[51].mxu0 }
 0x496   : > { %v10995_v49 = vadd.f32 %v10490_v23, %v15524_v56  ;;  %10536 = vmatmul.mubr.msk.bf16.gmra.mrb[72].mxu1 %vm5010_vm4, %v14179_v16  ;;  %v4968_v57 = vor.u32 %v4966_v43, %v4964_v60  ;;  %v4321_v59 = vadd.f32 %v10994_v25, %v13782_v9  ;;  %v10996_v54 = vadd.f32 %v4184_v19, %v15526_v20  ;;  %v4691_v60 = vpop.permute.xlu0 %4690 }
 0x497   : > { %v14188_v52 = vpack.c.bf16 %v4758_v50, %v4757_v28  ;;  %v14190_v37 = vpack.c.bf16 %v4759_v27, %v4758_v50  ;;  %v4378_v15 = vmax.f32 %v4323_v22, 0.0  ;;  %v4974_v28 = vshrl.u32 %v14150_v31, 16 }
 0x498   : > { %v4324_v33 = vadd.f32 %v10995_v49, %v13782_v9  ;;  %v14196_v0 = vsel %vm371_vm1, %v4968_v57, %v4972_v17  ;;  %v4376_v26 = vmax.f32 %v4321_v59, 0.0  ;;  %v4322_v46 = vadd.f32 %v10996_v54, %v13782_v9 }
 0x499   : > { %15525 = vst [vmem:[#allocation35_spill] sm:$0xff] %v14190_v37  ;;  %15527 = vst [vmem:[#allocation43_spill] sm:$0xff] %v14196_v0  ;;  %10539 = vmatprep.mubr.msk.bf16.mxu1 %vm5010_vm4, %v14196_v0  ;;  %v4978_v50 = vshll.u32 %v14188_v52, 16  ;;  %v4986_v27 = vshll.u32 %v14182_v38, 16  ;;  %v4976_v56 = vor.u32 %v4974_v28, %v4972_v17  ;;  %v4763_v19 = vmul.f32 %v4691_v60, %v4378_v15 }
 0x49a   : > { %v4379_v43 = vmax.f32 %v4324_v33, 0.0  ;;  %v4761_v25 = vmul.f32 %v4681_v42, %v4376_v26  ;;  %v4377_v23 = vmax.f32 %v4322_v46, 0.0  ;;  %v10493_v22 = vpop.f32.mrb[80].mxu0  ;;  %v4982_v54 = vshrl.u32 %v14188_v52, 16 }
 0x49b   : > { %v4980_v49 = vrot.slane %v4978_v50, 1  ;;  %v14207_v59 = vadd.f32 %v10493_v22, %v13769_v21  ;;  %v4197_v20 = vpop.f32.mrb[81].mxu0  ;;  %v4988_v26 = vrot.slane %v4986_v27, 1  ;;  %v4990_v27 = vshrl.u32 %v14182_v38, 16 }
 0x49c   : > { %v14204_v57 = vmul.f32 %v4696_v10, %v4379_v43  ;;  %v14210_v0 = vpack.c.bf16 %v4761_v25, %v4761_v25  ;;  %v4762_v33 = vmul.f32 %v4686_v6, %v4377_v23  ;;  %v4263_v16 = vadd.f32 %v4197_v20, %v13771_v8  ;;  %v10494_v37 = vpop.f32.mrb[82].mxu0 }
 0x49d   : > { %15528 = vst [vmem:[#allocation44_spill] sm:$0xff] %v14207_v59  ;;  %v14214_v42 = vsel %vm371_vm1, %v4976_v56, %v4980_v49  ;;  %v4200_v15 = vpop.f32.mrb[83].mxu0  ;;  %v4984_v21 = vor.u32 %v4982_v54, %v4980_v49  ;;  %v14235_v22 = vor.u32 %v4990_v27, %v4988_v26  ;;  %v4706_v56 = vpop.permute.xlu1 %4705  ;;  %v11823_v54 = vld [vmem:[%s15081_s4 + $0x28] sm:$0xff]   ;;  %v5636_v27 = vrot.slane %v13890_v63, 1 }
 0x49e   : > { %15529 = vst [vmem:[#allocation51_spill] sm:$0xff] %v14214_v42  ;;  %v14217_v17 = vpack.c.bf16 %v14204_v57, %v4763_v19  ;;  %10540 = vmatmul.mubr.msk.bf16.gmra.mrb[76].mxu1 %vm5010_vm4, %v14214_v42  ;;  %v14221_v46 = vpack.c.bf16 %v4763_v19, %v4762_v33  ;;  %v14223_v28 = vpack.c.bf16 %v4762_v33, %v4761_v25  ;;  %v4994_v50 = vshll.u32 %v14210_v0, 16 }
 0x49f   : > { %v4325_v6 = vadd.f32 %v13782_v9, %v4263_v16  ;;  %v4264_v8 = vadd.f32 %v4200_v15, %v13777_v53  ;;  %v14228_v37 = vsel %vm371_vm1, %v4984_v21, %v4988_v26  ;;  %15532 = vst [vmem:[#allocation60_spill] sm:$0xff] %v14235_v22  ;;  %v4701_v16 = vpop.permute.xlu0 %4700  ;;  %v5626_v15 = vrot.slane %v13822_v41, 1  ;;  %v11825_v26 = vld [vmem:[%s15081_s4 + $0x38] sm:$0xff]  }
 0x4a0   : > { %15530 = vst [vmem:[#allocation52_spill] sm:$0xff] %v14217_v17  ;;  %15531 = vst [vmem:[#allocation59_spill] sm:$0xff] %v14228_v37  ;;  %10543 = vmatprep.mubr.msk.bf16.mxu1 %vm5010_vm4, %v14228_v37  ;;  %v4996_v10 = vrot.slane %v4994_v50, 1  ;;  %v5628_v21 = vrot.slane %v13819_v1, 1  ;;  %v6448_v59 = vshll.u32 %v13884_v44, 16 }
 0x4a1   : > { %v4380_v60 = vmax.f32 %v4325_v6, 0.0  ;;  %v4326_v43 = vadd.f32 %v13782_v9, %v4264_v8  ;;  %v14241_v9 = vpack.c.bf16 %v4761_v25, %v14172_v55  ;;  %v11824_v55 = vld [vmem:[%s15081_s4 + $0x30] sm:$0xff]   ;;  %v5624_v25 = vrot.slane %v13800_v3, 1 }
 0x4a2   : > { %v4997_v19 = vsel %vm371_vm1, %v14235_v22, %v4996_v10  ;;  %v5632_v8 = vrot.slane %v13851_v7, 1  ;;  %v6431_v22 = vshrl.u32 %v13824_v29, 16 }
 0x4a3   : > { %v4381_v23 = vmax.f32 %v4326_v43, 0.0  ;;  %v4765_v53 = vmul.f32 %v4701_v16, %v4380_v60  ;;  %v5627_v6 = vsel %vm1286_vm3, %v5624_v25, %v5626_v15  ;;  %v5634_v43 = vrot.slane %v13895_v58, 1 }
 0x4a4   : > { %v5638_v16 = vrot.slane %v13929_v12, 1 }
 0x4a5   : > { %v4766_v49 = vmul.f32 %v4706_v56, %v4381_v23  ;;  %v14334_v10 = vsel %vm1286_vm3, %v5632_v8, %v5634_v43  ;;  %v14339_v23 = vsel %vm1286_vm3, %v5634_v43, %v5636_v27  ;;  %v5640_v56 = vrot.slane %v13924_v62, 1 }
 0x4a6   : > { %10544 = vmatmul.mubr.msk.bf16.gmra.mrb[80].mxu1 %vm5010_vm4, %v4997_v19  ;;  %15536 = vst [vmem:[#allocation6_spill] sm:$0xff] %v14334_v10  ;;  %15537 = vst [vmem:[#allocation8_spill] sm:$0xff] %v14339_v23  ;;  %v5642_v19 = vrot.slane %v13979_v34, 1  ;;  %v5656_v43 = vrot.slane %v14085_v2, 1 }
 0x4a7   : > { %v14243_v20 = vpack.c.bf16 %v4766_v49, %v4765_v53  ;;  %10551 = vmatprep.mubr.msk.bf16.mxu1 %vm5010_vm4, %v13803_v39  ;;  %v14346_v53 = vsel %vm1286_vm3, %v5636_v27, %v5638_v16  ;;  %v14351_v49 = vsel %vm1286_vm3, %v5638_v16, %v5640_v56 }
 0x4a8   : > { %15538 = vst [vmem:[#allocation7_spill] sm:$0xff] %v14346_v53  ;;  %15539 = vst [vmem:[#allocation13_spill] sm:$0xff] %v14351_v49 }
 0x4a9   : > { %15533 = vst [vmem:[#allocation65_spill] sm:$0xff] %v14243_v20 }
 0x4ae   : > { %10552 = vmatmul.mubr.msk.bf16.vlgmr.msra.gmra.mrb[36].mxu1 %vm5010_vm4, %v13800_v3  ;;  %v5629_v3 = vsel %vm1286_vm3, %v5626_v15, %v5628_v21 }
 0x4af   : > { %10600 = vmatpush3.bf16.msra.mxu1 %v13870_v14  ;;  %10555 = vmatprep.mubr.msk.bf16.mxu1 %vm5010_vm4, %v13822_v41  ;;  %v5623_v14 = vrot.slane %v13803_v39, 1  ;;  %v14316_v39 = vld [vmem:[%s15081_s4 + $0x40] sm:$0xff]   ;;  %v5630_v41 = vrot.slane %v13857_v32, 1 }
 0x4b0   : > { %10601 = vmatprep.subr.bf16.mxu1 %v11823_v54 }
 0x4b1   : > { %v5625_v33 = vsel %vm1286_vm3, %v5623_v14, %v5624_v25  ;;  %v14322_v50 = vsel %vm1286_vm3, %v5628_v21, %v5630_v41  ;;  %v14327_v60 = vsel %vm1286_vm3, %v5630_v41, %v5632_v8  ;;  %v5646_v25 = vrot.slane %v14013_v4, 1 }
 0x4b2   : > { %15534 = vst [vmem:[#allocation66_spill] sm:$0xff] %v14322_v50  ;;  %15535 = vst [vmem:[#allocation5_spill] sm:$0xff] %v14327_v60  ;;  %v5654_v8 = vrot.slane %v14091_v11, 1 }
 0x4b3   : > { %10602 = vmatpush3.bf16.msra.mxu1 %v11823_v54  ;;  %v5644_v54 = vrot.slane %v13973_v13, 1 }
 0x4b4   : > { %10651 = vmatprep.subr.bf16.mxu1 %v11824_v55  ;;  %v14399_v16 = vsel %vm1286_vm3, %v5654_v8, %v5656_v43 }
 0x4b5   : > { %v14363_v14 = vsel %vm1286_vm3, %v5642_v19, %v5644_v54  ;;  %v14370_v15 = vsel %vm1286_vm3, %v5644_v54, %v5646_v25  ;;  %15547 = vst [vmem:[#allocation24_spill] sm:$0xff] %v14399_v16 }
 0x4b6   : > { %10556 = vmatmul.mubr.msk.bf16.gmra.mrb[40].mxu1 %vm5010_vm4, %v13819_v1  ;;  %15541 = vst [vmem:[#allocation23_spill] sm:$0xff] %v14363_v14  ;;  %15542 = vst [vmem:[#allocation30_spill] sm:$0xff] %v14370_v15 }
 0x4b7   : > { %10559 = vmatprep.mubr.msk.bf16.mxu1 %vm5010_vm4, %v13857_v32 }
 0x4be   : > { %10560 = vmatmul.mubr.msk.bf16.gmra.mrb[44].mxu1 %vm5010_vm4, %v13851_v7 }
 0x4bf   : > { %10563 = vmatprep.mubr.msk.bf16.mxu1 %vm5010_vm4, %v13895_v58 }
 0x4c6   : > { %10564 = vmatmul.mubr.msk.bf16.gmra.mrb[48].mxu1 %vm5010_vm4, %v13890_v63 }
 0x4c7   : > { %10567 = vmatprep.mubr.msk.bf16.mxu1 %vm5010_vm4, %v13929_v12 }
 0x4ce   : > { %10568 = vmatmul.mubr.msk.bf16.gmra.mrb[52].mxu1 %vm5010_vm4, %v13924_v62 }
 0x4cf   : > { %10571 = vmatprep.mubr.msk.bf16.mxu1 %vm5010_vm4, %v13979_v34 }
 0x4d6   : > { %10572 = vmatmul.mubr.msk.bf16.gmra.mrb[56].mxu1 %vm5010_vm4, %v13973_v13 }
 0x4d7   : > { %10575 = vmatprep.mubr.msk.bf16.mxu1 %vm5010_vm4, %v14013_v4 }
 0x4de   : > { %10576 = vmatmul.mubr.msk.bf16.gmra.mrb[60].mxu1 %vm5010_vm4, %v14007_v18 }
 0x4df   : > { %10579 = vmatprep.mubr.msk.bf16.mxu1 %vm5010_vm4, %v14053_v35 }
 0x4e6   : > { %10580 = vmatmul.mubr.msk.bf16.gmra.mrb[64].mxu1 %vm5010_vm4, %v14047_v40 }
 0x4e7   : > { %10583 = vmatprep.mubr.msk.bf16.mxu1 %vm5010_vm4, %v14091_v11 }
 0x4ee   : > { %10584 = vmatmul.mubr.msk.bf16.gmra.mrb[68].mxu1 %vm5010_vm4, %v14085_v2 }
 0x4ef   : > { %10587 = vmatprep.mubr.msk.bf16.mxu1 %vm5010_vm4, %v14124_v36 }
 0x4f6   : > { %10588 = vmatmul.mubr.msk.bf16.gmra.mrb[72].mxu1 %vm5010_vm4, %v14118_v45 }
 0x4f7   : > { %10591 = vmatprep.mubr.msk.bf16.mxu1 %vm5010_vm4, %v14156_v61 }
 0x4fe   : > { %10592 = vmatmul.mubr.msk.bf16.gmra.mrb[76].mxu1 %vm5010_vm4, %v14150_v31 }
 0x4ff   : > { %10595 = vmatprep.mubr.msk.bf16.mxu1 %vm5010_vm4, %v14188_v52 }
 0x506   : > { %10596 = vmatmul.mubr.msk.bf16.gmra.mrb[80].mxu1 %vm5010_vm4, %v14182_v38 }
 0x507   : > { %10603 = vmatprep.mubr.msk.bf16.mxu1 %vm5010_vm4, %v5625_v33  ;;  %v5648_v33 = vrot.slane %v14007_v18, 1 }
 0x509   : > { %v14375_v21 = vsel %vm1286_vm3, %v5646_v25, %v5648_v33 }
 0x50a   : > { %15543 = vst [vmem:[#allocation34_spill] sm:$0xff] %v14375_v21 }
 0x50e   : > { %10604 = vmatmul.mubr.msk.bf16.vlgmr.msra.gmra.mrb[36].mxu1 %vm5010_vm4, %v5627_v6  ;;  %v5652_v6 = vrot.slane %v14047_v40, 1 }
 0x50f   : > { %10652 = vmatpush3.bf16.msra.mxu1 %v11824_v55  ;;  %10607 = vmatprep.mubr.msk.bf16.mxu1 %vm5010_vm4, %v5629_v3  ;;  %v14358_v55 = vsel %vm1286_vm3, %v5640_v56, %v5642_v19  ;;  %v5658_v56 = vrot.slane %v14124_v36, 1  ;;  %v5660_v19 = vrot.slane %v14118_v45, 1 }
 0x510   : > { %10653 = vmatprep.subr.bf16.mxu1 %v11825_v26  ;;  %15540 = vst [vmem:[#allocation21_spill] sm:$0xff] %v14358_v55  ;;  %v14394_v27 = vsel %vm1286_vm3, %v5652_v6, %v5654_v8 }
 0x511   : > { %15546 = vst [vmem:[#allocation22_spill] sm:$0xff] %v14394_v27  ;;  %v14406_v54 = vsel %vm1286_vm3, %v5656_v43, %v5658_v56  ;;  %v14411_v25 = vsel %vm1286_vm3, %v5658_v56, %v5660_v19  ;;  %v5666_v43 = vrot.slane %v14188_v52, 1  ;;  %v14429_v56 = vrot.slane %v14182_v38, 1 }
 0x512   : > { %15548 = vst [vmem:[#allocation28_spill] sm:$0xff] %v14406_v54  ;;  %15549 = vst [vmem:[#allocation29_spill] sm:$0xff] %v14411_v25 }
 0x513   : > { %10654 = vmatpush3.bf16.msra.mxu1 %v11825_v26  ;;  %v5650_v26 = vrot.slane %v14053_v35, 1  ;;  %15552 = vst [vmem:[#allocation45_spill] sm:$0xff] %v14429_v56 }
 0x514   : > { %10703 = vmatprep.subr.bf16.mxu1 %v14316_v39 }
 0x515   : > { %v14382_v3 = vsel %vm1286_vm3, %v5648_v33, %v5650_v26  ;;  %v14387_v41 = vsel %vm1286_vm3, %v5650_v26, %v5652_v6  ;;  %v5662_v33 = vrot.slane %v14156_v61, 1  ;;  %v5664_v26 = vrot.slane %v14150_v31, 1 }
 0x516   : > { %10608 = vmatmul.mubr.msk.bf16.gmra.mrb[40].mxu1 %vm5010_vm4, %v14322_v50  ;;  %15544 = vst [vmem:[#allocation42_spill] sm:$0xff] %v14382_v3  ;;  %15545 = vst [vmem:[#allocation18_spill] sm:$0xff] %v14387_v41  ;;  %v6441_v50 = vshll.u32 %v13859_v48, 16 }
 0x517   : > { %10611 = vmatprep.mubr.msk.bf16.mxu1 %vm5010_vm4, %v14327_v60  ;;  %v14418_v6 = vsel %vm1286_vm3, %v5660_v19, %v5662_v33  ;;  %v14423_v8 = vsel %vm1286_vm3, %v5662_v33, %v5664_v26  ;;  %v14438_v19 = vsel %vm1286_vm3, %v5666_v43, %v14429_v56  ;;  %v5670_v33 = vrot.slane %v14210_v0, 1  ;;  %v11828_v0 = vld [vmem:[%s15081_s4 + $0x50] sm:$0xff]  }
 0x518   : > { %15550 = vst [vmem:[#allocation36_spill] sm:$0xff] %v14418_v6  ;;  %15551 = vst [vmem:[#allocation39_spill] sm:$0xff] %v14423_v8  ;;  %v6443_v42 = vrot.slane %v6441_v50, 1  ;;  %v6452_v50 = vshrl.u32 %v13884_v44, 16 }
 0x519   : > { %15554 = vst [vmem:[#allocation53_spill] sm:$0xff] %v14438_v19 }
 0x51e   : > { %10612 = vmatmul.mubr.msk.bf16.gmra.mrb[44].mxu1 %vm5010_vm4, %v14334_v10 }
 0x51f   : > { %10615 = vmatprep.mubr.msk.bf16.mxu1 %vm5010_vm4, %v14339_v23 }
 0x526   : > { %10616 = vmatmul.mubr.msk.bf16.gmra.mrb[48].mxu1 %vm5010_vm4, %v14346_v53 }
 0x527   : > { %10619 = vmatprep.mubr.msk.bf16.mxu1 %vm5010_vm4, %v14351_v49  ;;  %v6434_v49 = vshll.u32 %v13845_v5, 16 }
 0x529   : > { %v6436_v60 = vrot.slane %v6434_v49, 1 }
 0x52e   : > { %10620 = vmatmul.mubr.msk.bf16.gmra.mrb[52].mxu1 %vm5010_vm4, %v14358_v55  ;;  %v6421_v55 = vshrl.u32 %v13816_v24, 16 }
 0x52f   : > { %10623 = vmatprep.mubr.msk.bf16.mxu1 %vm5010_vm4, %v14363_v14  ;;  %v6427_v14 = vshll.u32 %v13824_v29, 16 }
 0x531   : > { %v6429_v23 = vrot.slane %v6427_v14, 1  ;;  %v11829_v14 = vld [vmem:[%s15081_s4 + $0x58] sm:$0xff]  }
 0x536   : > { %10624 = vmatmul.mubr.msk.bf16.gmra.mrb[56].mxu1 %vm5010_vm4, %v14370_v15 }
 0x537   : > { %10627 = vmatprep.mubr.msk.bf16.mxu1 %vm5010_vm4, %v14375_v21  ;;  %v15568_v21 = vld [vmem:[#allocation35_spill] sm:$0xff] }
 0x53e   : > { %10628 = vmatmul.mubr.msk.bf16.gmra.mrb[60].mxu1 %vm5010_vm4, %v14382_v3  ;;  %v6423_v3 = vshll.u32 %v13816_v24, 16 }
 0x53f   : > { %10631 = vmatprep.mubr.msk.bf16.mxu1 %vm5010_vm4, %v14387_v41  ;;  %v15567_v41 = vld [vmem:[#allocation64_spill] sm:$0xff] }
 0x540   : > { %v6425_v15 = vrot.slane %v6423_v3, 1  ;;  %v6438_v3 = vshrl.u32 %v13845_v5, 16 }
 0x542   : > { %v6426_v53 = vor.u32 %v6425_v15, %v6421_v55  ;;  %v6440_v37 = vor.u32 %v6438_v3, %v6436_v60  ;;  %v6433_v55 = vor.u32 %v6431_v22, %v6429_v23  ;;  %v6455_v15 = vshll.u32 %v13897_v47, 16  ;;  %v14523_v22 = vld [vmem:[%s15081_s4 + $0x60] sm:$0xff]  }
 0x544   : > { %v6430_v10 = vsel %vm371_vm1, %v6426_v53, %v6429_v23  ;;  %v6437_v53 = vsel %vm371_vm1, %v6433_v55, %v6436_v60  ;;  %v6444_v49 = vsel %vm371_vm1, %v6440_v37, %v6443_v42  ;;  %v6445_v60 = vshrl.u32 %v13859_v48, 16 }
 0x545   : > { %v6457_v3 = vrot.slane %v6455_v15, 1  ;;  %v6462_v37 = vshll.u32 %v13918_v30, 16  ;;  %v6459_v15 = vshrl.u32 %v13897_v47, 16 }
 0x546   : > { %10632 = vmatmul.mubr.msk.bf16.gmra.mrb[64].mxu1 %vm5010_vm4, %v14394_v27  ;;  %v15566_v27 = vld [vmem:[#allocation58_spill] sm:$0xff] }
 0x547   : > { %10635 = vmatprep.mubr.msk.bf16.mxu1 %vm5010_vm4, %v14399_v16  ;;  %v15565_v16 = vld [vmem:[#allocation55_spill] sm:$0xff] }
 0x54e   : > { %10636 = vmatmul.mubr.msk.bf16.gmra.mrb[68].mxu1 %vm5010_vm4, %v14406_v54  ;;  %v15564_v54 = vld [vmem:[#allocation50_spill] sm:$0xff] }
 0x54f   : > { %10639 = vmatprep.mubr.msk.bf16.mxu1 %vm5010_vm4, %v14411_v25  ;;  %v14432_v25 = vsel %vm1286_vm3, %v5664_v26, %v5666_v43  ;;  %v11827_v26 = vld [vmem:[%s15081_s4 + $0x48] sm:$0xff]   ;;  %v15557_v43 = vld [vmem:[#allocation19_spill] sm:$0xff] }
 0x550   : > { %15553 = vst [vmem:[#allocation48_spill] sm:$0xff] %v14432_v25 }
 0x556   : > { %10640 = vmatmul.mubr.msk.bf16.gmra.mrb[72].mxu1 %vm5010_vm4, %v14418_v6  ;;  %v15563_v6 = vld [vmem:[#allocation47_spill] sm:$0xff] }
 0x557   : > { %10643 = vmatprep.mubr.msk.bf16.mxu1 %vm5010_vm4, %v14423_v8  ;;  %v5671_v8 = vsel %vm1286_vm3, %v14429_v56, %v5670_v33  ;;  %v15558_v33 = vld [vmem:[#allocation20_spill] sm:$0xff]  ;;  %v15560_v56 = vld [vmem:[#allocation33_spill] sm:$0xff] }
 0x558   : > { %v6490_v17 = vshll.u32 %v15558_v33, 16 }
 0x55e   : > { %10644 = vmatmul.mubr.msk.bf16.gmra.mrb[76].mxu1 %vm5010_vm4, %v14432_v25  ;;  %v15562_v25 = vld [vmem:[#allocation41_spill] sm:$0xff] }
 0x55f   : > { %10647 = vmatprep.mubr.msk.bf16.mxu1 %vm5010_vm4, %v14438_v19  ;;  %v15561_v19 = vld [vmem:[#allocation38_spill] sm:$0xff] }
 0x566   : > { %10648 = vmatmul.mubr.msk.bf16.gmra.mrb[80].mxu1 %vm5010_vm4, %v5671_v8  ;;  %v15556_v8 = vld [vmem:[#allocation16_spill] sm:$0xff] }
 0x567   : > { %10655 = vmatprep.mubr.msk.bf16.mxu1 %vm5010_vm4, %v13816_v24 }
 0x56e   : > { %10656 = vmatmul.mubr.msk.bf16.vlgmr.msra.gmra.mrb[36].mxu1 %vm5010_vm4, %v13824_v29 }
 0x56f   : > { %10704 = vmatpush3.bf16.msra.mxu1 %v14316_v39  ;;  %10659 = vmatprep.mubr.msk.bf16.mxu1 %vm5010_vm4, %v13845_v5  ;;  %v15555_v39 = vld [vmem:[#allocation12_spill] sm:$0xff] }
 0x570   : > { %10705 = vmatprep.subr.bf16.mxu1 %v11827_v26 }
 0x573   : > { %10706 = vmatpush3.bf16.msra.mxu1 %v11827_v26  ;;  %v15559_v26 = vld [vmem:[#allocation27_spill] sm:$0xff] }
 0x574   : > { %10755 = vmatprep.subr.bf16.mxu1 %v11828_v0 }
 0x576   : > { %10660 = vmatmul.mubr.msk.bf16.gmra.mrb[40].mxu1 %vm5010_vm4, %v13859_v48 }
 0x577   : > { %10663 = vmatprep.mubr.msk.bf16.mxu1 %vm5010_vm4, %v13884_v44 }
 0x57e   : > { %10664 = vmatmul.mubr.msk.bf16.gmra.mrb[44].mxu1 %vm5010_vm4, %v13897_v47 }
 0x57f   : > { %10667 = vmatprep.mubr.msk.bf16.mxu1 %vm5010_vm4, %v13918_v30 }
 0x586   : > { %10668 = vmatmul.mubr.msk.bf16.gmra.mrb[48].mxu1 %vm5010_vm4, %v15555_v39 }
 0x587   : > { %10671 = vmatprep.mubr.msk.bf16.mxu1 %vm5010_vm4, %v15556_v8 }
 0x58e   : > { %10672 = vmatmul.mubr.msk.bf16.gmra.mrb[52].mxu1 %vm5010_vm4, %v15557_v43 }
 0x58f   : > { %10675 = vmatprep.mubr.msk.bf16.mxu1 %vm5010_vm4, %v15558_v33 }
 0x596   : > { %10676 = vmatmul.mubr.msk.bf16.gmra.mrb[56].mxu1 %vm5010_vm4, %v15559_v26 }
 0x597   : > { %10679 = vmatprep.mubr.msk.bf16.mxu1 %vm5010_vm4, %v15560_v56 }
 0x59e   : > { %10680 = vmatmul.mubr.msk.bf16.gmra.mrb[60].mxu1 %vm5010_vm4, %v15561_v19 }
 0x59f   : > { %10683 = vmatprep.mubr.msk.bf16.mxu1 %vm5010_vm4, %v15562_v25 }
 0x5a6   : > { %10684 = vmatmul.mubr.msk.bf16.gmra.mrb[64].mxu1 %vm5010_vm4, %v15563_v6 }
 0x5a7   : > { %10687 = vmatprep.mubr.msk.bf16.mxu1 %vm5010_vm4, %v15564_v54 }
 0x5ae   : > { %10688 = vmatmul.mubr.msk.bf16.gmra.mrb[68].mxu1 %vm5010_vm4, %v15565_v16 }
 0x5af   : > { %10691 = vmatprep.mubr.msk.bf16.mxu1 %vm5010_vm4, %v15566_v27 }
 0x5b6   : > { %10692 = vmatmul.mubr.msk.bf16.gmra.mrb[72].mxu1 %vm5010_vm4, %v15567_v41 }
 0x5b7   : > { %10695 = vmatprep.mubr.msk.bf16.mxu1 %vm5010_vm4, %v14175_v51 }
 0x5be   : > { %10696 = vmatmul.mubr.msk.bf16.gmra.mrb[76].mxu1 %vm5010_vm4, %v15568_v21 }
 0x5bf   : > { %10699 = vmatprep.mubr.msk.bf16.mxu1 %vm5010_vm4, %v14241_v9 }
 0x5c6   : > { %10700 = vmatmul.mubr.msk.bf16.gmra.mrb[80].mxu1 %vm5010_vm4, %v14221_v46 }
 0x5c7   : > { %10707 = vmatprep.mubr.msk.bf16.mxu1 %vm5010_vm4, %v6430_v10  ;;  %v6450_v10 = vrot.slane %v6448_v59, 1  ;;  %v6447_v59 = vor.u32 %v6445_v60, %v6443_v42  ;;  %v6461_v60 = vor.u32 %v6459_v15, %v6457_v3  ;;  %v6492_v15 = vrot.slane %v6490_v17, 1 }
 0x5c9   : > { %v6454_v23 = vor.u32 %v6452_v50, %v6450_v10  ;;  %v6466_v50 = vshrl.u32 %v13918_v30, 16 }
 0x5cb   : > { %v6458_v55 = vsel %vm371_vm1, %v6454_v23, %v6457_v3 }
 0x5ce   : > { %10708 = vmatmul.mubr.msk.bf16.vlgmr.msra.gmra.mrb[36].mxu1 %vm5010_vm4, %v6437_v53  ;;  %v6464_v53 = vrot.slane %v6462_v37, 1 }
 0x5cf   : > { %10756 = vmatpush3.bf16.msra.mxu1 %v11828_v0  ;;  %10711 = vmatprep.mubr.msk.bf16.mxu1 %vm5010_vm4, %v6444_v49  ;;  %v6451_v0 = vsel %vm371_vm1, %v6447_v59, %v6450_v10  ;;  %v6469_v49 = vshll.u32 %v15555_v39, 16  ;;  %v6483_v59 = vshll.u32 %v15557_v43, 16 }
 0x5d0   : > { %10757 = vmatprep.subr.bf16.mxu1 %v11829_v14  ;;  %v6468_v20 = vor.u32 %v6466_v50, %v6464_v53  ;;  %v6465_v10 = vsel %vm371_vm1, %v6461_v60, %v6464_v53  ;;  %v6494_v60 = vshrl.u32 %v15558_v33, 16 }
 0x5d1   : > { %v6471_v42 = vrot.slane %v6469_v49, 1  ;;  %v6485_v49 = vrot.slane %v6483_v59, 1 }
 0x5d3   : > { %10758 = vmatpush3.bf16.msra.mxu1 %v11829_v14  ;;  %v6476_v14 = vshll.u32 %v15556_v8, 16  ;;  %v6472_v23 = vsel %vm371_vm1, %v6468_v20, %v6471_v42 }
 0x5d4   : > { %10807 = vmatprep.subr.bf16.mxu1 %v14523_v22 }
 0x5d5   : > { %v6478_v37 = vrot.slane %v6476_v14, 1  ;;  %v6497_v14 = vshll.u32 %v15559_v26, 16 }
 0x5d6   : > { %10712 = vmatmul.mubr.msk.bf16.gmra.mrb[40].mxu1 %vm5010_vm4, %v6451_v0  ;;  %v6480_v0 = vshrl.u32 %v15556_v8, 16 }
 0x5d7   : > { %10715 = vmatprep.mubr.msk.bf16.mxu1 %vm5010_vm4, %v6458_v55  ;;  %v6473_v55 = vshrl.u32 %v15555_v39, 16  ;;  %v6499_v59 = vrot.slane %v6497_v14, 1 }
 0x5d8   : > { %v6482_v50 = vor.u32 %v6480_v0, %v6478_v37  ;;  %v6504_v0 = vshll.u32 %v15560_v56, 16 }
 0x5d9   : > { %v6475_v3 = vor.u32 %v6473_v55, %v6471_v42 }
 0x5da   : > { %v6486_v20 = vsel %vm371_vm1, %v6482_v50, %v6485_v49  ;;  %v6506_v17 = vrot.slane %v6504_v0, 1  ;;  %v6511_v50 = vshll.u32 %v15561_v19, 16  ;;  %v6525_v0 = vshll.u32 %v15563_v6, 16 }
 0x5db   : > { %v6479_v53 = vsel %vm371_vm1, %v6475_v3, %v6478_v37  ;;  %v6508_v3 = vshrl.u32 %v15560_v56, 16 }
 0x5dc   : > { %v6513_v14 = vrot.slane %v6511_v50, 1  ;;  %v6527_v50 = vrot.slane %v6525_v0, 1 }
 0x5de   : > { %10716 = vmatmul.mubr.msk.bf16.gmra.mrb[44].mxu1 %vm5010_vm4, %v6465_v10  ;;  %v6487_v10 = vshrl.u32 %v15557_v43, 16 }
 0x5df   : > { %10719 = vmatprep.mubr.msk.bf16.mxu1 %vm5010_vm4, %v6472_v23  ;;  %v6496_v23 = vor.u32 %v6494_v60, %v6492_v15  ;;  %v6518_v60 = vshll.u32 %v15562_v25, 16 }
 0x5e0   : > { %v6489_v42 = vor.u32 %v6487_v10, %v6485_v49 }
 0x5e1   : > { %v6500_v55 = vsel %vm371_vm1, %v6496_v23, %v6499_v59  ;;  %v6520_v23 = vrot.slane %v6518_v60, 1  ;;  %v6539_v60 = vshll.u32 %v15565_v16, 16 }
 0x5e2   : > { %v6493_v37 = vsel %vm371_vm1, %v6489_v42, %v6492_v15  ;;  %v6522_v42 = vshrl.u32 %v15562_v25, 16 }
 0x5e3   : > { %v6541_v0 = vrot.slane %v6539_v60, 1 }
 0x5e6   : > { %10720 = vmatmul.mubr.msk.bf16.gmra.mrb[48].mxu1 %vm5010_vm4, %v6479_v53  ;;  %v6501_v53 = vshrl.u32 %v15559_v26, 16 }
 0x5e7   : > { %10723 = vmatprep.mubr.msk.bf16.mxu1 %vm5010_vm4, %v6486_v20  ;;  %v6510_v20 = vor.u32 %v6508_v3, %v6506_v17  ;;  %v6532_v3 = vshll.u32 %v15564_v54, 16 }
 0x5e8   : > { %v6503_v49 = vor.u32 %v6501_v53, %v6499_v59 }
 0x5e9   : > { %v6514_v10 = vsel %vm371_vm1, %v6510_v20, %v6513_v14  ;;  %v6534_v20 = vrot.slane %v6532_v3, 1  ;;  %v6553_v3 = vshll.u32 %v15567_v41, 16 }
 0x5ea   : > { %v6507_v15 = vsel %vm371_vm1, %v6503_v49, %v6506_v17  ;;  %v6536_v49 = vshrl.u32 %v15564_v54, 16 }
 0x5eb   : > { %v6555_v60 = vrot.slane %v6553_v3, 1 }
 0x5ee   : > { %10724 = vmatmul.mubr.msk.bf16.gmra.mrb[52].mxu1 %vm5010_vm4, %v6493_v37  ;;  %v6515_v37 = vshrl.u32 %v15561_v19, 16 }
 0x5ef   : > { %10727 = vmatprep.mubr.msk.bf16.mxu1 %vm5010_vm4, %v6500_v55  ;;  %v6524_v55 = vor.u32 %v6522_v42, %v6520_v23  ;;  %v6546_v42 = vshll.u32 %v15566_v27, 16 }
 0x5f0   : > { %v6517_v59 = vor.u32 %v6515_v37, %v6513_v14 }
 0x5f1   : > { %v6528_v53 = vsel %vm371_vm1, %v6524_v55, %v6527_v50  ;;  %v6548_v55 = vrot.slane %v6546_v42, 1  ;;  %v6567_v42 = vshll.u32 %v15568_v21, 16 }
 0x5f2   : > { %v6521_v17 = vsel %vm371_vm1, %v6517_v59, %v6520_v23  ;;  %v6550_v59 = vshrl.u32 %v15566_v27, 16 }
 0x5f3   : > { %v6569_v3 = vrot.slane %v6567_v42, 1 }
 0x5f6   : > { %10728 = vmatmul.mubr.msk.bf16.gmra.mrb[56].mxu1 %vm5010_vm4, %v6507_v15  ;;  %v6529_v15 = vshrl.u32 %v15563_v6, 16 }
 0x5f7   : > { %10731 = vmatprep.mubr.msk.bf16.mxu1 %vm5010_vm4, %v6514_v10  ;;  %v6538_v10 = vor.u32 %v6536_v49, %v6534_v20  ;;  %v6560_v49 = vshll.u32 %v14175_v51, 16 }
 0x5f8   : > { %v6531_v14 = vor.u32 %v6529_v15, %v6527_v50 }
 0x5f9   : > { %v6542_v37 = vsel %vm371_vm1, %v6538_v10, %v6541_v0  ;;  %v6562_v10 = vrot.slane %v6560_v49, 1  ;;  %v6581_v49 = vshll.u32 %v14221_v46, 16 }
 0x5fa   : > { %v6535_v23 = vsel %vm371_vm1, %v6531_v14, %v6534_v20  ;;  %v6564_v14 = vshrl.u32 %v14175_v51, 16 }
 0x5fb   : > { %v6583_v42 = vrot.slane %v6581_v49, 1  ;;  %v6983_v49 = vrot.slane %v13845_v5, 1  ;;  %v14628_v5 = vld [vmem:[%s15081_s4 + $0x70] sm:$0xff]  }
 0x5fe   : > { %10732 = vmatmul.mubr.msk.bf16.gmra.mrb[60].mxu1 %vm5010_vm4, %v6521_v17  ;;  %v6543_v17 = vshrl.u32 %v15565_v16, 16 }
 0x5ff   : > { %10735 = vmatprep.mubr.msk.bf16.mxu1 %vm5010_vm4, %v6528_v53  ;;  %v6552_v53 = vor.u32 %v6550_v59, %v6548_v55  ;;  %v6574_v59 = vshll.u32 %v14241_v9, 16 }
 0x600   : > { %v6545_v50 = vor.u32 %v6543_v17, %v6541_v0 }
 0x601   : > { %v6556_v15 = vsel %vm371_vm1, %v6552_v53, %v6555_v60  ;;  %v6576_v53 = vrot.slane %v6574_v59, 1 }
 0x602   : > { %v6549_v20 = vsel %vm371_vm1, %v6545_v50, %v6548_v55  ;;  %v6578_v50 = vshrl.u32 %v14241_v9, 16 }
 0x606   : > { %10736 = vmatmul.mubr.msk.bf16.gmra.mrb[64].mxu1 %vm5010_vm4, %v6535_v23  ;;  %v6557_v23 = vshrl.u32 %v15567_v41, 16 }
 0x607   : > { %10739 = vmatprep.mubr.msk.bf16.mxu1 %vm5010_vm4, %v6542_v37  ;;  %v6566_v37 = vor.u32 %v6564_v14, %v6562_v10 }
 0x608   : > { %v6559_v0 = vor.u32 %v6557_v23, %v6555_v60  ;;  %v14601_v60 = vpack.c.bf16 %v14204_v57, %v14204_v57  ;;  %v6980_v57 = vrot.slane %v13816_v24, 1 }
 0x609   : > { %v6570_v17 = vsel %vm371_vm1, %v6566_v37, %v6569_v3  ;;  %v6585_v37 = vshrl.u32 %v14221_v46, 16 }
 0x60a   : > { %v6563_v55 = vsel %vm371_vm1, %v6559_v0, %v6562_v10  ;;  %v6589_v59 = vshll.u32 %v14601_v60, 16 }
 0x60b   : > { %v6587_v0 = vor.u32 %v6585_v37, %v6583_v42  ;;  %v6997_v37 = vrot.slane %v15557_v43, 1  ;;  %v7003_v43 = vrot.slane %v15560_v56, 1 }
 0x60e   : > { %10740 = vmatmul.mubr.msk.bf16.gmra.mrb[68].mxu1 %vm5010_vm4, %v6549_v20  ;;  %v6571_v20 = vshrl.u32 %v15568_v21, 16 }
 0x60f   : > { %10743 = vmatprep.mubr.msk.bf16.mxu1 %vm5010_vm4, %v6556_v15  ;;  %v6580_v15 = vor.u32 %v6578_v50, %v6576_v53  ;;  %v6985_v50 = vrot.slane %v13859_v48, 1  ;;  %v6987_v48 = vrot.slane %v13884_v44, 1 }
 0x610   : > { %v6573_v10 = vor.u32 %v6571_v20, %v6569_v3  ;;  %v11831_v20 = vld [vmem:[%s15081_s4 + $0x68] sm:$0xff]  }
 0x611   : > { %v6584_v23 = vsel %vm371_vm1, %v6580_v15, %v6583_v42  ;;  %v6986_v24 = vsel %vm1286_vm3, %v6983_v49, %v6985_v50  ;;  %v6989_v15 = vrot.slane %v13897_v47, 1  ;;  %v6988_v42 = vsel %vm1286_vm3, %v6985_v50, %v6987_v48 }
 0x612   : > { %v6577_v14 = vsel %vm371_vm1, %v6573_v10, %v6576_v53  ;;  %v6991_v10 = vrot.slane %v13918_v30, 1  ;;  %v6995_v47 = vrot.slane %v15556_v8, 1 }
 0x614   : > { %v6998_v30 = vsel %vm1286_vm3, %v6995_v47, %v6997_v37 }
 0x616   : > { %10744 = vmatmul.mubr.msk.bf16.gmra.mrb[72].mxu1 %vm5010_vm4, %v6563_v55  ;;  %v6981_v55 = vrot.slane %v13824_v29, 1 }
 0x617   : > { %10747 = vmatprep.mubr.msk.bf16.mxu1 %vm5010_vm4, %v6570_v17  ;;  %v6591_v17 = vrot.slane %v6589_v59, 1 }
 0x618   : > { %v6982_v53 = vsel %vm1286_vm3, %v6980_v57, %v6981_v55  ;;  %v6984_v29 = vsel %vm1286_vm3, %v6981_v55, %v6983_v49  ;;  %v7013_v49 = vrot.slane %v15565_v16, 1  ;;  %v7019_v16 = vrot.slane %v14175_v51, 1 }
 0x619   : > { %v6592_v3 = vsel %vm371_vm1, %v6587_v0, %v6591_v17  ;;  %v7001_v0 = vrot.slane %v15559_v26, 1  ;;  %v7005_v17 = vrot.slane %v15561_v19, 1  ;;  %v7007_v26 = vrot.slane %v15562_v25, 1 }
 0x61a   : > { %v7011_v19 = vrot.slane %v15564_v54, 1 }
 0x61b   : > { %v7004_v57 = vsel %vm1286_vm3, %v7001_v0, %v7003_v43 }
 0x61c   : > { %v7014_v25 = vsel %vm1286_vm3, %v7011_v19, %v7013_v49 }
 0x61e   : > { %10748 = vmatmul.mubr.msk.bf16.gmra.mrb[76].mxu1 %vm5010_vm4, %v6577_v14  ;;  %v6993_v14 = vrot.slane %v15555_v39, 1  ;;  %v6999_v39 = vrot.slane %v15558_v33, 1  ;;  %v7006_v33 = vsel %vm1286_vm3, %v7003_v43, %v7005_v17  ;;  %v7698_v43 = vshrl.u32 %v14223_v28, 16 }
 0x61f   : > { %10751 = vmatprep.mubr.msk.bf16.mxu1 %vm5010_vm4, %v6584_v23  ;;  %v6992_v23 = vsel %vm1286_vm3, %v6989_v15, %v6991_v10 }
 0x620   : > { %v6994_v44 = vsel %vm1286_vm3, %v6991_v10, %v6993_v14  ;;  %v6996_v59 = vsel %vm1286_vm3, %v6993_v14, %v6995_v47  ;;  %v7000_v55 = vsel %vm1286_vm3, %v6997_v37, %v6999_v39  ;;  %v7002_v8 = vsel %vm1286_vm3, %v6999_v39, %v7001_v0  ;;  %v15589_v10 = vld [vmem:[#allocation44_spill] sm:$0xff] }
 0x621   : > { %v15592_v39 = vld [vmem:[#allocation60_spill] sm:$0xff] }
 0x626   : > { %10752 = vmatmul.mubr.msk.bf16.gmra.mrb[80].mxu1 %vm5010_vm4, %v6592_v3  ;;  %v7009_v3 = vrot.slane %v15563_v6, 1  ;;  %v7015_v6 = vrot.slane %v15566_v27, 1 }
 0x627   : > { %10759 = vmatprep.mubr.msk.bf16.mxu1 %vm5010_vm4, %v6982_v53  ;;  %v7008_v53 = vsel %vm1286_vm3, %v7005_v17, %v7007_v26 }
 0x628   : > { %v7010_v56 = vsel %vm1286_vm3, %v7007_v26, %v7009_v3  ;;  %v7012_v50 = vsel %vm1286_vm3, %v7009_v3, %v7011_v19 }
 0x62e   : > { %10760 = vmatmul.mubr.msk.bf16.vlgmr.msra.gmra.mrb[36].mxu1 %vm5010_vm4, %v6984_v29  ;;  %v7016_v29 = vsel %vm1286_vm3, %v7013_v49, %v7015_v6 }
 0x62f   : > { %10808 = vmatpush3.bf16.msra.mxu1 %v14523_v22  ;;  %10763 = vmatprep.mubr.msk.bf16.mxu1 %vm5010_vm4, %v6986_v24  ;;  %v6990_v22 = vsel %vm1286_vm3, %v6987_v48, %v6989_v15  ;;  %v7021_v24 = vrot.slane %v15568_v21, 1  ;;  %v7025_v15 = vrot.slane %v14221_v46, 1  ;;  %v7027_v21 = vrot.slane %v14601_v60, 1  ;;  %v11833_v46 = vld [vmem:[%s15081_s4 + $0x78] sm:$0xff]  }
 0x630   : > { %10809 = vmatprep.subr.bf16.mxu1 %v11831_v20  ;;  %v7694_v60 = vshll.u32 %v14223_v28, 16 }
 0x631   : > { %v7022_v27 = vsel %vm1286_vm3, %v7019_v16, %v7021_v24 }
 0x633   : > { %10810 = vmatpush3.bf16.msra.mxu1 %v11831_v20  ;;  %v7017_v20 = vrot.slane %v15567_v41, 1  ;;  %v7023_v41 = vrot.slane %v14241_v9, 1  ;;  %v11834_v9 = vld [vmem:[%s15081_s4 + $0x80] sm:$0xff]  }
 0x634   : > { %10859 = vmatprep.subr.bf16.mxu1 %v14628_v5 }
 0x635   : > { %v7018_v54 = vsel %vm1286_vm3, %v7015_v6, %v7017_v20  ;;  %v7020_v48 = vsel %vm1286_vm3, %v7017_v20, %v7019_v16  ;;  %v7026_v51 = vsel %vm1286_vm3, %v7023_v41, %v7025_v15  ;;  %v15595_v16 = vld [vmem:[#allocation6_spill] sm:$0xff] }
 0x636   : > { %10764 = vmatmul.mubr.msk.bf16.gmra.mrb[40].mxu1 %vm5010_vm4, %v6988_v42  ;;  %v7024_v42 = vsel %vm1286_vm3, %v7021_v24, %v7023_v41  ;;  %v15596_v24 = vld [vmem:[#allocation8_spill] sm:$0xff]  ;;  %v15599_v41 = vld [vmem:[#allocation21_spill] sm:$0xff] }
 0x637   : > { %10767 = vmatprep.mubr.msk.bf16.mxu1 %vm5010_vm4, %v6990_v22  ;;  %v7028_v22 = vsel %vm1286_vm3, %v7025_v15, %v7027_v21  ;;  %v15600_v15 = vld [vmem:[#allocation23_spill] sm:$0xff]  ;;  %v15603_v21 = vld [vmem:[#allocation42_spill] sm:$0xff] }
 0x63e   : > { %10768 = vmatmul.mubr.msk.bf16.gmra.mrb[44].mxu1 %vm5010_vm4, %v6992_v23  ;;  %v15590_v23 = vld [vmem:[#allocation51_spill] sm:$0xff] }
 0x63f   : > { %10771 = vmatprep.mubr.msk.bf16.mxu1 %vm5010_vm4, %v6994_v44  ;;  %v7696_v44 = vrot.slane %v7694_v60, 1 }
 0x641   : > { %v7697_v0 = vsel %vm371_vm1, %v15592_v39, %v7696_v44 }
 0x646   : > { %10772 = vmatmul.mubr.msk.bf16.gmra.mrb[48].mxu1 %vm5010_vm4, %v6996_v59  ;;  %v4711_v59 = vpop.permute.xlu0 %4710 }
 0x647   : > { %10775 = vmatprep.mubr.msk.bf16.mxu1 %vm5010_vm4, %v6998_v30  ;;  %v15591_v30 = vld [vmem:[#allocation59_spill] sm:$0xff] }
 0x64e   : > { %10776 = vmatmul.mubr.msk.bf16.gmra.mrb[52].mxu1 %vm5010_vm4, %v7000_v55 }
 0x64f   : > { %10779 = vmatprep.mubr.msk.bf16.mxu1 %vm5010_vm4, %v7002_v8 }
 0x656   : > { %10780 = vmatmul.mubr.msk.bf16.gmra.mrb[56].mxu1 %vm5010_vm4, %v7004_v57  ;;  %v7700_v57 = vor.u32 %v7698_v43, %v7696_v44 }
 0x657   : > { %10783 = vmatprep.mubr.msk.bf16.mxu1 %vm5010_vm4, %v7006_v33 }
 0x65e   : > { %10784 = vmatmul.mubr.msk.bf16.gmra.mrb[60].mxu1 %vm5010_vm4, %v7008_v53 }
 0x65f   : > { %10787 = vmatprep.mubr.msk.bf16.mxu1 %vm5010_vm4, %v7010_v56 }
 0x666   : > { %10788 = vmatmul.mubr.msk.bf16.gmra.mrb[64].mxu1 %vm5010_vm4, %v7012_v50 }
 0x667   : > { %10791 = vmatprep.mubr.msk.bf16.mxu1 %vm5010_vm4, %v7014_v25 }
 0x66e   : > { %10792 = vmatmul.mubr.msk.bf16.gmra.mrb[68].mxu1 %vm5010_vm4, %v7016_v29  ;;  %v15593_v29 = vld [vmem:[#allocation66_spill] sm:$0xff] }
 0x66f   : > { %10795 = vmatprep.mubr.msk.bf16.mxu1 %vm5010_vm4, %v7018_v54  ;;  %v15594_v54 = vld [vmem:[#allocation5_spill] sm:$0xff] }
 0x676   : > { %10796 = vmatmul.mubr.msk.bf16.gmra.mrb[72].mxu1 %vm5010_vm4, %v7020_v48  ;;  %v15597_v48 = vld [vmem:[#allocation7_spill] sm:$0xff] }
 0x677   : > { %10799 = vmatprep.mubr.msk.bf16.mxu1 %vm5010_vm4, %v7022_v27  ;;  %v15598_v27 = vld [vmem:[#allocation13_spill] sm:$0xff] }
 0x67e   : > { %10800 = vmatmul.mubr.msk.bf16.gmra.mrb[76].mxu1 %vm5010_vm4, %v7024_v42  ;;  %v15601_v42 = vld [vmem:[#allocation30_spill] sm:$0xff] }
 0x67f   : > { %10803 = vmatprep.mubr.msk.bf16.mxu1 %vm5010_vm4, %v7026_v51  ;;  %v15602_v51 = vld [vmem:[#allocation34_spill] sm:$0xff] }
 0x686   : > { %10804 = vmatmul.mubr.msk.bf16.gmra.mrb[80].mxu1 %vm5010_vm4, %v7028_v22  ;;  %v15604_v22 = vld [vmem:[#allocation18_spill] sm:$0xff] }
 0x687   : > { %10811 = vmatprep.mubr.msk.bf16.mxu1 %vm5010_vm4, %v13819_v1  ;;  %v15569_v1 = vld [vmem:[#allocation52_spill] sm:$0xff] }
 0x688   : > { %v7701_v37 = vshll.u32 %v15569_v1, 16  ;;  %v7705_v33 = vshrl.u32 %v15569_v1, 16 }
 0x68a   : > { %v7703_v17 = vrot.slane %v7701_v37, 1  ;;  %v14878_v37 = vld [vmem:[%s15082_s5] ss:$0 sm:$0xff] }
 0x68c   : > { %v7707_v53 = vor.u32 %v7705_v33, %v7703_v17  ;;  %v7704_v56 = vsel %vm371_vm1, %v7700_v57, %v7703_v17 }
 0x68e   : > { %10812 = vmatmul.mubr.msk.bf16.vlgmr.msra.gmra.mrb[36].mxu1 %vm5010_vm4, %v13857_v32  ;;  %v15571_v32 = vld [vmem:[#allocation9_spill] sm:$0xff] }
 0x68f   : > { %10860 = vmatpush3.bf16.msra.mxu1 %v14628_v5  ;;  %10815 = vmatprep.mubr.msk.bf16.mxu1 %vm5010_vm4, %v13851_v7  ;;  %v15570_v7 = vld [vmem:[#allocation65_spill] sm:$0xff]  ;;  %v11836_v5 = vld [vmem:[%s15079_s2] ss:$0 sm:$0xff] }
 0x690   : > { %10861 = vmatprep.subr.bf16.mxu1 %v11833_v46  ;;  %v4327_v14 = vadd.f32 %v11836_v5, %v15589_v10  ;;  %v7708_v55 = vshll.u32 %v15570_v7, 16  ;;  %v7712_v50 = vshrl.u32 %v15570_v7, 16 }
 0x692   : > { %v4382_v47 = vmax.f32 %v4327_v14, 0.0  ;;  %v7710_v26 = vrot.slane %v7708_v55, 1 }
 0x693   : > { %10862 = vmatpush3.bf16.msra.mxu1 %v11833_v46  ;;  %v15605_v46 = vld [vmem:[#allocation22_spill] sm:$0xff] }
 0x694   : > { %10911 = vmatprep.subr.bf16.mxu1 %v11834_v9  ;;  %v4767_v8 = vmul.f32 %v4711_v59, %v4382_v47  ;;  %v7711_v19 = vsel %vm371_vm1, %v7707_v53, %v7710_v26  ;;  %v7714_v25 = vor.u32 %v7712_v50, %v7710_v26 }
 0x696   : > { %10816 = vmatmul.mubr.msk.bf16.gmra.mrb[40].mxu1 %vm5010_vm4, %v13895_v58  ;;  %v15572_v58 = vld [vmem:[#allocation10_spill] sm:$0xff]  ;;  %v7688_v3 = vpack.c.bf16 %v4767_v8, %v4767_v8 }
 0x697   : > { %10819 = vmatprep.mubr.msk.bf16.mxu1 %vm5010_vm4, %v13890_v63  ;;  %v11835_v63 = vld [vmem:[%s15081_s4 + $0x88] sm:$0xff]  }
 0x698   : > { %v7716_v49 = vshll.u32 %v7688_v3, 16 }
 0x69a   : > { %v7718_v6 = vrot.slane %v7716_v49, 1 }
 0x69c   : > { %v7719_v20 = vsel %vm371_vm1, %v7714_v25, %v7718_v6 }
 0x69e   : > { %10820 = vmatmul.mubr.msk.bf16.gmra.mrb[44].mxu1 %vm5010_vm4, %v13929_v12  ;;  %v15574_v12 = vld [vmem:[#allocation14_spill] sm:$0xff] }
 0x69f   : > { %10823 = vmatprep.mubr.msk.bf16.mxu1 %vm5010_vm4, %v13924_v62  ;;  %v15573_v62 = vld [vmem:[#allocation11_spill] sm:$0xff] }
 0x6a6   : > { %10824 = vmatmul.mubr.msk.bf16.gmra.mrb[48].mxu1 %vm5010_vm4, %v13979_v34  ;;  %v15576_v34 = vld [vmem:[#allocation17_spill] sm:$0xff] }
 0x6a7   : > { %10827 = vmatprep.mubr.msk.bf16.mxu1 %vm5010_vm4, %v13973_v13  ;;  %v15575_v13 = vld [vmem:[#allocation15_spill] sm:$0xff] }
 0x6ae   : > { %10828 = vmatmul.mubr.msk.bf16.gmra.mrb[52].mxu1 %vm5010_vm4, %v14013_v4  ;;  %v15578_v4 = vld [vmem:[#allocation32_spill] sm:$0xff] }
 0x6af   : > { %10831 = vmatprep.mubr.msk.bf16.mxu1 %vm5010_vm4, %v14007_v18  ;;  %v15577_v18 = vld [vmem:[#allocation26_spill] sm:$0xff] }
 0x6b6   : > { %10832 = vmatmul.mubr.msk.bf16.gmra.mrb[56].mxu1 %vm5010_vm4, %v14053_v35  ;;  %v15580_v35 = vld [vmem:[#allocation40_spill] sm:$0xff] }
 0x6b7   : > { %10835 = vmatprep.mubr.msk.bf16.mxu1 %vm5010_vm4, %v14047_v40  ;;  %v15579_v40 = vld [vmem:[#allocation37_spill] sm:$0xff] }
 0x6be   : > { %10836 = vmatmul.mubr.msk.bf16.gmra.mrb[60].mxu1 %vm5010_vm4, %v14091_v11  ;;  %v15582_v11 = vld [vmem:[#allocation49_spill] sm:$0xff] }
 0x6bf   : > { %10839 = vmatprep.mubr.msk.bf16.mxu1 %vm5010_vm4, %v14085_v2  ;;  %v15581_v2 = vld [vmem:[#allocation46_spill] sm:$0xff] }
 0x6c6   : > { %10840 = vmatmul.mubr.msk.bf16.gmra.mrb[64].mxu1 %vm5010_vm4, %v14124_v36  ;;  %v15584_v36 = vld [vmem:[#allocation57_spill] sm:$0xff] }
 0x6c7   : > { %10843 = vmatprep.mubr.msk.bf16.mxu1 %vm5010_vm4, %v14118_v45  ;;  %v15583_v45 = vld [vmem:[#allocation54_spill] sm:$0xff] }
 0x6ce   : > { %10844 = vmatmul.mubr.msk.bf16.gmra.mrb[68].mxu1 %vm5010_vm4, %v14156_v61  ;;  %v15586_v61 = vld [vmem:[#allocation25_spill] sm:$0xff] }
 0x6cf   : > { %10847 = vmatprep.mubr.msk.bf16.mxu1 %vm5010_vm4, %v14150_v31  ;;  %v15585_v31 = vld [vmem:[#allocation62_spill] sm:$0xff] }
 0x6d6   : > { %10848 = vmatmul.mubr.msk.bf16.gmra.mrb[72].mxu1 %vm5010_vm4, %v14188_v52  ;;  %v15588_v52 = vld [vmem:[#allocation43_spill] sm:$0xff] }
 0x6d7   : > { %10851 = vmatprep.mubr.msk.bf16.mxu1 %vm5010_vm4, %v14182_v38  ;;  %v15587_v38 = vld [vmem:[#allocation31_spill] sm:$0xff] }
 0x6de   : > { %10852 = vmatmul.mubr.msk.bf16.gmra.mrb[76].mxu1 %vm5010_vm4, %v14223_v28 }
 0x6df   : > { %10855 = vmatprep.mubr.msk.bf16.mxu1 %vm5010_vm4, %v15569_v1 }
 0x6e6   : > { %10856 = vmatmul.mubr.msk.bf16.gmra.mrb[80].mxu1 %vm5010_vm4, %v15570_v7 }
 0x6e7   : > { %10863 = vmatprep.mubr.msk.bf16.mxu1 %vm5010_vm4, %v15571_v32  ;;  %v15607_v32 = vld [vmem:[#allocation28_spill] sm:$0xff] }
 0x6ee   : > { %10864 = vmatmul.mubr.msk.bf16.vlgmr.msra.gmra.mrb[36].mxu1 %vm5010_vm4, %v15572_v58  ;;  %v15609_v58 = vld [vmem:[#allocation36_spill] sm:$0xff] }
 0x6ef   : > { %10912 = vmatpush3.bf16.msra.mxu1 %v11834_v9  ;;  %10867 = vmatprep.mubr.msk.bf16.mxu1 %vm5010_vm4, %v15573_v62  ;;  %v15606_v9 = vld [vmem:[#allocation24_spill] sm:$0xff]  ;;  %v15610_v62 = vld [vmem:[#allocation39_spill] sm:$0xff] }
 0x6f0   : > { %10913 = vmatprep.subr.bf16.mxu1 %v11835_v63 }
 0x6f3   : > { %10914 = vmatpush3.bf16.msra.mxu1 %v11835_v63  ;;  %v15608_v63 = vld [vmem:[#allocation29_spill] sm:$0xff] }
 0x6f6   : > { %10868 = vmatmul.mubr.msk.bf16.gmra.mrb[40].mxu1 %vm5010_vm4, %v15574_v12  ;;  %v15611_v12 = vld [vmem:[#allocation48_spill] sm:$0xff] }
 0x6f7   : > { %10871 = vmatprep.mubr.msk.bf16.mxu1 %vm5010_vm4, %v15575_v13  ;;  %v8026_v13 = vrot.slane %v14223_v28, 1  ;;  %v8032_v28 = vrot.slane %v7688_v3, 1 }
 0x6fe   : > { %10872 = vmatmul.mubr.msk.bf16.gmra.mrb[44].mxu1 %vm5010_vm4, %v15576_v34  ;;  %v15612_v34 = vld [vmem:[#allocation53_spill] sm:$0xff] }
 0x6ff   : > { %10875 = vmatprep.mubr.msk.bf16.mxu1 %vm5010_vm4, %v15577_v18  ;;  %v15613_v18 = vld [vmem:[#allocation45_spill] sm:$0xff] }
 0x706   : > { %10876 = vmatmul.mubr.msk.bf16.gmra.mrb[48].mxu1 %vm5010_vm4, %v15578_v4  ;;  %v8027_v4 = vsel %vm1286_vm3, %v15613_v18, %v8026_v13 }
 0x707   : > { %10879 = vmatprep.mubr.msk.bf16.mxu1 %vm5010_vm4, %v15579_v40  ;;  %v8028_v40 = vrot.slane %v15569_v1, 1 }
 0x70e   : > { %10880 = vmatmul.mubr.msk.bf16.gmra.mrb[52].mxu1 %vm5010_vm4, %v15580_v35  ;;  %v8030_v35 = vrot.slane %v15570_v7, 1 }
 0x70f   : > { %10883 = vmatprep.mubr.msk.bf16.mxu1 %vm5010_vm4, %v15581_v2  ;;  %v8029_v2 = vsel %vm1286_vm3, %v8026_v13, %v8028_v40 }
 0x716   : > { %10884 = vmatmul.mubr.msk.bf16.gmra.mrb[56].mxu1 %vm5010_vm4, %v15582_v11  ;;  %v8031_v11 = vsel %vm1286_vm3, %v8028_v40, %v8030_v35 }
 0x717   : > { %10887 = vmatprep.mubr.msk.bf16.mxu1 %vm5010_vm4, %v15583_v45  ;;  %v8033_v45 = vsel %vm1286_vm3, %v8030_v35, %v8032_v28 }
 0x71e   : > { %10888 = vmatmul.mubr.msk.bf16.gmra.mrb[60].mxu1 %vm5010_vm4, %v15584_v36  ;;  %v8485_v36 = vpop.permute.xlu1 %8484 }
 0x71f   : > { %10891 = vmatprep.mubr.msk.bf16.mxu1 %vm5010_vm4, %v15585_v31  ;;  %v8490_v31 = vpop.permute.xlu0 %8489 }
 0x726   : > { %10892 = vmatmul.mubr.msk.bf16.gmra.mrb[64].mxu1 %vm5010_vm4, %v15586_v61  ;;  %v8495_v61 = vpop.permute.xlu1 %8494 }
 0x727   : > { %10895 = vmatprep.mubr.msk.bf16.mxu1 %vm5010_vm4, %v15587_v38  ;;  %v8500_v38 = vpop.permute.xlu0 %8499 }
 0x72a   : > { %v8505_v1 = vpop.permute.xlu1 %8504 }
 0x72e   : > { %10896 = vmatmul.mubr.msk.bf16.gmra.mrb[68].mxu1 %vm5010_vm4, %v15588_v52  ;;  %v8510_v52 = vpop.permute.xlu0 %8509  ;;  %v8515_v7 = vpop.permute.xlu1 %8514 }
 0x72f   : > { %10899 = vmatprep.mubr.msk.bf16.mxu1 %vm5010_vm4, %v15590_v23 }
 0x732   : > { %v8520_v60 = vpop.permute.xlu0 %8519  ;;  %v14863_v5 = vpop.permute.xlu1 %8524 }
 0x736   : > { %10900 = vmatmul.mubr.msk.bf16.gmra.mrb[72].mxu1 %vm5010_vm4, %v15591_v30  ;;  %v14865_v10 = vpop.permute.xlu0 %8529  ;;  %v14867_v14 = vpop.permute.xlu1 %8534 }
 0x737   : > { %10903 = vmatprep.mubr.msk.bf16.mxu1 %vm5010_vm4, %v7697_v0 }
 0x73a   : > { %v14869_v23 = vpop.permute.xlu0 %8539  ;;  %v14871_v44 = vpop.permute.xlu1 %8544 }
 0x73e   : > { %10904 = vmatmul.mubr.msk.bf16.gmra.mrb[76].mxu1 %vm5010_vm4, %v7704_v56  ;;  %v14873_v47 = vpop.permute.xlu0 %8549  ;;  %v14880_v59 = vpop.permute.xlu1 %8554 }
 0x73f   : > { %10907 = vmatprep.mubr.msk.bf16.mxu1 %vm5010_vm4, %v7711_v19 }
 0x742   : > { %v14882_v39 = vpop.permute.xlu0 %8559  ;;  %v14888_v53 = vpop.permute.xlu1 %8564 }
 0x746   : > { %10908 = vmatmul.mubr.msk.bf16.gmra.mrb[80].mxu1 %vm5010_vm4, %v7719_v20  ;;  %v14890_v50 = vpop.permute.xlu0 %8569 }
 0x747   : > { %10915 = vmatprep.mubr.msk.bf16.mxu1 %vm5010_vm4, %v15593_v29 }
 0x74e   : > { %10916 = vmatmul.mubr.msk.bf16.vlgmr.msra.gmra.mrb[36].mxu1 %vm5010_vm4, %v15594_v54 }
 0x74f   : > { %10919 = vmatprep.mubr.msk.bf16.mxu1 %vm5010_vm4, %v15595_v16 }
 0x756   : > { %10920 = vmatmul.mubr.msk.bf16.gmra.mrb[40].mxu1 %vm5010_vm4, %v15596_v24 }
 0x757   : > { %10923 = vmatprep.mubr.msk.bf16.mxu1 %vm5010_vm4, %v15597_v48 }
 0x75e   : > { %10924 = vmatmul.mubr.msk.bf16.gmra.mrb[44].mxu1 %vm5010_vm4, %v15598_v27 }
 0x75f   : > { %10927 = vmatprep.mubr.msk.bf16.mxu1 %vm5010_vm4, %v15599_v41 }
 0x766   : > { %10928 = vmatmul.mubr.msk.bf16.gmra.mrb[48].mxu1 %vm5010_vm4, %v15600_v15  ;;  %v14896_v15 = vpop.permute.xlu1 %8574 }
 0x767   : > { %10931 = vmatprep.mubr.msk.bf16.mxu1 %vm5010_vm4, %v15601_v42 }
 0x76e   : > { %10932 = vmatmul.mubr.msk.bf16.gmra.mrb[52].mxu1 %vm5010_vm4, %v15602_v51 }
 0x76f   : > { %10935 = vmatprep.mubr.msk.bf16.mxu1 %vm5010_vm4, %v15603_v21 }
 0x776   : > { %10936 = vmatmul.mubr.msk.bf16.gmra.mrb[56].mxu1 %vm5010_vm4, %v15604_v22 }
 0x777   : > { %10939 = vmatprep.mubr.msk.bf16.mxu1 %vm5010_vm4, %v15605_v46 }
 0x77e   : > { %10940 = vmatmul.mubr.msk.bf16.gmra.mrb[60].mxu1 %vm5010_vm4, %v15606_v9 }
 0x77f   : > { %10943 = vmatprep.mubr.msk.bf16.mxu1 %vm5010_vm4, %v15607_v32 }
 0x786   : > { %10944 = vmatmul.mubr.msk.bf16.gmra.mrb[64].mxu1 %vm5010_vm4, %v15608_v63  ;;  %v14901_v63 = vpop.permute.xlu0 %8579 }
 0x787   : > { %10947 = vmatprep.mubr.msk.bf16.mxu1 %vm5010_vm4, %v15609_v58 }
 0x78e   : > { %10948 = vmatmul.mubr.msk.bf16.gmra.mrb[68].mxu1 %vm5010_vm4, %v15610_v62 }
 0x78f   : > { %10951 = vmatprep.mubr.msk.bf16.mxu1 %vm5010_vm4, %v15611_v12 }
 0x796   : > { %10952 = vmatmul.mubr.msk.bf16.gmra.mrb[72].mxu1 %vm5010_vm4, %v15612_v34 }
 0x797   : > { %10955 = vmatprep.mubr.msk.bf16.mxu1 %vm5010_vm4, %v8027_v4 }
 0x79e   : > { %10956 = vmatmul.mubr.msk.bf16.gmra.mrb[76].mxu1 %vm5010_vm4, %v8029_v2 }
 0x79f   : > { %10959 = vmatprep.mubr.msk.bf16.mxu1 %vm5010_vm4, %v8031_v11  ;;  %v14905_v11 = vpop.permute.xlu1 %8584 }
 0x7a6   : > { %10960 = vmatmul.mubr.msk.bf16.gmra.mrb[80].mxu1 %vm5010_vm4, %v8033_v45 }
 0x821   : > { %v10917_v30 = vpop.f32.mrb[36].mxu1 }
 0x822   : > { %v8340_v0 = vadd.f32 %v10917_v30, %v14878_v37  ;;  %v8092_v55 = vpop.f32.mrb[37].mxu1  ;;  %v14910_v30 = vpop.permute.xlu0 %8589 }
 0x823   : > { %v8338_v8 = vadd.f32 %v14878_v37, %v8092_v55  ;;  %v10918_v43 = vpop.f32.mrb[38].mxu1 }
 0x824   : > { %v8341_v17 = vadd.f32 %v10918_v43, %v14878_v37  ;;  %v8095_v57 = vpop.f32.mrb[39].mxu1  ;;  %v8388_v33 = vmax.f32 %v8340_v0, 0.0 }
 0x825   : > { %v8386_v26 = vmax.f32 %v8338_v8, 0.0  ;;  %v8339_v3 = vadd.f32 %v14878_v37, %v8095_v57 }
 0x826   : > { %v8389_v19 = vmax.f32 %v8341_v17, 0.0  ;;  %v8724_v25 = vmul.f32 %v8495_v61, %v8388_v33 }
 0x827   : > { %v8722_v56 = vmul.f32 %v8485_v36, %v8386_v26  ;;  %v8387_v49 = vmax.f32 %v8339_v3, 0.0 }
 0x828   : > { %v8725_v24 = vmul.f32 %v8500_v38, %v8389_v19  ;;  %v8774_v22 = vsel %vm8770_vm5, %v8724_v25, 0.0 }
 0x829   : > { %v8723_v6 = vmul.f32 %v8490_v31, %v8387_v49  ;;  %v10921_v20 = vpop.f32.mrb[40].mxu1  ;;  %v8771_v16 = vsel %vm8770_vm5, %v8722_v56, 0.0  ;;  %v14917_v56 = vpop.permute.xlu1 %8594 }
 0x82a   : > { %v8344_v29 = vadd.f32 %v10921_v20, %v14878_v37  ;;  %v8108_v54 = vpop.f32.mrb[41].mxu1  ;;  %v8776_v62 = vsel %vm8770_vm5, %v8725_v24, 0.0 }
 0x82b   : > { %v8772_v48 = vsel %vm8770_vm5, %v8723_v6, 0.0  ;;  %v8342_v27 = vadd.f32 %v14878_v37, %v8108_v54  ;;  %v10922_v41 = vpop.f32.mrb[42].mxu1 }
 0x82c   : > { %v8773_v42 = vadd.f32 %v8772_v48, %v8771_v16  ;;  %v8345_v51 = vadd.f32 %v10922_v41, %v14878_v37  ;;  %v8111_v21 = vpop.f32.mrb[43].mxu1  ;;  %v8392_v46 = vmax.f32 %v8344_v29, 0.0  ;;  %v14922_v29 = vpop.permute.xlu0 %8599 }
 0x82d   : > { %v8390_v9 = vmax.f32 %v8342_v27, 0.0  ;;  %v8343_v32 = vadd.f32 %v14878_v37, %v8111_v21 }
 0x82e   : > { %v8775_v58 = vadd.f32 %v8774_v22, %v8773_v42  ;;  %v8393_v13 = vmax.f32 %v8345_v51, 0.0  ;;  %v8728_v4 = vmul.f32 %v8515_v7, %v8392_v46 }
 0x82f   : > { %v8726_v12 = vmul.f32 %v8505_v1, %v8390_v9  ;;  %v8391_v34 = vmax.f32 %v8343_v32, 0.0  ;;  %v14931_v9 = vpop.permute.xlu1 %8604 }
 0x830   : > { %v8777_v18 = vadd.f32 %v8776_v62, %v8775_v58  ;;  %v8729_v31 = vmul.f32 %v8520_v60, %v8393_v13  ;;  %v14935_v13 = vpop.permute.xlu0 %8609 }
 0x831   : > { %v8778_v40 = vsel %vm8770_vm5, %v8726_v12, 0.0  ;;  %v8727_v35 = vmul.f32 %v8510_v52, %v8391_v34  ;;  %v10925_v2 = vpop.f32.mrb[44].mxu1  ;;  %v8782_v52 = vsel %vm8770_vm5, %v8728_v4, 0.0 }
 0x832   : > { %v8779_v28 = vadd.f32 %v8778_v40, %v8777_v18  ;;  %v8348_v45 = vadd.f32 %v10925_v2, %v14878_v37  ;;  %v8124_v36 = vpop.f32.mrb[45].mxu1  ;;  %v8784_v60 = vsel %vm8770_vm5, %v8729_v31, 0.0 }
 0x833   : > { %v8780_v61 = vsel %vm8770_vm5, %v8727_v35, 0.0  ;;  %v8346_v38 = vadd.f32 %v14878_v37, %v8124_v36  ;;  %v10926_v1 = vpop.f32.mrb[46].mxu1 }
 0x834   : > { %v8781_v0 = vadd.f32 %v8780_v61, %v8779_v28  ;;  %v8349_v7 = vadd.f32 %v10926_v1, %v14878_v37  ;;  %v8127_v55 = vpop.f32.mrb[47].mxu1  ;;  %v8396_v8 = vmax.f32 %v8348_v45, 0.0 }
 0x835   : > { %v8394_v43 = vmax.f32 %v8346_v38, 0.0  ;;  %v8347_v17 = vadd.f32 %v14878_v37, %v8127_v55  ;;  %v14944_v38 = vpop.permute.xlu1 %8614 }
 0x836   : > { %v8783_v57 = vadd.f32 %v8782_v52, %v8781_v0  ;;  %v8397_v26 = vmax.f32 %v8349_v7, 0.0  ;;  %v8732_v49 = vmul.f32 %v14867_v14, %v8396_v8  ;;  %v14949_v8 = vpop.permute.xlu0 %8619 }
 0x837   : > { %v8730_v33 = vmul.f32 %v14863_v5, %v8394_v43  ;;  %v8395_v3 = vmax.f32 %v8347_v17, 0.0 }
 0x838   : > { %v8785_v19 = vadd.f32 %v8784_v60, %v8783_v57  ;;  %v8733_v5 = vmul.f32 %v14869_v23, %v8397_v26 }
 0x839   : > { %v8786_v25 = vsel %vm8770_vm5, %v8730_v33, 0.0  ;;  %v8731_v6 = vmul.f32 %v14865_v10, %v8395_v3  ;;  %v10929_v20 = vpop.f32.mrb[48].mxu1  ;;  %v8790_v10 = vsel %vm8770_vm5, %v8732_v49, 0.0 }
 0x83a   : > { %v8787_v54 = vadd.f32 %v8786_v25, %v8785_v19  ;;  %v8352_v16 = vadd.f32 %v10929_v20, %v14878_v37  ;;  %v8140_v24 = vpop.f32.mrb[49].mxu1  ;;  %v8792_v23 = vsel %vm8770_vm5, %v8733_v5, 0.0  ;;  %v14956_v25 = vpop.permute.xlu1 %8624 }
 0x83b   : > { %v8788_v48 = vsel %vm8770_vm5, %v8731_v6, 0.0  ;;  %v8350_v27 = vadd.f32 %v14878_v37, %v8140_v24  ;;  %v10930_v41 = vpop.f32.mrb[50].mxu1 }
 0x83c   : > { %v8789_v42 = vadd.f32 %v8788_v48, %v8787_v54  ;;  %v8353_v14 = vadd.f32 %v10930_v41, %v14878_v37  ;;  %v8143_v51 = vpop.f32.mrb[51].mxu1  ;;  %v8400_v21 = vmax.f32 %v8352_v16, 0.0  ;;  %v14962_v48 = vpop.permute.xlu0 %8629 }
 0x83d   : > { %v8398_v22 = vmax.f32 %v8350_v27, 0.0  ;;  %v8351_v46 = vadd.f32 %v14878_v37, %v8143_v51 }
 0x83e   : > { %v8791_v32 = vadd.f32 %v8790_v10, %v8789_v42  ;;  %v8401_v62 = vmax.f32 %v8353_v14, 0.0  ;;  %v8736_v18 = vmul.f32 %v14880_v59, %v8400_v21 }
 0x83f   : > { %v8734_v58 = vmul.f32 %v14871_v44, %v8398_v22  ;;  %v8399_v12 = vmax.f32 %v8351_v46, 0.0 }
 0x840   : > { %v8793_v34 = vadd.f32 %v8792_v23, %v8791_v32  ;;  %v8737_v36 = vmul.f32 %v14882_v39, %v8401_v62  ;;  %v8635_v32 = vpop.permute.xlu1 %8634 }
 0x841   : > { %v8794_v4 = vsel %vm8770_vm5, %v8734_v58, 0.0  ;;  %v8735_v40 = vmul.f32 %v14873_v47, %v8399_v12  ;;  %v10933_v35 = vpop.f32.mrb[52].mxu1  ;;  %v8798_v47 = vsel %vm8770_vm5, %v8736_v18, 0.0  ;;  %v8640_v18 = vpop.permute.xlu0 %8639 }
 0x842   : > { %v8795_v2 = vadd.f32 %v8794_v4, %v8793_v34  ;;  %v8356_v28 = vadd.f32 %v10933_v35, %v14878_v37  ;;  %v8156_v45 = vpop.f32.mrb[53].mxu1  ;;  %v8800_v43 = vsel %vm8770_vm5, %v8737_v36, 0.0 }
 0x843   : > { %v8796_v44 = vsel %vm8770_vm5, %v8735_v40, 0.0  ;;  %v8354_v31 = vadd.f32 %v14878_v37, %v8156_v45  ;;  %v10934_v61 = vpop.f32.mrb[54].mxu1 }
 0x844   : > { %v8797_v1 = vadd.f32 %v8796_v44, %v8795_v2  ;;  %v8357_v59 = vadd.f32 %v10934_v61, %v14878_v37  ;;  %v8159_v0 = vpop.f32.mrb[55].mxu1  ;;  %v8404_v7 = vmax.f32 %v8356_v28, 0.0 }
 0x845   : > { %v8402_v55 = vmax.f32 %v8354_v31, 0.0  ;;  %v8355_v52 = vadd.f32 %v14878_v37, %v8159_v0 }
 0x846   : > { %v8799_v39 = vadd.f32 %v8798_v47, %v8797_v1  ;;  %v8405_v57 = vmax.f32 %v8357_v59, 0.0  ;;  %v8740_v26 = vmul.f32 %v14896_v15, %v8404_v7  ;;  %v8645_v59 = vpop.permute.xlu1 %8644 }
 0x847   : > { %v8738_v17 = vmul.f32 %v14888_v53, %v8402_v55  ;;  %v8403_v60 = vmax.f32 %v8355_v52, 0.0  ;;  %v8650_v52 = vpop.permute.xlu0 %8649 }
 0x848   : > { %v8801_v33 = vadd.f32 %v8800_v43, %v8799_v39  ;;  %v8741_v16 = vmul.f32 %v14901_v63, %v8405_v57  ;;  %v8806_v41 = vsel %vm8770_vm5, %v8740_v26, 0.0 }
 0x849   : > { %v8802_v3 = vsel %vm8770_vm5, %v8738_v17, 0.0  ;;  %v8739_v19 = vmul.f32 %v14890_v50, %v8403_v60  ;;  %v10937_v49 = vpop.f32.mrb[56].mxu1 }
 0x84a   : > { %v8803_v6 = vadd.f32 %v8802_v3, %v8801_v33  ;;  %v8360_v20 = vadd.f32 %v10937_v49, %v14878_v37  ;;  %v8172_v54 = vpop.f32.mrb[57].mxu1  ;;  %v8808_v63 = vsel %vm8770_vm5, %v8741_v16, 0.0 }
 0x84b   : > { %v8804_v53 = vsel %vm8770_vm5, %v8739_v19, 0.0  ;;  %v8358_v24 = vadd.f32 %v14878_v37, %v8172_v54  ;;  %v10938_v5 = vpop.f32.mrb[58].mxu1 }
 0x84c   : > { %v8805_v15 = vadd.f32 %v8804_v53, %v8803_v6  ;;  %v8361_v27 = vadd.f32 %v10938_v5, %v14878_v37  ;;  %v8175_v50 = vpop.f32.mrb[59].mxu1  ;;  %v8408_v42 = vmax.f32 %v8360_v20, 0.0  ;;  %v8655_v20 = vpop.permute.xlu1 %8654 }
 0x84d   : > { %v8406_v14 = vmax.f32 %v8358_v24, 0.0  ;;  %v8359_v51 = vadd.f32 %v14878_v37, %v8175_v50 }
 0x84e   : > { %v8807_v10 = vadd.f32 %v8806_v41, %v8805_v15  ;;  %v8409_v22 = vmax.f32 %v8361_v27, 0.0  ;;  %v8744_v58 = vmul.f32 %v14917_v56, %v8408_v42  ;;  %v8660_v15 = vpop.permute.xlu0 %8659 }
 0x84f   : > { %v8742_v21 = vmul.f32 %v14905_v11, %v8406_v14  ;;  %v8407_v46 = vmax.f32 %v8359_v51, 0.0 }
 0x850   : > { %v8809_v23 = vadd.f32 %v8808_v63, %v8807_v10  ;;  %v8745_v2 = vmul.f32 %v14922_v29, %v8409_v22  ;;  %v8814_v31 = vsel %vm8770_vm5, %v8744_v58, 0.0  ;;  %v8665_v22 = vpop.permute.xlu1 %8664 }
 0x851   : > { %v8810_v62 = vsel %vm8770_vm5, %v8742_v21, 0.0  ;;  %v8743_v12 = vmul.f32 %v14910_v30, %v8407_v46  ;;  %v10941_v34 = vpop.f32.mrb[60].mxu1 }
 0x852   : > { %v8811_v4 = vadd.f32 %v8810_v62, %v8809_v23  ;;  %v8364_v40 = vadd.f32 %v10941_v34, %v14878_v37  ;;  %v8188_v35 = vpop.f32.mrb[61].mxu1  ;;  %v8816_v47 = vsel %vm8770_vm5, %v8745_v2, 0.0 }
 0x853   : > { %v8812_v11 = vsel %vm8770_vm5, %v8743_v12, 0.0  ;;  %v8362_v28 = vadd.f32 %v14878_v37, %v8188_v35  ;;  %v10942_v45 = vpop.f32.mrb[62].mxu1 }
 0x854   : > { %v8813_v36 = vadd.f32 %v8812_v11, %v8811_v4  ;;  %v8365_v56 = vadd.f32 %v10942_v45, %v14878_v37  ;;  %v8191_v44 = vpop.f32.mrb[63].mxu1  ;;  %v8412_v30 = vmax.f32 %v8364_v40, 0.0  ;;  %v8670_v4 = vpop.permute.xlu0 %8669 }
 0x855   : > { %v8410_v61 = vmax.f32 %v8362_v28, 0.0  ;;  %v8363_v1 = vadd.f32 %v14878_v37, %v8191_v44 }
 0x856   : > { %v8815_v0 = vadd.f32 %v8814_v31, %v8813_v36  ;;  %v8413_v7 = vmax.f32 %v8365_v56, 0.0  ;;  %v8748_v43 = vmul.f32 %v14944_v38, %v8412_v30  ;;  %v8675_v31 = vpop.permute.xlu1 %8674 }
 0x857   : > { %v8746_v29 = vmul.f32 %v14931_v9, %v8410_v61  ;;  %v8411_v55 = vmax.f32 %v8363_v1, 0.0 }
 0x858   : > { %v8817_v39 = vadd.f32 %v8816_v47, %v8815_v0  ;;  %v8749_v19 = vmul.f32 %v14949_v8, %v8413_v7  ;;  %v8822_v53 = vsel %vm8770_vm5, %v8748_v43, 0.0 }
 0x859   : > { %v8818_v17 = vsel %vm8770_vm5, %v8746_v29, 0.0  ;;  %v8747_v57 = vmul.f32 %v14935_v13, %v8411_v55  ;;  %v10945_v60 = vpop.f32.mrb[64].mxu1  ;;  %v8680_v29 = vpop.permute.xlu0 %8679 }
 0x85a   : > { %v8819_v33 = vadd.f32 %v8818_v17, %v8817_v39  ;;  %v8368_v26 = vadd.f32 %v10945_v60, %v14878_v37  ;;  %v8204_v3 = vpop.f32.mrb[65].mxu1  ;;  %v8824_v8 = vsel %vm8770_vm5, %v8749_v19, 0.0 }
 0x85b   : > { %v8820_v49 = vsel %vm8770_vm5, %v8747_v57, 0.0  ;;  %v8366_v9 = vadd.f32 %v14878_v37, %v8204_v3  ;;  %v10946_v6 = vpop.f32.mrb[66].mxu1 }
 0x85c   : > { %v8821_v54 = vadd.f32 %v8820_v49, %v8819_v33  ;;  %v8369_v38 = vadd.f32 %v10946_v6, %v14878_v37  ;;  %v8207_v16 = vpop.f32.mrb[67].mxu1  ;;  %v8416_v13 = vmax.f32 %v8368_v26, 0.0 }
 0x85d   : > { %v8414_v24 = vmax.f32 %v8366_v9, 0.0  ;;  %v8367_v5 = vadd.f32 %v14878_v37, %v8207_v16  ;;  %v8685_v9 = vpop.permute.xlu1 %8684 }
 0x85e   : > { %v8823_v27 = vadd.f32 %v8822_v53, %v8821_v54  ;;  %v8417_v41 = vmax.f32 %v8369_v38, 0.0  ;;  %v8752_v51 = vmul.f32 %v8635_v32, %v8416_v13  ;;  %v8690_v53 = vpop.permute.xlu0 %8689 }
 0x85f   : > { %v8750_v50 = vmul.f32 %v14956_v25, %v8414_v24  ;;  %v8415_v42 = vmax.f32 %v8367_v5, 0.0 }
 0x860   : > { %v8825_v14 = vadd.f32 %v8824_v8, %v8823_v27  ;;  %v8753_v62 = vmul.f32 %v8640_v18, %v8417_v41  ;;  %v8830_v2 = vsel %vm8770_vm5, %v8752_v51, 0.0 }
 0x861   : > { %v8826_v10 = vsel %vm8770_vm5, %v8750_v50, 0.0  ;;  %v8751_v63 = vmul.f32 %v14962_v48, %v8415_v42  ;;  %v10949_v21 = vpop.f32.mrb[68].mxu1 }
 0x862   : > { %v8827_v46 = vadd.f32 %v8826_v10, %v8825_v14  ;;  %v8372_v23 = vadd.f32 %v10949_v21, %v14878_v37  ;;  %v8220_v58 = vpop.f32.mrb[69].mxu1  ;;  %v8832_v36 = vsel %vm8770_vm5, %v8753_v62, 0.0 }
 0x863   : > { %v8828_v12 = vsel %vm8770_vm5, %v8751_v63, 0.0  ;;  %v8370_v34 = vadd.f32 %v14878_v37, %v8220_v58  ;;  %v10950_v25 = vpop.f32.mrb[70].mxu1  ;;  %v8695_v63 = vpop.permute.xlu1 %8694 }
 0x864   : > { %v8829_v40 = vadd.f32 %v8828_v12, %v8827_v46  ;;  %v8373_v32 = vadd.f32 %v10950_v25, %v14878_v37  ;;  %v8223_v35 = vpop.f32.mrb[71].mxu1  ;;  %v8420_v48 = vmax.f32 %v8372_v23, 0.0 }
 0x865   : > { %v8418_v11 = vmax.f32 %v8370_v34, 0.0  ;;  %v8371_v28 = vadd.f32 %v14878_v37, %v8223_v35  ;;  %v8700_v34 = vpop.permute.xlu0 %8699 }
 0x866   : > { %v8831_v45 = vadd.f32 %v8830_v2, %v8829_v40  ;;  %v8421_v56 = vmax.f32 %v8373_v32, 0.0  ;;  %v8756_v61 = vmul.f32 %v8655_v20, %v8420_v48 }
 0x867   : > { %v8754_v18 = vmul.f32 %v8645_v59, %v8418_v11  ;;  %v8419_v44 = vmax.f32 %v8371_v28, 0.0 }
 0x868   : > { %v8833_v30 = vadd.f32 %v8832_v36, %v8831_v45  ;;  %v8757_v43 = vmul.f32 %v8660_v15, %v8421_v56  ;;  %v8838_v3 = vsel %vm8770_vm5, %v8756_v61, 0.0  ;;  %v8705_v36 = vpop.permute.xlu1 %8704 }
 0x869   : > { %v8834_v1 = vsel %vm8770_vm5, %v8754_v18, 0.0  ;;  %v8755_v0 = vmul.f32 %v8650_v52, %v8419_v44  ;;  %v10953_v47 = vpop.f32.mrb[72].mxu1 }
 0x86a   : > { %v8835_v7 = vadd.f32 %v8834_v1, %v8833_v30  ;;  %v8376_v55 = vadd.f32 %v10953_v47, %v14878_v37  ;;  %v8236_v39 = vpop.f32.mrb[73].mxu1  ;;  %v8840_v20 = vsel %vm8770_vm5, %v8757_v43, 0.0 }
 0x86b   : > { %v8836_v17 = vsel %vm8770_vm5, %v8755_v0, 0.0  ;;  %v8374_v57 = vadd.f32 %v14878_v37, %v8236_v39  ;;  %v10954_v59 = vpop.f32.mrb[74].mxu1  ;;  %v8710_v0 = vpop.permute.xlu0 %8709 }
 0x86c   : > { %v8837_v60 = vadd.f32 %v8836_v17, %v8835_v7  ;;  %v8377_v33 = vadd.f32 %v10954_v59, %v14878_v37  ;;  %v8239_v26 = vpop.f32.mrb[75].mxu1  ;;  %v8424_v19 = vmax.f32 %v8376_v55, 0.0 }
 0x86d   : > { %v8422_v52 = vmax.f32 %v8374_v57, 0.0  ;;  %v8375_v49 = vadd.f32 %v14878_v37, %v8239_v26 }
 0x86e   : > { %v8839_v6 = vadd.f32 %v8838_v3, %v8837_v60  ;;  %v8425_v38 = vmax.f32 %v8377_v33, 0.0  ;;  %v8760_v24 = vmul.f32 %v8675_v31, %v8424_v19  ;;  %v8715_v3 = vpop.permute.xlu1 %8714 }
 0x86f   : > { %v8758_v54 = vmul.f32 %v8665_v22, %v8422_v52  ;;  %v8423_v16 = vmax.f32 %v8375_v49, 0.0 }
 0x870   : > { %v8841_v13 = vadd.f32 %v8840_v20, %v8839_v6  ;;  %v8761_v42 = vmul.f32 %v8680_v29, %v8425_v38  ;;  %v8846_v23 = vsel %vm8770_vm5, %v8760_v24, 0.0  ;;  %v8720_v6 = vpop.permute.xlu0 %8719 }
 0x871   : > { %v8842_v5 = vsel %vm8770_vm5, %v8758_v54, 0.0  ;;  %v8759_v15 = vmul.f32 %v8670_v4, %v8423_v16  ;;  %v10957_v27 = vpop.f32.mrb[76].mxu1 }
 0x872   : > { %v8843_v8 = vadd.f32 %v8842_v5, %v8841_v13  ;;  %v8380_v50 = vadd.f32 %v10957_v27, %v14878_v37  ;;  %v8252_v41 = vpop.f32.mrb[77].mxu1  ;;  %v8848_v4 = vsel %vm8770_vm5, %v8761_v42, 0.0 }
 0x873   : > { %v8844_v14 = vsel %vm8770_vm5, %v8759_v15, 0.0  ;;  %v8378_v51 = vadd.f32 %v14878_v37, %v8252_v41  ;;  %v10958_v10 = vpop.f32.mrb[78].mxu1 }
 0x874   : > { %v8845_v21 = vadd.f32 %v8844_v14, %v8843_v8  ;;  %v8381_v22 = vadd.f32 %v10958_v10, %v14878_v37  ;;  %v8255_v46 = vpop.f32.mrb[79].mxu1  ;;  %v8428_v58 = vmax.f32 %v8380_v50, 0.0 }
 0x875   : > { %v8426_v62 = vmax.f32 %v8378_v51, 0.0  ;;  %v8379_v12 = vadd.f32 %v14878_v37, %v8255_v46 }
 0x876   : > { %v8847_v25 = vadd.f32 %v8846_v23, %v8845_v21  ;;  %v8429_v32 = vmax.f32 %v8381_v22, 0.0  ;;  %v8764_v48 = vmul.f32 %v8695_v63, %v8428_v58 }
 0x877   : > { %v8762_v40 = vmul.f32 %v8685_v9, %v8426_v62  ;;  %v8427_v35 = vmax.f32 %v8379_v12, 0.0 }
 0x878   : > { %v8849_v2 = vadd.f32 %v8848_v4, %v8847_v25  ;;  %v8765_v31 = vmul.f32 %v8700_v34, %v8429_v32  ;;  %v8854_v55 = vsel %vm8770_vm5, %v8764_v48, 0.0 }
 0x879   : > { %v8850_v11 = vsel %vm8770_vm5, %v8762_v40, 0.0  ;;  %v8763_v28 = vmul.f32 %v8690_v53, %v8427_v35  ;;  %v10961_v45 = vpop.f32.mrb[80].mxu1 }
 0x87a   : > { %v8851_v18 = vadd.f32 %v8850_v11, %v8849_v2  ;;  %v8384_v56 = vadd.f32 %v10961_v45, %v14878_v37  ;;  %v8268_v44 = vpop.f32.mrb[81].mxu1  ;;  %v8856_v59 = vsel %vm8770_vm5, %v8765_v31, 0.0 }
 0x87b   : > { %v8852_v30 = vsel %vm8770_vm5, %v8763_v28, 0.0  ;;  %v8382_v61 = vadd.f32 %v14878_v37, %v8268_v44  ;;  %v10962_v1 = vpop.f32.mrb[82].mxu1 }
 0x87c   : > { %v8853_v47 = vadd.f32 %v8852_v30, %v8851_v18  ;;  %v8385_v29 = vadd.f32 %v10962_v1, %v14878_v37  ;;  %v8271_v7 = vpop.f32.mrb[83].mxu1  ;;  %v8432_v39 = vmax.f32 %v8384_v56, 0.0 }
 0x87d   : > { %v8430_v43 = vmax.f32 %v8382_v61, 0.0  ;;  %v8383_v17 = vadd.f32 %v14878_v37, %v8271_v7 }
 0x87e   : > { %v8855_v57 = vadd.f32 %v8854_v55, %v8853_v47  ;;  %v8433_v33 = vmax.f32 %v8385_v29, 0.0  ;;  %v8768_v52 = vmul.f32 %v8715_v3, %v8432_v39 }
 0x87f   : > { %v8766_v60 = vmul.f32 %v8705_v36, %v8430_v43  ;;  %v8431_v26 = vmax.f32 %v8383_v17, 0.0 }
 0x880   : > { %v8857_v19 = vadd.f32 %v8856_v59, %v8855_v57  ;;  %v8769_v54 = vmul.f32 %v8720_v6, %v8433_v33  ;;  %v8862_v16 = vsel %vm8770_vm5, %v8768_v52, 0.0 }
 0x881   : > { %v8858_v49 = vsel %vm8770_vm5, %v8766_v60, 0.0  ;;  %v8767_v9 = vmul.f32 %v8710_v0, %v8431_v26 }
 0x882   : > { %v8859_v20 = vadd.f32 %v8858_v49, %v8857_v19  ;;  %v8864_v13 = vsel %vm8770_vm5, %v8769_v54, 0.0 }
 0x883   : > { %v8860_v38 = vsel %vm8770_vm5, %v8767_v9, 0.0 }
 0x884   : > { %v8861_v37 = vadd.f32 %v8860_v38, %v8859_v20 }
 0x886   : > { %v8863_v53 = vadd.f32 %v8862_v16, %v8861_v37 }
 0x888   : > { %v8865_v24 = vadd.f32 %v8864_v13, %v8863_v53 }
 0x88a   : > { %v8866_v5 = vrot.slane %v8865_v24, 4 }
 0x88c   : > { %v8867_v15 = vadd.f32 %v8866_v5, %v8865_v24 }
 0x88e   : > { %v8868_v27 = vrot.slane %v8867_v15, 2 }
 0x890   : > { %v8869_v8 = vadd.f32 %v8868_v27, %v8867_v15 }
 0x892   : > { %v8870_v50 = vrot.slane %v8869_v8, 1 }
 0x894   : > { %v8871_v41 = vadd.f32 %v8870_v50, %v8869_v8 }
 0x896   : > { %8873 = vst.msk [vmem:[%s270_s22] sm:$0x1] %vm8872_vm6, %v8871_v41 }
 0x897   : > { %11850 = shalt.err (!%p11847_p3)
}
 0x898   : > { %s11851_s17 = scalar_lea.hbm %s15035_s9, 16  ;;  %s11855_s21 = scalar_lea.hbm %s15084_s7, 32 }
 0x899   : > { %p11852_p4 = scmp.ne.s32.totalorder %s15035_s9, %s11851_s17  ;;  %p11856_p9 = scmp.lt.u32.totalorder %s15035_s9, %s15084_s7 }
 0x89a   : > { %p11857_p10 = scmp.lt.u32.totalorder %s11855_s21, %s11851_s17  ;;  %p11859_p12 = scmp.lt.u32.totalorder %s11851_s17, %s15035_s9 }
 0x89b   : > { %p11853_p7 = pnand %p11852_p4, %p11981_p5 }
 0x89c   : > { %p11858_p11 = por %p11857_p10, %p11856_p9 }
 0x89d   : > { %p11854_p8 = pneg %p11853_p7 }
 0x89e   : > { %p11860_p13 = por %p11859_p12, %p11858_p11 }
 0x8a0   : > { %p11861_p0 = pnand %p11860_p13, %p11854_p8 }
 0x8a2   : > { %11864 = shalt.err (!%p11861_p0)
}
 0x8a3   : > { %11776 = dma.vmem_to_hbm [thread:$0]  (%p11981_p5), %s15037_s23, 16, %s15035_s9, %s8875_s13  }
 0x8a4 PF: > { %p11782_p1 = scmp.ge.s32.totalorder %s11899_s27, 2  ;;  %s8899_s29 = sand.u32 1, %s11887_s24  }
 0x8a5   : > { %s8900_s8 = scalar_lea.sflag [#allocation3], %s8899_s29 }
 0x8a6   : > { %p11779_p2 = pnand %p11782_p1, %p11985_p6 }
 0x8a8   : > { %11882 = dma.done.wait (!%p11779_p2), %s8900_s8, 16  }
 0x8a9   : > { %11884 = vsyncadd (!%p11779_p2), %s8900_s8, 4294967280  ;;  %p17_p3 = scmp.ge.s32.totalorder %s11968_s30, 4   ;;  %s15614_s24 = smov %s11891_s25 }
 0x8aa   : > { %s15615_s25 = smov %s11895_s26  ;;  %s15616_s26 = smov %s11979_s10 }
 0x8ab   : > { %s15617_s27 = smov %s11968_s30  ;;  %19 = sbr.rel (!%p17_p3) target bundleno = 3 (0x3), region = 99 }
 0x8b2   :  { %8904 = vsyncpa [#allocation3], 1 }
 0x8b3   :  { %8906 = vsyncpa [#allocation3 + $0x1], 1 }

</bundles_post_ra>
